<compile_context>
chip_gen: v7x
topology: tpu7x:2x2x1
jax: 0.10.0
libtpu: 0.0.40
codegen_flags: <defaults>
</compile_context>

<pallas_src>
import jax
import jax.numpy as jnp
from jax.experimental import pallas as pl
from jax.experimental.pallas import tpu as pltpu

TEMP = 0.66  # digit_temp, unused in the forward tensor compute
Z_PRIVATE = 50
Z_SHARED = 10
Z_IN = Z_PRIVATE + Z_SHARED      # 60
HIDDEN = 200
HIDDEN_PAD = 256                 # lane-padded hidden width (zero padding, exact)
OUT = 800


# ----------------------------------------------------------------------------
# Kernels
# ----------------------------------------------------------------------------
def _mlp(z_bf16, w_refs):
    """bf16 MXU operands, f32 accumulation, f32 ReLU, recast to bf16 per layer."""
    h = z_bf16
    for w_ref in w_refs[:-1]:
        acc = jnp.dot(h, w_ref[...], preferred_element_type=jnp.float32)
        h = jnp.maximum(acc, 0.0).astype(jnp.bfloat16)
    return jnp.dot(h, w_refs[-1][...], preferred_element_type=jnp.float32)


def decoder_b_loss_kernel(z_ref, img_ref,
                          w0, w1, w2, w3, w4, w5, w6,
                          recon_ref, loss_ref):
    recon = _mlp(z_ref[...], (w0, w1, w2, w3, w4, w5, w6))
    recon_ref[...] = recon.astype(recon_ref.dtype)
    diff = img_ref[...].astype(jnp.float32) - recon          # f32 elementwise
    loss_ref[...] = jnp.sum(diff * diff, axis=-1)[None, :]   # lane-dense (1, tm)


def decoder_b_recon_kernel(z_ref,
                           w0, w1, w2, w3, w4, w5, w6,
                           recon_ref):
    recon_ref[...] = _mlp(
        z_ref[...], (w0, w1, w2, w3, w4, w5, w6)).astype(recon_ref.dtype)


# ----------------------------------------------------------------------------
# Wrappers
# ----------------------------------------------------------------------------
def _row_tile(m):
    # 256 rows matches the v6e/v7x 256-wide MXU and guarantees >=2 grid steps
    # (megacore) once M >= 512; small problems fall back to a single 128-row tile.
    return 256 if m >= 512 else 128


def _pad_rows(x, m_pad):
    m = x.shape[0]
    if m == m_pad:
        return x
    return jnp.pad(x, ((0, m_pad - m),) + ((0, 0),) * (x.ndim - 1))


def prepare_weights(weights, dtype=jnp.bfloat16):
    """Pad hidden 200->256 with zeros (exact for a bias-free ReLU MLP), cast for MXU.

    `weights` are (in, out) matrices, i.e. PyTorch nn.Linear.weight transposed.
    """
    pad_h = HIDDEN_PAD - HIDDEN
    padded = [jnp.pad(weights[0], ((0, 0), (0, pad_h)))]          # (60, 256)
    for w in weights[1:-1]:
        padded.append(jnp.pad(w, ((0, pad_h), (0, pad_h))))       # (256, 256)
    padded.append(jnp.pad(weights[-1], ((0, pad_h), (0, 0))))     # (256, 800)
    return [w.astype(dtype) for w in padded]


def dec_hidden_and_loss(z, images, kernel_weights, *, tm=None):
    """z: (M, 60), images: (M, 800). Returns (recon (M,800) f32, loss (M,) f32)."""
    M = z.shape[0]
    if tm is None:
        tm = _row_tile(M)
    assert tm % 128 == 0, "row tile must be a lane multiple (128)"
    m_pad = ((M + tm - 1) // tm) * tm
    z_p = _pad_rows(z, m_pad).astype(jnp.bfloat16)
    img_p = _pad_rows(images, m_pad).astype(jnp.float32)

    w_specs = [pl.BlockSpec(w.shape, lambda i: (0, 0)) for w in kernel_weights]
    in_specs = [
        pl.BlockSpec((tm, Z_IN), lambda i: (i, 0)),
        pl.BlockSpec((tm, OUT), lambda i: (i, 0)),
    ] + w_specs
    out_specs = (
        pl.BlockSpec((tm, OUT), lambda i: (i, 0)),
        pl.BlockSpec((1, tm), lambda i: (0, i)),     # lane-dense loss
    )
    out_shape = (
        jax.ShapeDtypeStruct((m_pad, OUT), jnp.float32),
        jax.ShapeDtypeStruct((1, m_pad), jnp.float32),
    )

    recon, loss = pl.pallas_call(
        decoder_b_loss_kernel,
        out_shape=out_shape,
        grid_spec=pltpu.PrefetchScalarGridSpec(
            num_scalar_prefetch=0,
            grid=(m_pad // tm,),
            in_specs=in_specs,
            out_specs=out_specs,
        ),
        compiler_params=pltpu.CompilerParams(
            dimension_semantics=("parallel",),
        ),
    )(z_p, img_p, *kernel_weights)
    return recon[:M], loss[0, :M]


def dec_hidden(z, kernel_weights, *, tm=None):
    """Loss-free path (forward2): z (M, 60) -> recon (M, 800)."""
    M = z.shape[0]
    if tm is None:
        tm = _row_tile(M)
    assert tm % 128 == 0, "row tile must be a lane multiple (128)"
    m_pad = ((M + tm - 1) // tm) * tm
    z_p = _pad_rows(z, m_pad).astype(jnp.bfloat16)

    w_specs = [pl.BlockSpec(w.shape, lambda i: (0, 0)) for w in kernel_weights]
    in_specs = [pl.BlockSpec((tm, Z_IN), lambda i: (i, 0))] + w_specs

    recon = pl.pallas_call(
        decoder_b_recon_kernel,
        out_shape=jax.ShapeDtypeStruct((m_pad, OUT), jnp.float32),
        grid_spec=pltpu.PrefetchScalarGridSpec(
            num_scalar_prefetch=0,
            grid=(m_pad // tm,),
            in_specs=in_specs,
            out_specs=pl.BlockSpec((tm, OUT), lambda i: (i, 0)),
        ),
        compiler_params=pltpu.CompilerParams(
            dimension_semantics=("parallel",),
        ),
    )(z_p, *kernel_weights)
    return recon[:M]


# ----------------------------------------------------------------------------
# Parameter construction (deterministic kaiming-style init, no checkpoint).
# ----------------------------------------------------------------------------
def make_decoder_b_weights(seed=0):
    dims = [(Z_IN, HIDDEN)] + [(HIDDEN, HIDDEN)] * 5 + [(HIDDEN, OUT)]
    key = jax.random.PRNGKey(seed)
    keys = jax.random.split(key, len(dims))
    weights = []
    for k, (fan_in, fan_out) in zip(keys, dims):
        std = jnp.sqrt(2.0 / fan_in)   # kaiming normal, fan_in mode, relu gain
        weights.append(jax.random.normal(k, (fan_in, fan_out), jnp.float32) * std)
    return weights


# ----------------------------------------------------------------------------
# Forward wrappers mirroring DecoderB.forward / forward2.
# Both shared-key decodes are fused into one pallas_call.
# ----------------------------------------------------------------------------
def decoder_b_forward(z_private, shared, images, kernel_weights):
    """z_private: (S,B,50); shared: dict name -> (S,B,10); images: (S,B,800)."""
    S, B, _ = z_private.shape
    M = S * B
    names = list(shared.keys())
    z_all = jnp.concatenate(
        [jnp.concatenate([z_private, shared[n]], -1).reshape(M, Z_IN) for n in names],
        axis=0)
    img_flat = images.reshape(M, OUT)
    img_all = jnp.tile(img_flat, (len(names), 1))

    recon_all, loss_all = dec_hidden_and_loss(z_all, img_all, kernel_weights)

    results = {}
    for i, n in enumerate(names):
        results["images2_" + n] = (
            recon_all[i * M:(i + 1) * M].reshape(S, B, OUT),
            loss_all[i * M:(i + 1) * M].reshape(S, B),
        )
    return results


def decoder_b_forward2(z, kernel_weights):
    """z: (..., 60) -> recon (..., 800); no loss, no dummy-image traffic."""
    lead = z.shape[:-1]
    recon = dec_hidden(z.reshape(-1, Z_IN), kernel_weights)
    return recon.reshape(*lead, OUT)


# ----------------------------------------------------------------------------
# Reference (plain JAX, same bf16-operand / f32-accumulate numerics).
# ----------------------------------------------------------------------------
def reference_mlp(z, images, weights):
    h = z.astype(jnp.bfloat16)
    for w in weights[:-1]:
        acc = jnp.dot(h, w.astype(jnp.bfloat16), preferred_element_type=jnp.float32)
        h = jnp.maximum(acc, 0.0).astype(jnp.bfloat16)
    recon = jnp.dot(h, weights[-1].astype(jnp.bfloat16),
                    preferred_element_type=jnp.float32)
    loss = jnp.sum((images - recon) ** 2, axis=-1)
    return recon, loss


if __name__ == "__main__":
    key = jax.random.PRNGKey(0)
    k_priv, k_sh1, k_sh2, k_img = jax.random.split(key, 4)

    num_samples, batch = 2, 8   # M = 16 per key; both keys fused -> 32 rows
    z_private = jax.random.normal(k_priv, (num_samples, batch, Z_PRIVATE), jnp.float32)
    shared = {
        "own": jax.random.normal(k_sh1, (num_samples, batch, Z_SHARED), jnp.float32),
        "cross": jax.random.normal(k_sh2, (num_samples, batch, Z_SHARED), jnp.float32),
    }
    images = jax.random.uniform(k_img, (num_samples, batch, OUT), jnp.float32)

    weights = make_decoder_b_weights(seed=0)
    kernel_weights = prepare_weights(weights)   # bf16, hidden padded 200->256

    out = decoder_b_forward(z_private, shared, images, kernel_weights)
    for name, (recon, loss) in out.items():
        jax.block_until_ready(recon)
        jax.block_until_ready(loss)

    # validate against plain-JAX reference (matching bf16 MXU numerics)
    img_flat = images.reshape(-1, OUT)
    for name, z_shared in shared.items():
        z = jnp.concatenate([z_private, z_shared], -1).reshape(-1, Z_IN)
        ref_recon, ref_loss = reference_mlp(z, img_flat, weights)
        got_recon, got_loss = out["images2_" + name]
        assert jnp.allclose(got_recon.reshape(-1, OUT), ref_recon,
                            atol=2e-2, rtol=2e-2), name
        assert jnp.allclose(got_loss.reshape(-1), ref_loss,
                            atol=1.0, rtol=2e-2), name

    # forward2 (loss-free path) smoke test + check
    z_all = jnp.concatenate([z_private, shared["own"]], -1)
    r2 = decoder_b_forward2(z_all, kernel_weights)
    jax.block_until_ready(r2)
    ref2, _ = reference_mlp(z_all.reshape(-1, Z_IN),
                            jnp.zeros((num_samples * batch, OUT), jnp.float32),
                            weights)
    assert jnp.allclose(r2.reshape(-1, OUT), ref2, atol=2e-2, rtol=2e-2)

    print("KERNEL_OK")
</pallas_src>

<mosaic_0001>
module attributes {stable_mosaic.version = 11 : i64} {
  func.func @decoder_b_loss_kernel(%arg0: i32, %arg1: memref<128x60xbf16, #tpu.memory_space<vmem>>, %arg2: memref<128x800xf32, #tpu.memory_space<vmem>>, %arg3: memref<60x256xbf16, #tpu.memory_space<vmem>>, %arg4: memref<256x256xbf16, #tpu.memory_space<vmem>>, %arg5: memref<256x256xbf16, #tpu.memory_space<vmem>>, %arg6: memref<256x256xbf16, #tpu.memory_space<vmem>>, %arg7: memref<256x256xbf16, #tpu.memory_space<vmem>>, %arg8: memref<256x256xbf16, #tpu.memory_space<vmem>>, %arg9: memref<256x800xbf16, #tpu.memory_space<vmem>>, %arg10: memref<128x800xf32, #tpu.memory_space<vmem>>, %arg11: memref<1x128xf32, #tpu.memory_space<vmem>>) attributes {dimension_semantics = [#tpu.dimension_semantics<parallel>], iteration_bounds = array<i64: 1>, scalar_prefetch = 0 : i64, scratch_operands = 0 : i64, tpu.core_type = #tpu.core_type<tc>, window_params = [{transform_indices = @transform_0, window_bounds = array<i64: 128, 60>}, {transform_indices = @transform_1, window_bounds = array<i64: 128, 800>}, {pipeline_mode = #tpu.pipeline_mode<synchronous>, transform_indices = @transform_2, window_bounds = array<i64: 60, 256>}, {pipeline_mode = #tpu.pipeline_mode<synchronous>, transform_indices = @transform_3, window_bounds = array<i64: 256, 256>}, {pipeline_mode = #tpu.pipeline_mode<synchronous>, transform_indices = @transform_4, window_bounds = array<i64: 256, 256>}, {pipeline_mode = #tpu.pipeline_mode<synchronous>, transform_indices = @transform_5, window_bounds = array<i64: 256, 256>}, {pipeline_mode = #tpu.pipeline_mode<synchronous>, transform_indices = @transform_6, window_bounds = array<i64: 256, 256>}, {pipeline_mode = #tpu.pipeline_mode<synchronous>, transform_indices = @transform_7, window_bounds = array<i64: 256, 256>}, {pipeline_mode = #tpu.pipeline_mode<synchronous>, transform_indices = @transform_8, window_bounds = array<i64: 256, 800>}, {transform_indices = @transform_9, window_bounds = array<i64: 128, 800>}, {transform_indices = @transform_10, window_bounds = array<i64: 1, 128>}]} {
    %c0 = arith.constant 0 : index
    %c0_0 = arith.constant 0 : index
    %0 = vector.load %arg1[%c0, %c0_0] : memref<128x60xbf16, #tpu.memory_space<vmem>>, vector<128x60xbf16>
    %c0_1 = arith.constant 0 : index
    %c0_2 = arith.constant 0 : index
    %1 = vector.load %arg3[%c0_1, %c0_2] : memref<60x256xbf16, #tpu.memory_space<vmem>>, vector<60x256xbf16>
    %cst = arith.constant dense<0.000000e+00> : vector<128x256xf32>
    %2 = tpu.matmul %0, %1, %cst {dimension_numbers = #tpu.dot_dimension_numbers<[1], [0], [0], [1], [0, 0, 1, 1], [], []>} : vector<128x60xbf16>, vector<60x256xbf16>, vector<128x256xf32> -> vector<128x256xf32>
    %cst_3 = arith.constant 0.000000e+00 : f32
    %3 = vector.broadcast %cst_3 : f32 to vector<128x256xf32>
    %4 = arith.maximumf %2, %3 : vector<128x256xf32>
    %5 = arith.truncf %4 : vector<128x256xf32> to vector<128x256xbf16>
    %c0_4 = arith.constant 0 : index
    %c0_5 = arith.constant 0 : index
    %6 = vector.load %arg4[%c0_4, %c0_5] : memref<256x256xbf16, #tpu.memory_space<vmem>>, vector<256x256xbf16>
    %cst_6 = arith.constant dense<0.000000e+00> : vector<128x256xf32>
    %7 = tpu.matmul %5, %6, %cst_6 {dimension_numbers = #tpu.dot_dimension_numbers<[1], [0], [0], [1], [0, 0, 1, 1], [], []>} : vector<128x256xbf16>, vector<256x256xbf16>, vector<128x256xf32> -> vector<128x256xf32>
    %cst_7 = arith.constant 0.000000e+00 : f32
    %8 = vector.broadcast %cst_7 : f32 to vector<128x256xf32>
    %9 = arith.maximumf %7, %8 : vector<128x256xf32>
    %10 = arith.truncf %9 : vector<128x256xf32> to vector<128x256xbf16>
    %c0_8 = arith.constant 0 : index
    %c0_9 = arith.constant 0 : index
    %11 = vector.load %arg5[%c0_8, %c0_9] : memref<256x256xbf16, #tpu.memory_space<vmem>>, vector<256x256xbf16>
    %cst_10 = arith.constant dense<0.000000e+00> : vector<128x256xf32>
    %12 = tpu.matmul %10, %11, %cst_10 {dimension_numbers = #tpu.dot_dimension_numbers<[1], [0], [0], [1], [0, 0, 1, 1], [], []>} : vector<128x256xbf16>, vector<256x256xbf16>, vector<128x256xf32> -> vector<128x256xf32>
    %cst_11 = arith.constant 0.000000e+00 : f32
    %13 = vector.broadcast %cst_11 : f32 to vector<128x256xf32>
    %14 = arith.maximumf %12, %13 : vector<128x256xf32>
    %15 = arith.truncf %14 : vector<128x256xf32> to vector<128x256xbf16>
    %c0_12 = arith.constant 0 : index
    %c0_13 = arith.constant 0 : index
    %16 = vector.load %arg6[%c0_12, %c0_13] : memref<256x256xbf16, #tpu.memory_space<vmem>>, vector<256x256xbf16>
    %cst_14 = arith.constant dense<0.000000e+00> : vector<128x256xf32>
    %17 = tpu.matmul %15, %16, %cst_14 {dimension_numbers = #tpu.dot_dimension_numbers<[1], [0], [0], [1], [0, 0, 1, 1], [], []>} : vector<128x256xbf16>, vector<256x256xbf16>, vector<128x256xf32> -> vector<128x256xf32>
    %cst_15 = arith.constant 0.000000e+00 : f32
    %18 = vector.broadcast %cst_15 : f32 to vector<128x256xf32>
    %19 = arith.maximumf %17, %18 : vector<128x256xf32>
    %20 = arith.truncf %19 : vector<128x256xf32> to vector<128x256xbf16>
    %c0_16 = arith.constant 0 : index
    %c0_17 = arith.constant 0 : index
    %21 = vector.load %arg7[%c0_16, %c0_17] : memref<256x256xbf16, #tpu.memory_space<vmem>>, vector<256x256xbf16>
    %cst_18 = arith.constant dense<0.000000e+00> : vector<128x256xf32>
    %22 = tpu.matmul %20, %21, %cst_18 {dimension_numbers = #tpu.dot_dimension_numbers<[1], [0], [0], [1], [0, 0, 1, 1], [], []>} : vector<128x256xbf16>, vector<256x256xbf16>, vector<128x256xf32> -> vector<128x256xf32>
    %cst_19 = arith.constant 0.000000e+00 : f32
    %23 = vector.broadcast %cst_19 : f32 to vector<128x256xf32>
    %24 = arith.maximumf %22, %23 : vector<128x256xf32>
    %25 = arith.truncf %24 : vector<128x256xf32> to vector<128x256xbf16>
    %c0_20 = arith.constant 0 : index
    %c0_21 = arith.constant 0 : index
    %26 = vector.load %arg8[%c0_20, %c0_21] : memref<256x256xbf16, #tpu.memory_space<vmem>>, vector<256x256xbf16>
    %cst_22 = arith.constant dense<0.000000e+00> : vector<128x256xf32>
    %27 = tpu.matmul %25, %26, %cst_22 {dimension_numbers = #tpu.dot_dimension_numbers<[1], [0], [0], [1], [0, 0, 1, 1], [], []>} : vector<128x256xbf16>, vector<256x256xbf16>, vector<128x256xf32> -> vector<128x256xf32>
    %cst_23 = arith.constant 0.000000e+00 : f32
    %28 = vector.broadcast %cst_23 : f32 to vector<128x256xf32>
    %29 = arith.maximumf %27, %28 : vector<128x256xf32>
    %30 = arith.truncf %29 : vector<128x256xf32> to vector<128x256xbf16>
    %c0_24 = arith.constant 0 : index
    %c0_25 = arith.constant 0 : index
    %31 = vector.load %arg9[%c0_24, %c0_25] : memref<256x800xbf16, #tpu.memory_space<vmem>>, vector<256x800xbf16>
    %cst_26 = arith.constant dense<0.000000e+00> : vector<128x800xf32>
    %32 = tpu.matmul %30, %31, %cst_26 {dimension_numbers = #tpu.dot_dimension_numbers<[1], [0], [0], [1], [0, 0, 1, 1], [], []>} : vector<128x256xbf16>, vector<256x800xbf16>, vector<128x800xf32> -> vector<128x800xf32>
    %c0_27 = arith.constant 0 : index
    %c0_28 = arith.constant 0 : index
    %33 = vector.load %arg10[%c0_27, %c0_28] : memref<128x800xf32, #tpu.memory_space<vmem>>, vector<128x800xf32>
    tpu.vector_store %arg10[%c0_27, %c0_28], %32 {strides = array<i32>} : memref<128x800xf32, #tpu.memory_space<vmem>>, vector<128x800xf32>,
    %c0_29 = arith.constant 0 : index
    %c0_30 = arith.constant 0 : index
    %34 = vector.load %arg2[%c0_29, %c0_30] : memref<128x800xf32, #tpu.memory_space<vmem>>, vector<128x800xf32>
    %35 = arith.subf %34, %32 : vector<128x800xf32>
    %36 = arith.mulf %35, %35 : vector<128x800xf32>
    %cst_31 = arith.constant dense<0.000000e+00> : vector<128xf32>
    %37 = vector.multi_reduction <add>, %36, %cst_31 [1] : vector<128x800xf32> to vector<128xf32>
    %38 = vector.shape_cast %37 : vector<128xf32> to vector<1x128xf32>
    %c0_32 = arith.constant 0 : index
    %c0_33 = arith.constant 0 : index
    %39 = vector.load %arg11[%c0_32, %c0_33] : memref<1x128xf32, #tpu.memory_space<vmem>>, vector<1x128xf32>
    tpu.vector_store %arg11[%c0_32, %c0_33], %38 {strides = array<i32>} : memref<1x128xf32, #tpu.memory_space<vmem>>, vector<1x128xf32>,
    return
  }
  func.func @transform_0(%arg0: i32) -> (i32, i32) {
    %c0_i32 = arith.constant 0 : i32
    %c0_i32_0 = arith.constant 0 : i32
    return %arg0, %c0_i32 : i32, i32
  }
  func.func @transform_1(%arg0: i32) -> (i32, i32) {
    %c0_i32 = arith.constant 0 : i32
    %c0_i32_0 = arith.constant 0 : i32
    return %arg0, %c0_i32 : i32, i32
  }
  func.func @transform_2(%arg0: i32) -> (i32, i32) {
    %c0_i32 = arith.constant 0 : i32
    %c0_i32_0 = arith.constant 0 : i32
    %c0_i32_1 = arith.constant 0 : i32
    return %c0_i32, %c0_i32_0 : i32, i32
  }
  func.func @transform_3(%arg0: i32) -> (i32, i32) {
    %c0_i32 = arith.constant 0 : i32
    %c0_i32_0 = arith.constant 0 : i32
    %c0_i32_1 = arith.constant 0 : i32
    return %c0_i32, %c0_i32_0 : i32, i32
  }
  func.func @transform_4(%arg0: i32) -> (i32, i32) {
    %c0_i32 = arith.constant 0 : i32
    %c0_i32_0 = arith.constant 0 : i32
    %c0_i32_1 = arith.constant 0 : i32
    return %c0_i32, %c0_i32_0 : i32, i32
  }
  func.func @transform_5(%arg0: i32) -> (i32, i32) {
    %c0_i32 = arith.constant 0 : i32
    %c0_i32_0 = arith.constant 0 : i32
    %c0_i32_1 = arith.constant 0 : i32
    return %c0_i32, %c0_i32_0 : i32, i32
  }
  func.func @transform_6(%arg0: i32) -> (i32, i32) {
    %c0_i32 = arith.constant 0 : i32
    %c0_i32_0 = arith.constant 0 : i32
    %c0_i32_1 = arith.constant 0 : i32
    return %c0_i32, %c0_i32_0 : i32, i32
  }
  func.func @transform_7(%arg0: i32) -> (i32, i32) {
    %c0_i32 = arith.constant 0 : i32
    %c0_i32_0 = arith.constant 0 : i32
    %c0_i32_1 = arith.constant 0 : i32
    return %c0_i32, %c0_i32_0 : i32, i32
  }
  func.func @transform_8(%arg0: i32) -> (i32, i32) {
    %c0_i32 = arith.constant 0 : i32
    %c0_i32_0 = arith.constant 0 : i32
    %c0_i32_1 = arith.constant 0 : i32
    return %c0_i32, %c0_i32_0 : i32, i32
  }
  func.func @transform_9(%arg0: i32) -> (i32, i32) {
    %c0_i32 = arith.constant 0 : i32
    %c0_i32_0 = arith.constant 0 : i32
    return %arg0, %c0_i32 : i32, i32
  }
  func.func @transform_10(%arg0: i32) -> (i32, i32) {
    %c0_i32 = arith.constant 0 : i32
    %c0_i32_0 = arith.constant 0 : i32
    return %c0_i32, %arg0 : i32, i32
  }
}

</mosaic_0001>

<bundles_post_ra>
// kernel: tpu_custom_call.1
= control target key start
LH: loop header
LB: loop body
LE: loop exit
PB: predicated region body
PF: predicated region fallthrough
CT: control target
= control target key end

     0   :  { %v4799_v2 = vmov 0   ;;  %vm163_vm0 = vcmask 1045504   ;;  %vm138_vm1 = vcmask 490496   ;;  %s6760_s0 = inlined_call_operand.vmem [shape: bf16[128,60], index: 0, kind: input, shape index: {}]   ;;  %s6761_s1 = inlined_call_operand.vmem [shape: f32[128,800], index: 1, kind: input, shape index: {}]   ;;  %s6762_s2 = inlined_call_operand.vmem [shape: bf16[60,256], index: 2, kind: input, shape index: {}]   ;;  %s6763_s3 = inlined_call_operand.vmem [shape: bf16[256,256], index: 3, kind: input, shape index: {}]   ;;  %s6764_s4 = inlined_call_operand.vmem [shape: bf16[256,256], index: 4, kind: input, shape index: {}]   ;;  %s6765_s5 = inlined_call_operand.vmem [shape: bf16[256,256], index: 5, kind: input, shape index: {}]   ;;  %s6766_s6 = inlined_call_operand.vmem [shape: bf16[256,256], index: 6, kind: input, shape index: {}]   ;;  %s6767_s7 = inlined_call_operand.vmem [shape: bf16[256,256], index: 7, kind: input, shape index: {}]   ;;  %s6768_s8 = inlined_call_operand.vmem [shape: bf16[256,800], index: 8, kind: input, shape index: {}]   ;;  %s6769_s9 = inlined_call_operand.vmem [shape: f32[128,800], index: 9, kind: output, shape index: {0}]   ;;  %s6770_s10 = inlined_call_operand.hbm [shape: f32[1,128], index: 10, kind: output, shape index: {1}]  }
   0x1   :  { %v4355_v0 = vld [vmem:[%s6762_s2 + $0x4] ss:$8 sps:$4 sm:$0xff]   ;;  %v4357_v1 = vld [vmem:[%s6762_s2] ss:$8 sps:$4 sm:$0xff]   ;;  %202 = vmatprep.mubr.bf16.mxu0 %v4799_v2  ;;  %v4358_v3 = vld [vmem:[%s6762_s2 + $0x14] ss:$8 sps:$4 sm:$0xff]  }
   0x2   :  { %170 = vmatprep.subr.bf16.mxu0 %v4355_v0  ;;  %v4360_v4 = vld [vmem:[%s6762_s2 + $0x10] ss:$8 sps:$4 sm:$0xff]   ;;  %v4361_v5 = vld [vmem:[%s6762_s2 + $0x24] ss:$8 sps:$4 sm:$0xff]   ;;  %v4363_v8 = vld [vmem:[%s6762_s2 + $0x20] ss:$8 sps:$4 sm:$0xff]  }
   0x3   :  { %171 = vmatpush1.bf16.msra.mxu0 %v4357_v1  ;;  %v4364_v6 = vld [vmem:[%s6762_s2 + $0x34] ss:$8 sps:$4 sm:$0x3f]   ;;  %v4366_v7 = vld [vmem:[%s6762_s2 + $0x30] ss:$8 sps:$4 sm:$0x3f]  }
   0x4   :  { %172 = vmatprep.subr.bf16.mxu0 %v4358_v3  ;;  %v165_v9 = vsel %vm163_vm0, %v4366_v7, 0  ;;  %v4367_v10 = vld [vmem:[%s6760_s0] sm:$0xff]   ;;  %v4378_v13 = vld [vmem:[%s6763_s3 + $0x14] ss:$8 sps:$4 sm:$0xff]   ;;  %v4380_v14 = vld [vmem:[%s6763_s3 + $0x10] ss:$8 sps:$4 sm:$0xff]  }
   0x5   :  { %v4375_v11 = vld [vmem:[%s6763_s3 + $0x4] ss:$8 sps:$4 sm:$0xff]   ;;  %v4377_v12 = vld [vmem:[%s6763_s3] ss:$8 sps:$4 sm:$0xff]   ;;  %v4384_v18 = vld [vmem:[%s6763_s3 + $0x34] ss:$8 sps:$4 sm:$0xff]  }
   0x6   :  { %523 = vmatprep.subr.bf16.mxu1 %v4375_v11  ;;  %v4381_v15 = vld [vmem:[%s6763_s3 + $0x24] ss:$8 sps:$4 sm:$0xff]   ;;  %v4383_v16 = vld [vmem:[%s6763_s3 + $0x20] ss:$8 sps:$4 sm:$0xff]   ;;  %v4386_v19 = vld [vmem:[%s6763_s3 + $0x30] ss:$8 sps:$4 sm:$0xff]  }
   0x7   :  { %173 = vmatpush1.bf16.msra.mxu0 %v4360_v4  ;;  %524 = vmatpush1.bf16.msra.mxu1 %v4377_v12  ;;  %v4368_v17 = vld [vmem:[%s6760_s0 + $0x8] sm:$0xff]   ;;  %v4369_v22 = vld [vmem:[%s6760_s0 + $0x10] sm:$0xff]   ;;  %v4370_v27 = vld [vmem:[%s6760_s0 + $0x18] sm:$0xff]  }
   0x8   :  { %174 = vmatprep.subr.bf16.mxu0 %v4361_v5  ;;  %525 = vmatprep.subr.bf16.mxu1 %v4378_v13  ;;  %v4387_v20 = vld [vmem:[%s6763_s3 + $0x44] ss:$8 sps:$4 sm:$0xff]   ;;  %v4389_v21 = vld [vmem:[%s6763_s3 + $0x40] ss:$8 sps:$4 sm:$0xff]   ;;  %v4390_v23 = vld [vmem:[%s6763_s3 + $0x54] ss:$8 sps:$4 sm:$0xff]  }
   0x9   :  { %v4392_v24 = vld [vmem:[%s6763_s3 + $0x50] ss:$8 sps:$4 sm:$0xff]   ;;  %v4393_v25 = vld [vmem:[%s6763_s3 + $0x64] ss:$8 sps:$4 sm:$0xff]   ;;  %v4395_v26 = vld [vmem:[%s6763_s3 + $0x60] ss:$8 sps:$4 sm:$0xff]  }
   0xa   :  { %v4396_v28 = vld [vmem:[%s6763_s3 + $0x74] ss:$8 sps:$4 sm:$0xff]   ;;  %v4398_v29 = vld [vmem:[%s6763_s3 + $0x70] ss:$8 sps:$4 sm:$0xff]   ;;  %v4399_v30 = vld [vmem:[%s6763_s3 + $0x84] ss:$8 sps:$4 sm:$0xff]  }
   0xb   :  { %175 = vmatpush1.bf16.msra.mxu0 %v4363_v8  ;;  %526 = vmatpush1.bf16.msra.mxu1 %v4380_v14  ;;  %v4401_v31 = vld [vmem:[%s6763_s3 + $0x80] ss:$8 sps:$4 sm:$0xff]   ;;  %v4402_v33 = vld [vmem:[%s6763_s3 + $0x94] ss:$8 sps:$4 sm:$0xff]   ;;  %v4404_v34 = vld [vmem:[%s6763_s3 + $0x90] ss:$8 sps:$4 sm:$0xff]  }
   0xc   :  { %3992 = vmatprep.subr.msk.bf16.mxu0 %vm163_vm0, %v4364_v6  ;;  %527 = vmatprep.subr.bf16.mxu1 %v4381_v15  ;;  %v4371_v32 = vld [vmem:[%s6760_s0 + $0x20] sm:$0xff]   ;;  %v4372_v37 = vld [vmem:[%s6760_s0 + $0x28] sm:$0xff]   ;;  %v4408_v38 = vld [vmem:[%s6763_s3 + $0xb4] ss:$8 sps:$4 sm:$0xff]  }
   0xd   :  { %v4405_v35 = vld [vmem:[%s6763_s3 + $0xa4] ss:$8 sps:$4 sm:$0xff]   ;;  %v4407_v36 = vld [vmem:[%s6763_s3 + $0xa0] ss:$8 sps:$4 sm:$0xff]   ;;  %v4410_v39 = vld [vmem:[%s6763_s3 + $0xb0] ss:$8 sps:$4 sm:$0xff]  }
   0xe   :  { %v4411_v40 = vld [vmem:[%s6763_s3 + $0xc4] ss:$8 sps:$4 sm:$0xff]   ;;  %v4413_v41 = vld [vmem:[%s6763_s3 + $0xc0] ss:$8 sps:$4 sm:$0xff]   ;;  %v4373_v42 = vld [vmem:[%s6760_s0 + $0x30] sm:$0xff]  }
   0xf   :  { %177 = vmatpush1.bf16.msra.mxu0 %v165_v9  ;;  %528 = vmatpush1.bf16.msra.mxu1 %v4383_v16  ;;  %v4414_v43 = vld [vmem:[%s6763_s3 + $0xd4] ss:$8 sps:$4 sm:$0xff]   ;;  %v4416_v44 = vld [vmem:[%s6763_s3 + $0xd0] ss:$8 sps:$4 sm:$0xff]   ;;  %v4417_v46 = vld [vmem:[%s6763_s3 + $0xe4] ss:$8 sps:$4 sm:$0xff]  }
  0x10   :  { %529 = vmatprep.subr.bf16.mxu1 %v4384_v18  ;;  %v4374_v45 = vld [vmem:[%s6760_s0 + $0x38] sm:$0xff]   ;;  %v4419_v47 = vld [vmem:[%s6763_s3 + $0xe0] ss:$8 sps:$4 sm:$0xff]  }
  0x11   :  { %v4420_v48 = vld [vmem:[%s6763_s3 + $0xf4] ss:$8 sps:$4 sm:$0xff]   ;;  %v4422_v49 = vld [vmem:[%s6763_s3 + $0xf0] ss:$8 sps:$4 sm:$0xff]  }
  0x12   :  { %3993 = vmatmul.mubr.msk.bf16.vlgmr.msra.gmra.mrb[0].mxu0 %vm138_vm1, %v4367_v10 }
  0x13   :  { %212 = vmatprep.mubr.bf16.mxu0 %v4799_v2  ;;  %530 = vmatpush1.bf16.msra.mxu1 %v4386_v19 }
  0x14   :  { %531 = vmatprep.subr.bf16.mxu1 %v4387_v20 }
  0x17   :  { %532 = vmatpush1.bf16.msra.mxu1 %v4389_v21 }
  0x18   :  { %533 = vmatprep.subr.bf16.mxu1 %v4390_v23 }
  0x1a   :  { %3994 = vmatmul.mubr.msk.bf16.gmra.mrb[4].mxu0 %vm138_vm1, %v4368_v17 }
  0x1b   :  { %222 = vmatprep.mubr.bf16.mxu0 %v4799_v2  ;;  %534 = vmatpush1.bf16.msra.mxu1 %v4392_v24 }
  0x1c   :  { %535 = vmatprep.subr.bf16.mxu1 %v4393_v25 }
  0x1f   :  { %536 = vmatpush1.bf16.msra.mxu1 %v4395_v26 }
  0x20   :  { %537 = vmatprep.subr.bf16.mxu1 %v4396_v28 }
  0x22   :  { %3995 = vmatmul.mubr.msk.bf16.gmra.mrb[8].mxu0 %vm138_vm1, %v4369_v22 }
  0x23   :  { %232 = vmatprep.mubr.bf16.mxu0 %v4799_v2  ;;  %538 = vmatpush1.bf16.msra.mxu1 %v4398_v29 }
  0x24   :  { %539 = vmatprep.subr.bf16.mxu1 %v4399_v30 }
  0x27   :  { %540 = vmatpush1.bf16.msra.mxu1 %v4401_v31 }
  0x28   :  { %541 = vmatprep.subr.bf16.mxu1 %v4402_v33 }
  0x2a   :  { %3996 = vmatmul.mubr.msk.bf16.gmra.mrb[12].mxu0 %vm138_vm1, %v4370_v27 }
  0x2b   :  { %242 = vmatprep.mubr.bf16.mxu0 %v4799_v2  ;;  %542 = vmatpush1.bf16.msra.mxu1 %v4404_v34 }
  0x2c   :  { %543 = vmatprep.subr.bf16.mxu1 %v4405_v35 }
  0x2f   :  { %544 = vmatpush1.bf16.msra.mxu1 %v4407_v36 }
  0x30   :  { %545 = vmatprep.subr.bf16.mxu1 %v4408_v38 }
  0x32   :  { %3997 = vmatmul.mubr.msk.bf16.gmra.mrb[16].mxu0 %vm138_vm1, %v4371_v32 }
  0x33   :  { %252 = vmatprep.mubr.bf16.mxu0 %v4799_v2  ;;  %546 = vmatpush1.bf16.msra.mxu1 %v4410_v39 }
  0x34   :  { %547 = vmatprep.subr.bf16.mxu1 %v4411_v40 }
  0x37   :  { %548 = vmatpush1.bf16.msra.mxu1 %v4413_v41 }
  0x38   :  { %549 = vmatprep.subr.bf16.mxu1 %v4414_v43 }
  0x3a   :  { %3998 = vmatmul.mubr.msk.bf16.gmra.mrb[20].mxu0 %vm138_vm1, %v4372_v37 }
  0x3b   :  { %262 = vmatprep.mubr.bf16.mxu0 %v4799_v2  ;;  %550 = vmatpush1.bf16.msra.mxu1 %v4416_v44 }
  0x3c   :  { %551 = vmatprep.subr.bf16.mxu1 %v4417_v46 }
  0x3f   :  { %552 = vmatpush1.bf16.msra.mxu1 %v4419_v47 }
  0x40   :  { %553 = vmatprep.subr.bf16.mxu1 %v4420_v48 }
  0x42   :  { %3999 = vmatmul.mubr.msk.bf16.gmra.mrb[24].mxu0 %vm138_vm1, %v4373_v42 }
  0x43   :  { %272 = vmatprep.mubr.bf16.mxu0 %v4799_v2  ;;  %554 = vmatpush1.bf16.msra.mxu1 %v4422_v49 }
  0x4a   :  { %4000 = vmatmul.mubr.msk.bf16.gmra.mrb[28].mxu0 %vm138_vm1, %v4374_v45 }
  0x4b   :  { %16 = vsyncpa [#allocation3], 0  ;;  %v4423_v50 = vld [vmem:[%s6764_s4] ss:$8 sps:$4 sm:$0xff]   ;;  %v4425_v51 = vld [vmem:[%s6764_s4 + $0x4] ss:$8 sps:$4 sm:$0xff]  }
  0x4c   :  { %v4428_v52 = vld [vmem:[%s6764_s4 + $0x14] ss:$8 sps:$4 sm:$0xff]   ;;  %876 = vmatprep.subr.bf16.mxu0 %v4425_v51  ;;  %v4426_v53 = vld [vmem:[%s6764_s4 + $0x10] ss:$8 sps:$4 sm:$0xff]   ;;  %v4431_v54 = vld [vmem:[%s6764_s4 + $0x24] ss:$8 sps:$4 sm:$0xff]  }
  0x4d   :  { %877 = vmatpush1.bf16.msra.mxu0 %v4423_v50  ;;  %v4429_v55 = vld [vmem:[%s6764_s4 + $0x20] ss:$8 sps:$4 sm:$0xff]   ;;  %v4434_v56 = vld [vmem:[%s6764_s4 + $0x34] ss:$8 sps:$4 sm:$0xff]   ;;  %v4432_v57 = vld [vmem:[%s6764_s4 + $0x30] ss:$8 sps:$4 sm:$0xff]  }
  0x4e   :  { %878 = vmatprep.subr.bf16.mxu0 %v4428_v52  ;;  %v4437_v58 = vld [vmem:[%s6764_s4 + $0x44] ss:$8 sps:$4 sm:$0xff]   ;;  %v4435_v59 = vld [vmem:[%s6764_s4 + $0x40] ss:$8 sps:$4 sm:$0xff]   ;;  %v4440_v60 = vld [vmem:[%s6764_s4 + $0x54] ss:$8 sps:$4 sm:$0xff]  }
  0x4f   :  { %v4438_v61 = vld [vmem:[%s6764_s4 + $0x50] ss:$8 sps:$4 sm:$0xff]   ;;  %v4443_v62 = vld [vmem:[%s6764_s4 + $0x64] ss:$8 sps:$4 sm:$0xff]   ;;  %v4441_v63 = vld [vmem:[%s6764_s4 + $0x60] ss:$8 sps:$4 sm:$0xff]  }
  0x50   :  { %v4446_v0 = vld [vmem:[%s6764_s4 + $0x74] ss:$8 sps:$4 sm:$0xff]   ;;  %v4444_v1 = vld [vmem:[%s6764_s4 + $0x70] ss:$8 sps:$4 sm:$0xff]   ;;  %v4449_v2 = vld [vmem:[%s6764_s4 + $0x84] ss:$8 sps:$4 sm:$0xff]  }
  0x51   :  { %879 = vmatpush1.bf16.msra.mxu0 %v4426_v53  ;;  %v4447_v3 = vld [vmem:[%s6764_s4 + $0x80] ss:$8 sps:$4 sm:$0xff]   ;;  %v4452_v4 = vld [vmem:[%s6764_s4 + $0x94] ss:$8 sps:$4 sm:$0xff]   ;;  %v4450_v5 = vld [vmem:[%s6764_s4 + $0x90] ss:$8 sps:$4 sm:$0xff]  }
  0x52   :  { %880 = vmatprep.subr.bf16.mxu0 %v4431_v54  ;;  %v4455_v6 = vld [vmem:[%s6764_s4 + $0xa4] ss:$8 sps:$4 sm:$0xff]   ;;  %v4453_v7 = vld [vmem:[%s6764_s4 + $0xa0] ss:$8 sps:$4 sm:$0xff]   ;;  %v4458_v8 = vld [vmem:[%s6764_s4 + $0xb4] ss:$8 sps:$4 sm:$0xff]  }
  0x53   :  { %v4456_v9 = vld [vmem:[%s6764_s4 + $0xb0] ss:$8 sps:$4 sm:$0xff]   ;;  %v4461_v10 = vld [vmem:[%s6764_s4 + $0xc4] ss:$8 sps:$4 sm:$0xff]   ;;  %v4459_v11 = vld [vmem:[%s6764_s4 + $0xc0] ss:$8 sps:$4 sm:$0xff]  }
  0x54   :  { %v4464_v12 = vld [vmem:[%s6764_s4 + $0xd4] ss:$8 sps:$4 sm:$0xff]   ;;  %v4462_v13 = vld [vmem:[%s6764_s4 + $0xd0] ss:$8 sps:$4 sm:$0xff]   ;;  %vm3242_vm2 = vcmask 261120   ;;  %vm3856_vm3 = vcmask 130112  }
  0x55   :  { %881 = vmatpush1.bf16.msra.mxu0 %v4429_v55  ;;  %vm3863_vm4 = vcmask 195712   ;;  %vm3870_vm5 = vcmask 261312   ;;  %vm3877_vm6 = vcmask 326912   ;;  %vm3884_vm7 = vcmask 392512  }
  0x56   :  { %882 = vmatprep.subr.bf16.mxu0 %v4434_v56  ;;  %vm3891_vm8 = vcmask 458112   ;;  %vm3898_vm9 = vcmask 523712   ;;  %vm3905_vm10 = vcmask 589312   ;;  %vm3912_vm11 = vcmask 654912  }
  0x57   :  { %vm3919_vm12 = vcmask 720512   ;;  %vm3926_vm13 = vcmask 786112   ;;  %vm3933_vm14 = vcmask 851712   ;;  %vm3940_vm15 = vcmask 917312  }
  0x58   :  { %vm3947_vm0 = vcmask 982912   ;;  %vm3954_vm1 = vcmask 1048512  }
  0x59   :  { %883 = vmatpush1.bf16.msra.mxu0 %v4432_v57 }
  0x5a   :  { %884 = vmatprep.subr.bf16.mxu0 %v4437_v58 }
  0x5d   :  { %885 = vmatpush1.bf16.msra.mxu0 %v4435_v59 }
  0x5e   :  { %886 = vmatprep.subr.bf16.mxu0 %v4440_v60 }
  0x61   :  { %887 = vmatpush1.bf16.msra.mxu0 %v4438_v61 }
  0x62   :  { %888 = vmatprep.subr.bf16.mxu0 %v4443_v62 }
  0x65   :  { %889 = vmatpush1.bf16.msra.mxu0 %v4441_v63 }
  0x66   :  { %890 = vmatprep.subr.bf16.mxu0 %v4446_v0 }
  0x69   :  { %891 = vmatpush1.bf16.msra.mxu0 %v4444_v1 }
  0x6a   :  { %892 = vmatprep.subr.bf16.mxu0 %v4449_v2 }
  0x6d   :  { %893 = vmatpush1.bf16.msra.mxu0 %v4447_v3 }
  0x6e   :  { %894 = vmatprep.subr.bf16.mxu0 %v4452_v4 }
  0x71   :  { %895 = vmatpush1.bf16.msra.mxu0 %v4450_v5 }
  0x72   :  { %896 = vmatprep.subr.bf16.mxu0 %v4455_v6 }
  0x75   :  { %897 = vmatpush1.bf16.msra.mxu0 %v4453_v7 }
  0x76   :  { %898 = vmatprep.subr.bf16.mxu0 %v4458_v8 }
  0x79   :  { %899 = vmatpush1.bf16.msra.mxu0 %v4456_v9 }
  0x7a   :  { %900 = vmatprep.subr.bf16.mxu0 %v4461_v10 }
  0x7d   :  { %901 = vmatpush1.bf16.msra.mxu0 %v4459_v11 }
  0x7e   :  { %902 = vmatprep.subr.bf16.mxu0 %v4464_v12 }
  0x81   :  { %903 = vmatpush1.bf16.msra.mxu0 %v4462_v13 }
  0xe5   :  { %v204_v14 = vpop.f32.mrb[0].mxu0 }
  0xe6   :  { %v206_v15 = vpop.f32.mrb[1].mxu0  ;;  %v283_v17 = vmax.f32 %v204_v14, 0.0 }
  0xe7   :  { %v208_v16 = vpop.f32.mrb[2].mxu0  ;;  %v284_v20 = vmax.f32 %v206_v15, 0.0 }
  0xe8   :  { %v285_v18 = vmax.f32 %v208_v16, 0.0  ;;  %v210_v19 = vpop.f32.mrb[3].mxu0 }
  0xe9   :  { %v286_v21 = vmax.f32 %v210_v19, 0.0 }
  0xea   :  { %v315_v22 = vpack.c.bf16 %v285_v18, %v283_v17 }
  0xeb   :  { %v316_v23 = vpack.c.bf16 %v286_v21, %v284_v20 }
  0xed   :  { %v214_v24 = vpop.f32.mrb[4].mxu0  ;;  %555 = vmatprep.mubr.bf16.mxu1 %v316_v23 }
  0xee   :  { %v216_v25 = vpop.f32.mrb[5].mxu0  ;;  %556 = vmatmul.mubr.bf16.vlgmr.msra.gmra.mrb[0].mxu1 %v315_v22  ;;  %v287_v27 = vmax.f32 %v214_v24, 0.0 }
  0xef   :  { %v218_v26 = vpop.f32.mrb[6].mxu0  ;;  %v288_v30 = vmax.f32 %v216_v25, 0.0 }
  0xf0   :  { %v289_v28 = vmax.f32 %v218_v26, 0.0  ;;  %v220_v29 = vpop.f32.mrb[7].mxu0 }
  0xf1   :  { %v290_v31 = vmax.f32 %v220_v29, 0.0 }
  0xf2   :  { %v317_v32 = vpack.c.bf16 %v289_v28, %v287_v27 }
  0xf3   :  { %v318_v33 = vpack.c.bf16 %v290_v31, %v288_v30  ;;  %v4467_v30 = vld [vmem:[%s6764_s4 + $0xe4] ss:$8 sps:$4 sm:$0xff]   ;;  %v4465_v31 = vld [vmem:[%s6764_s4 + $0xe0] ss:$8 sps:$4 sm:$0xff]  }
  0xf4   :  { %904 = vmatprep.subr.bf16.mxu0 %v4467_v30 }
  0xf5   :  { %v224_v34 = vpop.f32.mrb[8].mxu0  ;;  %565 = vmatprep.mubr.bf16.mxu1 %v318_v33  ;;  %905 = vmatpush1.bf16.msra.mxu0 %v4465_v31  ;;  %v4468_v33 = vld [vmem:[%s6764_s4 + $0xf0] ss:$8 sps:$4 sm:$0xff]  }
  0xf6   :  { %v226_v35 = vpop.f32.mrb[9].mxu0  ;;  %566 = vmatmul.mubr.bf16.gmra.mrb[4].mxu1 %v317_v32  ;;  %v291_v37 = vmax.f32 %v224_v34, 0.0  ;;  %v4470_v32 = vld [vmem:[%s6764_s4 + $0xf4] ss:$8 sps:$4 sm:$0xff]   ;;  %v4471_v34 = vld [vmem:[%s6765_s5] ss:$8 sps:$4 sm:$0xff]  }
  0xf7   :  { %v228_v36 = vpop.f32.mrb[10].mxu0  ;;  %v292_v40 = vmax.f32 %v226_v35, 0.0  ;;  %906 = vmatprep.subr.bf16.mxu0 %v4470_v32  ;;  %v4473_v35 = vld [vmem:[%s6765_s5 + $0x4] ss:$8 sps:$4 sm:$0xff]  }
  0xf8   :  { %v293_v38 = vmax.f32 %v228_v36, 0.0  ;;  %v230_v39 = vpop.f32.mrb[11].mxu0  ;;  %v4476_v36 = vld [vmem:[%s6765_s5 + $0x14] ss:$8 sps:$4 sm:$0xff]   ;;  %1229 = vmatprep.subr.bf16.mxu1 %v4473_v35 }
  0xf9   :  { %v294_v41 = vmax.f32 %v230_v39, 0.0  ;;  %907 = vmatpush1.bf16.msra.mxu0 %v4468_v33  ;;  %1230 = vmatpush1.bf16.msra.mxu1 %v4471_v34  ;;  %v4477_v39 = vld [vmem:[%s6765_s5 + $0x20] ss:$8 sps:$4 sm:$0xff]  }
  0xfa   :  { %v319_v42 = vpack.c.bf16 %v293_v38, %v291_v37  ;;  %v4474_v37 = vld [vmem:[%s6765_s5 + $0x10] ss:$8 sps:$4 sm:$0xff]   ;;  %1231 = vmatprep.subr.bf16.mxu1 %v4476_v36  ;;  %v4479_v38 = vld [vmem:[%s6765_s5 + $0x24] ss:$8 sps:$4 sm:$0xff]  }
  0xfb   :  { %v320_v43 = vpack.c.bf16 %v294_v41, %v292_v40  ;;  %v4482_v40 = vld [vmem:[%s6765_s5 + $0x34] ss:$8 sps:$4 sm:$0xff]   ;;  %v4480_v41 = vld [vmem:[%s6765_s5 + $0x30] ss:$8 sps:$4 sm:$0xff]  }
  0xfd   :  { %v234_v44 = vpop.f32.mrb[12].mxu0  ;;  %575 = vmatprep.mubr.bf16.mxu1 %v320_v43  ;;  %1232 = vmatpush1.bf16.msra.mxu1 %v4474_v37  ;;  %v4483_v43 = vld [vmem:[%s6765_s5 + $0x40] ss:$8 sps:$4 sm:$0xff]  }
  0xfe   :  { %v236_v45 = vpop.f32.mrb[13].mxu0  ;;  %576 = vmatmul.mubr.bf16.gmra.mrb[8].mxu1 %v319_v42  ;;  %v295_v47 = vmax.f32 %v234_v44, 0.0  ;;  %1233 = vmatprep.subr.bf16.mxu1 %v4479_v38  ;;  %v4485_v42 = vld [vmem:[%s6765_s5 + $0x44] ss:$8 sps:$4 sm:$0xff]   ;;  %v4488_v44 = vld [vmem:[%s6765_s5 + $0x54] ss:$8 sps:$4 sm:$0xff]  }
  0xff   :  { %v238_v46 = vpop.f32.mrb[14].mxu0  ;;  %v296_v50 = vmax.f32 %v236_v45, 0.0  ;;  %v4486_v45 = vld [vmem:[%s6765_s5 + $0x50] ss:$8 sps:$4 sm:$0xff]  }
 0x100   :  { %v297_v48 = vmax.f32 %v238_v46, 0.0  ;;  %v240_v49 = vpop.f32.mrb[15].mxu0  ;;  %v4491_v46 = vld [vmem:[%s6765_s5 + $0x64] ss:$8 sps:$4 sm:$0xff]  }
 0x101   :  { %v298_v51 = vmax.f32 %v240_v49, 0.0  ;;  %1234 = vmatpush1.bf16.msra.mxu1 %v4477_v39  ;;  %v4492_v49 = vld [vmem:[%s6765_s5 + $0x70] ss:$8 sps:$4 sm:$0xff]  }
 0x102   :  { %v321_v52 = vpack.c.bf16 %v297_v48, %v295_v47  ;;  %1235 = vmatprep.subr.bf16.mxu1 %v4482_v40  ;;  %v4489_v47 = vld [vmem:[%s6765_s5 + $0x60] ss:$8 sps:$4 sm:$0xff]   ;;  %v4494_v48 = vld [vmem:[%s6765_s5 + $0x74] ss:$8 sps:$4 sm:$0xff]  }
 0x103   :  { %v322_v53 = vpack.c.bf16 %v298_v51, %v296_v50  ;;  %v4497_v50 = vld [vmem:[%s6765_s5 + $0x84] ss:$8 sps:$4 sm:$0xff]   ;;  %v4495_v51 = vld [vmem:[%s6765_s5 + $0x80] ss:$8 sps:$4 sm:$0xff]  }
 0x105   :  { %v244_v54 = vpop.f32.mrb[16].mxu0  ;;  %585 = vmatprep.mubr.bf16.mxu1 %v322_v53  ;;  %1236 = vmatpush1.bf16.msra.mxu1 %v4480_v41  ;;  %v4498_v53 = vld [vmem:[%s6765_s5 + $0x90] ss:$8 sps:$4 sm:$0xff]  }
 0x106   :  { %v246_v55 = vpop.f32.mrb[17].mxu0  ;;  %586 = vmatmul.mubr.bf16.gmra.mrb[12].mxu1 %v321_v52  ;;  %v299_v57 = vmax.f32 %v244_v54, 0.0  ;;  %1237 = vmatprep.subr.bf16.mxu1 %v4485_v42  ;;  %v4500_v52 = vld [vmem:[%s6765_s5 + $0x94] ss:$8 sps:$4 sm:$0xff]   ;;  %v4503_v54 = vld [vmem:[%s6765_s5 + $0xa4] ss:$8 sps:$4 sm:$0xff]  }
 0x107   :  { %v248_v56 = vpop.f32.mrb[18].mxu0  ;;  %v300_v60 = vmax.f32 %v246_v55, 0.0  ;;  %v4501_v55 = vld [vmem:[%s6765_s5 + $0xa0] ss:$8 sps:$4 sm:$0xff]  }
 0x108   :  { %v301_v58 = vmax.f32 %v248_v56, 0.0  ;;  %v250_v59 = vpop.f32.mrb[19].mxu0  ;;  %v4506_v56 = vld [vmem:[%s6765_s5 + $0xb4] ss:$8 sps:$4 sm:$0xff]  }
 0x109   :  { %v302_v61 = vmax.f32 %v250_v59, 0.0  ;;  %1238 = vmatpush1.bf16.msra.mxu1 %v4483_v43  ;;  %v4507_v59 = vld [vmem:[%s6765_s5 + $0xc0] ss:$8 sps:$4 sm:$0xff]  }
 0x10a   :  { %v323_v62 = vpack.c.bf16 %v301_v58, %v299_v57  ;;  %1239 = vmatprep.subr.bf16.mxu1 %v4488_v44  ;;  %v4504_v57 = vld [vmem:[%s6765_s5 + $0xb0] ss:$8 sps:$4 sm:$0xff]   ;;  %v4509_v58 = vld [vmem:[%s6765_s5 + $0xc4] ss:$8 sps:$4 sm:$0xff]  }
 0x10b   :  { %v324_v63 = vpack.c.bf16 %v302_v61, %v300_v60  ;;  %v4512_v60 = vld [vmem:[%s6765_s5 + $0xd4] ss:$8 sps:$4 sm:$0xff]   ;;  %v4510_v61 = vld [vmem:[%s6765_s5 + $0xd0] ss:$8 sps:$4 sm:$0xff]  }
 0x10d   :  { %v254_v0 = vpop.f32.mrb[20].mxu0  ;;  %595 = vmatprep.mubr.bf16.mxu1 %v324_v63  ;;  %1240 = vmatpush1.bf16.msra.mxu1 %v4486_v45 }
 0x10e   :  { %v256_v1 = vpop.f32.mrb[21].mxu0  ;;  %596 = vmatmul.mubr.bf16.gmra.mrb[16].mxu1 %v323_v62  ;;  %v303_v3 = vmax.f32 %v254_v0, 0.0  ;;  %1241 = vmatprep.subr.bf16.mxu1 %v4491_v46 }
 0x10f   :  { %v258_v2 = vpop.f32.mrb[22].mxu0  ;;  %v304_v6 = vmax.f32 %v256_v1, 0.0 }
 0x110   :  { %v305_v4 = vmax.f32 %v258_v2, 0.0  ;;  %v260_v5 = vpop.f32.mrb[23].mxu0 }
 0x111   :  { %v306_v7 = vmax.f32 %v260_v5, 0.0  ;;  %1242 = vmatpush1.bf16.msra.mxu1 %v4489_v47 }
 0x112   :  { %v325_v8 = vpack.c.bf16 %v305_v4, %v303_v3  ;;  %1243 = vmatprep.subr.bf16.mxu1 %v4494_v48 }
 0x113   :  { %v326_v9 = vpack.c.bf16 %v306_v7, %v304_v6 }
 0x115   :  { %v264_v10 = vpop.f32.mrb[24].mxu0  ;;  %605 = vmatprep.mubr.bf16.mxu1 %v326_v9  ;;  %1244 = vmatpush1.bf16.msra.mxu1 %v4492_v49 }
 0x116   :  { %v266_v11 = vpop.f32.mrb[25].mxu0  ;;  %606 = vmatmul.mubr.bf16.gmra.mrb[20].mxu1 %v325_v8  ;;  %v307_v13 = vmax.f32 %v264_v10, 0.0  ;;  %1245 = vmatprep.subr.bf16.mxu1 %v4497_v50 }
 0x117   :  { %v268_v12 = vpop.f32.mrb[26].mxu0  ;;  %v308_v16 = vmax.f32 %v266_v11, 0.0 }
 0x118   :  { %v309_v14 = vmax.f32 %v268_v12, 0.0  ;;  %v270_v15 = vpop.f32.mrb[27].mxu0 }
 0x119   :  { %v310_v17 = vmax.f32 %v270_v15, 0.0  ;;  %1246 = vmatpush1.bf16.msra.mxu1 %v4495_v51 }
 0x11a   :  { %v327_v18 = vpack.c.bf16 %v309_v14, %v307_v13  ;;  %1247 = vmatprep.subr.bf16.mxu1 %v4500_v52 }
 0x11b   :  { %v328_v19 = vpack.c.bf16 %v310_v17, %v308_v16 }
 0x11d   :  { %v274_v20 = vpop.f32.mrb[28].mxu0  ;;  %615 = vmatprep.mubr.bf16.mxu1 %v328_v19  ;;  %1248 = vmatpush1.bf16.msra.mxu1 %v4498_v53 }
 0x11e   :  { %v276_v21 = vpop.f32.mrb[29].mxu0  ;;  %616 = vmatmul.mubr.bf16.gmra.mrb[24].mxu1 %v327_v18  ;;  %v311_v23 = vmax.f32 %v274_v20, 0.0  ;;  %1249 = vmatprep.subr.bf16.mxu1 %v4503_v54 }
 0x11f   :  { %v278_v22 = vpop.f32.mrb[30].mxu0  ;;  %v312_v26 = vmax.f32 %v276_v21, 0.0 }
 0x120   :  { %v313_v24 = vmax.f32 %v278_v22, 0.0  ;;  %v280_v25 = vpop.f32.mrb[31].mxu0 }
 0x121   :  { %v314_v27 = vmax.f32 %v280_v25, 0.0  ;;  %1250 = vmatpush1.bf16.msra.mxu1 %v4501_v55 }
 0x122   :  { %v329_v28 = vpack.c.bf16 %v313_v24, %v311_v23  ;;  %1251 = vmatprep.subr.bf16.mxu1 %v4506_v56 }
 0x123   :  { %v330_v29 = vpack.c.bf16 %v314_v27, %v312_v26 }
 0x125   :  { %625 = vmatprep.mubr.bf16.mxu1 %v330_v29  ;;  %1252 = vmatpush1.bf16.msra.mxu1 %v4504_v57 }
 0x126   :  { %626 = vmatmul.mubr.bf16.gmra.mrb[28].mxu1 %v329_v28  ;;  %1253 = vmatprep.subr.bf16.mxu1 %v4509_v58 }
 0x129   :  { %1254 = vmatpush1.bf16.msra.mxu1 %v4507_v59 }
 0x12a   :  { %1255 = vmatprep.subr.bf16.mxu1 %v4512_v60 }
 0x12d   :  { %1256 = vmatpush1.bf16.msra.mxu1 %v4510_v61 }
 0x1c1   :  { %v557_v62 = vpop.f32.mrb[0].mxu1 }
 0x1c2   :  { %v559_v63 = vpop.f32.mrb[1].mxu1  ;;  %v636_v1 = vmax.f32 %v557_v62, 0.0 }
 0x1c3   :  { %v561_v0 = vpop.f32.mrb[2].mxu1  ;;  %v637_v4 = vmax.f32 %v559_v63, 0.0 }
 0x1c4   :  { %v638_v2 = vmax.f32 %v561_v0, 0.0  ;;  %v563_v3 = vpop.f32.mrb[3].mxu1 }
 0x1c5   :  { %v639_v5 = vmax.f32 %v563_v3, 0.0 }
 0x1c6   :  { %v668_v6 = vpack.c.bf16 %v638_v2, %v636_v1 }
 0x1c7   :  { %v669_v7 = vpack.c.bf16 %v639_v5, %v637_v4 }
 0x1c9   :  { %v567_v8 = vpop.f32.mrb[4].mxu1  ;;  %908 = vmatprep.mubr.bf16.mxu0 %v669_v7 }
 0x1ca   :  { %v569_v9 = vpop.f32.mrb[5].mxu1  ;;  %909 = vmatmul.mubr.bf16.vlgmr.msra.gmra.mrb[32].mxu0 %v668_v6  ;;  %v640_v11 = vmax.f32 %v567_v8, 0.0 }
 0x1cb   :  { %v571_v10 = vpop.f32.mrb[6].mxu1  ;;  %v641_v14 = vmax.f32 %v569_v9, 0.0 }
 0x1cc   :  { %v642_v12 = vmax.f32 %v571_v10, 0.0  ;;  %v573_v13 = vpop.f32.mrb[7].mxu1 }
 0x1cd   :  { %v643_v15 = vmax.f32 %v573_v13, 0.0 }
 0x1ce   :  { %v670_v16 = vpack.c.bf16 %v642_v12, %v640_v11 }
 0x1cf   :  { %v671_v17 = vpack.c.bf16 %v643_v15, %v641_v14  ;;  %v4515_v14 = vld [vmem:[%s6765_s5 + $0xe4] ss:$8 sps:$4 sm:$0xff]   ;;  %v4513_v15 = vld [vmem:[%s6765_s5 + $0xe0] ss:$8 sps:$4 sm:$0xff]  }
 0x1d0   :  { %1257 = vmatprep.subr.bf16.mxu1 %v4515_v14 }
 0x1d1   :  { %v577_v18 = vpop.f32.mrb[8].mxu1  ;;  %918 = vmatprep.mubr.bf16.mxu0 %v671_v17  ;;  %1258 = vmatpush1.bf16.msra.mxu1 %v4513_v15  ;;  %v4516_v17 = vld [vmem:[%s6765_s5 + $0xf0] ss:$8 sps:$4 sm:$0xff]  }
 0x1d2   :  { %v579_v19 = vpop.f32.mrb[9].mxu1  ;;  %919 = vmatmul.mubr.bf16.gmra.mrb[36].mxu0 %v670_v16  ;;  %v644_v21 = vmax.f32 %v577_v18, 0.0  ;;  %v4518_v16 = vld [vmem:[%s6765_s5 + $0xf4] ss:$8 sps:$4 sm:$0xff]   ;;  %v4519_v18 = vld [vmem:[%s6766_s6] ss:$8 sps:$4 sm:$0xff]  }
 0x1d3   :  { %v581_v20 = vpop.f32.mrb[10].mxu1  ;;  %v645_v24 = vmax.f32 %v579_v19, 0.0  ;;  %1259 = vmatprep.subr.bf16.mxu1 %v4518_v16  ;;  %v4521_v19 = vld [vmem:[%s6766_s6 + $0x4] ss:$8 sps:$4 sm:$0xff]  }
 0x1d4   :  { %v646_v22 = vmax.f32 %v581_v20, 0.0  ;;  %v583_v23 = vpop.f32.mrb[11].mxu1  ;;  %v4524_v20 = vld [vmem:[%s6766_s6 + $0x14] ss:$8 sps:$4 sm:$0xff]   ;;  %1582 = vmatprep.subr.bf16.mxu0 %v4521_v19 }
 0x1d5   :  { %v647_v25 = vmax.f32 %v583_v23, 0.0  ;;  %1260 = vmatpush1.bf16.msra.mxu1 %v4516_v17  ;;  %1583 = vmatpush1.bf16.msra.mxu0 %v4519_v18  ;;  %v4525_v23 = vld [vmem:[%s6766_s6 + $0x20] ss:$8 sps:$4 sm:$0xff]  }
 0x1d6   :  { %v672_v26 = vpack.c.bf16 %v646_v22, %v644_v21  ;;  %v4522_v21 = vld [vmem:[%s6766_s6 + $0x10] ss:$8 sps:$4 sm:$0xff]   ;;  %1584 = vmatprep.subr.bf16.mxu0 %v4524_v20  ;;  %v4527_v22 = vld [vmem:[%s6766_s6 + $0x24] ss:$8 sps:$4 sm:$0xff]  }
 0x1d7   :  { %v673_v27 = vpack.c.bf16 %v647_v25, %v645_v24  ;;  %v4530_v24 = vld [vmem:[%s6766_s6 + $0x34] ss:$8 sps:$4 sm:$0xff]   ;;  %v4528_v25 = vld [vmem:[%s6766_s6 + $0x30] ss:$8 sps:$4 sm:$0xff]  }
 0x1d9   :  { %v587_v28 = vpop.f32.mrb[12].mxu1  ;;  %928 = vmatprep.mubr.bf16.mxu0 %v673_v27  ;;  %1585 = vmatpush1.bf16.msra.mxu0 %v4522_v21  ;;  %v4531_v27 = vld [vmem:[%s6766_s6 + $0x40] ss:$8 sps:$4 sm:$0xff]  }
 0x1da   :  { %v589_v29 = vpop.f32.mrb[13].mxu1  ;;  %929 = vmatmul.mubr.bf16.gmra.mrb[40].mxu0 %v672_v26  ;;  %v648_v31 = vmax.f32 %v587_v28, 0.0  ;;  %1586 = vmatprep.subr.bf16.mxu0 %v4527_v22  ;;  %v4533_v26 = vld [vmem:[%s6766_s6 + $0x44] ss:$8 sps:$4 sm:$0xff]   ;;  %v4536_v28 = vld [vmem:[%s6766_s6 + $0x54] ss:$8 sps:$4 sm:$0xff]  }
 0x1db   :  { %v591_v30 = vpop.f32.mrb[14].mxu1  ;;  %v649_v34 = vmax.f32 %v589_v29, 0.0  ;;  %v4534_v29 = vld [vmem:[%s6766_s6 + $0x50] ss:$8 sps:$4 sm:$0xff]  }
 0x1dc   :  { %v650_v32 = vmax.f32 %v591_v30, 0.0  ;;  %v593_v33 = vpop.f32.mrb[15].mxu1  ;;  %v4539_v30 = vld [vmem:[%s6766_s6 + $0x64] ss:$8 sps:$4 sm:$0xff]  }
 0x1dd   :  { %v651_v35 = vmax.f32 %v593_v33, 0.0  ;;  %1587 = vmatpush1.bf16.msra.mxu0 %v4525_v23  ;;  %v4540_v33 = vld [vmem:[%s6766_s6 + $0x70] ss:$8 sps:$4 sm:$0xff]  }
 0x1de   :  { %v674_v36 = vpack.c.bf16 %v650_v32, %v648_v31  ;;  %1588 = vmatprep.subr.bf16.mxu0 %v4530_v24  ;;  %v4537_v31 = vld [vmem:[%s6766_s6 + $0x60] ss:$8 sps:$4 sm:$0xff]   ;;  %v4542_v32 = vld [vmem:[%s6766_s6 + $0x74] ss:$8 sps:$4 sm:$0xff]  }
 0x1df   :  { %v675_v37 = vpack.c.bf16 %v651_v35, %v649_v34  ;;  %v4545_v34 = vld [vmem:[%s6766_s6 + $0x84] ss:$8 sps:$4 sm:$0xff]   ;;  %v4543_v35 = vld [vmem:[%s6766_s6 + $0x80] ss:$8 sps:$4 sm:$0xff]  }
 0x1e1   :  { %v597_v38 = vpop.f32.mrb[16].mxu1  ;;  %938 = vmatprep.mubr.bf16.mxu0 %v675_v37  ;;  %1589 = vmatpush1.bf16.msra.mxu0 %v4528_v25  ;;  %v4546_v37 = vld [vmem:[%s6766_s6 + $0x90] ss:$8 sps:$4 sm:$0xff]  }
 0x1e2   :  { %v599_v39 = vpop.f32.mrb[17].mxu1  ;;  %939 = vmatmul.mubr.bf16.gmra.mrb[44].mxu0 %v674_v36  ;;  %v652_v41 = vmax.f32 %v597_v38, 0.0  ;;  %1590 = vmatprep.subr.bf16.mxu0 %v4533_v26  ;;  %v4548_v36 = vld [vmem:[%s6766_s6 + $0x94] ss:$8 sps:$4 sm:$0xff]   ;;  %v4551_v38 = vld [vmem:[%s6766_s6 + $0xa4] ss:$8 sps:$4 sm:$0xff]  }
 0x1e3   :  { %v601_v40 = vpop.f32.mrb[18].mxu1  ;;  %v653_v44 = vmax.f32 %v599_v39, 0.0  ;;  %v4549_v39 = vld [vmem:[%s6766_s6 + $0xa0] ss:$8 sps:$4 sm:$0xff]  }
 0x1e4   :  { %v654_v42 = vmax.f32 %v601_v40, 0.0  ;;  %v603_v43 = vpop.f32.mrb[19].mxu1  ;;  %v4554_v40 = vld [vmem:[%s6766_s6 + $0xb4] ss:$8 sps:$4 sm:$0xff]  }
 0x1e5   :  { %v655_v45 = vmax.f32 %v603_v43, 0.0  ;;  %1591 = vmatpush1.bf16.msra.mxu0 %v4531_v27  ;;  %v4555_v43 = vld [vmem:[%s6766_s6 + $0xc0] ss:$8 sps:$4 sm:$0xff]  }
 0x1e6   :  { %v676_v46 = vpack.c.bf16 %v654_v42, %v652_v41  ;;  %1592 = vmatprep.subr.bf16.mxu0 %v4536_v28  ;;  %v4552_v41 = vld [vmem:[%s6766_s6 + $0xb0] ss:$8 sps:$4 sm:$0xff]   ;;  %v4557_v42 = vld [vmem:[%s6766_s6 + $0xc4] ss:$8 sps:$4 sm:$0xff]  }
 0x1e7   :  { %v677_v47 = vpack.c.bf16 %v655_v45, %v653_v44  ;;  %v4560_v44 = vld [vmem:[%s6766_s6 + $0xd4] ss:$8 sps:$4 sm:$0xff]   ;;  %v4558_v45 = vld [vmem:[%s6766_s6 + $0xd0] ss:$8 sps:$4 sm:$0xff]  }
 0x1e9   :  { %v607_v48 = vpop.f32.mrb[20].mxu1  ;;  %948 = vmatprep.mubr.bf16.mxu0 %v677_v47  ;;  %1593 = vmatpush1.bf16.msra.mxu0 %v4534_v29 }
 0x1ea   :  { %v609_v49 = vpop.f32.mrb[21].mxu1  ;;  %949 = vmatmul.mubr.bf16.gmra.mrb[48].mxu0 %v676_v46  ;;  %v656_v51 = vmax.f32 %v607_v48, 0.0  ;;  %1594 = vmatprep.subr.bf16.mxu0 %v4539_v30 }
 0x1eb   :  { %v611_v50 = vpop.f32.mrb[22].mxu1  ;;  %v657_v54 = vmax.f32 %v609_v49, 0.0 }
 0x1ec   :  { %v658_v52 = vmax.f32 %v611_v50, 0.0  ;;  %v613_v53 = vpop.f32.mrb[23].mxu1 }
 0x1ed   :  { %v659_v55 = vmax.f32 %v613_v53, 0.0  ;;  %1595 = vmatpush1.bf16.msra.mxu0 %v4537_v31 }
 0x1ee   :  { %v678_v56 = vpack.c.bf16 %v658_v52, %v656_v51  ;;  %1596 = vmatprep.subr.bf16.mxu0 %v4542_v32 }
 0x1ef   :  { %v679_v57 = vpack.c.bf16 %v659_v55, %v657_v54 }
 0x1f1   :  { %v617_v58 = vpop.f32.mrb[24].mxu1  ;;  %958 = vmatprep.mubr.bf16.mxu0 %v679_v57  ;;  %1597 = vmatpush1.bf16.msra.mxu0 %v4540_v33 }
 0x1f2   :  { %v619_v59 = vpop.f32.mrb[25].mxu1  ;;  %959 = vmatmul.mubr.bf16.gmra.mrb[52].mxu0 %v678_v56  ;;  %v660_v61 = vmax.f32 %v617_v58, 0.0  ;;  %1598 = vmatprep.subr.bf16.mxu0 %v4545_v34 }
 0x1f3   :  { %v621_v60 = vpop.f32.mrb[26].mxu1  ;;  %v661_v0 = vmax.f32 %v619_v59, 0.0 }
 0x1f4   :  { %v662_v62 = vmax.f32 %v621_v60, 0.0  ;;  %v623_v63 = vpop.f32.mrb[27].mxu1 }
 0x1f5   :  { %v663_v1 = vmax.f32 %v623_v63, 0.0  ;;  %1599 = vmatpush1.bf16.msra.mxu0 %v4543_v35 }
 0x1f6   :  { %v680_v2 = vpack.c.bf16 %v662_v62, %v660_v61  ;;  %1600 = vmatprep.subr.bf16.mxu0 %v4548_v36 }
 0x1f7   :  { %v681_v3 = vpack.c.bf16 %v663_v1, %v661_v0 }
 0x1f9   :  { %v627_v4 = vpop.f32.mrb[28].mxu1  ;;  %968 = vmatprep.mubr.bf16.mxu0 %v681_v3  ;;  %1601 = vmatpush1.bf16.msra.mxu0 %v4546_v37 }
 0x1fa   :  { %v629_v5 = vpop.f32.mrb[29].mxu1  ;;  %969 = vmatmul.mubr.bf16.gmra.mrb[56].mxu0 %v680_v2  ;;  %v664_v7 = vmax.f32 %v627_v4, 0.0  ;;  %1602 = vmatprep.subr.bf16.mxu0 %v4551_v38 }
 0x1fb   :  { %v631_v6 = vpop.f32.mrb[30].mxu1  ;;  %v665_v10 = vmax.f32 %v629_v5, 0.0 }
 0x1fc   :  { %v666_v8 = vmax.f32 %v631_v6, 0.0  ;;  %v633_v9 = vpop.f32.mrb[31].mxu1 }
 0x1fd   :  { %v667_v11 = vmax.f32 %v633_v9, 0.0  ;;  %1603 = vmatpush1.bf16.msra.mxu0 %v4549_v39 }
 0x1fe   :  { %v682_v12 = vpack.c.bf16 %v666_v8, %v664_v7  ;;  %1604 = vmatprep.subr.bf16.mxu0 %v4554_v40 }
 0x1ff   :  { %v683_v13 = vpack.c.bf16 %v667_v11, %v665_v10 }
 0x201   :  { %978 = vmatprep.mubr.bf16.mxu0 %v683_v13  ;;  %1605 = vmatpush1.bf16.msra.mxu0 %v4552_v41 }
 0x202   :  { %979 = vmatmul.mubr.bf16.gmra.mrb[60].mxu0 %v682_v12  ;;  %1606 = vmatprep.subr.bf16.mxu0 %v4557_v42 }
 0x205   :  { %1607 = vmatpush1.bf16.msra.mxu0 %v4555_v43 }
 0x206   :  { %1608 = vmatprep.subr.bf16.mxu0 %v4560_v44 }
 0x209   :  { %1609 = vmatpush1.bf16.msra.mxu0 %v4558_v45 }
 0x29d   :  { %v910_v46 = vpop.f32.mrb[32].mxu0 }
 0x29e   :  { %v912_v47 = vpop.f32.mrb[33].mxu0  ;;  %v989_v49 = vmax.f32 %v910_v46, 0.0 }
 0x29f   :  { %v914_v48 = vpop.f32.mrb[34].mxu0  ;;  %v990_v52 = vmax.f32 %v912_v47, 0.0 }
 0x2a0   :  { %v991_v50 = vmax.f32 %v914_v48, 0.0  ;;  %v916_v51 = vpop.f32.mrb[35].mxu0 }
 0x2a1   :  { %v992_v53 = vmax.f32 %v916_v51, 0.0 }
 0x2a2   :  { %v1021_v54 = vpack.c.bf16 %v991_v50, %v989_v49 }
 0x2a3   :  { %v1022_v55 = vpack.c.bf16 %v992_v53, %v990_v52 }
 0x2a5   :  { %v920_v56 = vpop.f32.mrb[36].mxu0  ;;  %1261 = vmatprep.mubr.bf16.mxu1 %v1022_v55 }
 0x2a6   :  { %v922_v57 = vpop.f32.mrb[37].mxu0  ;;  %1262 = vmatmul.mubr.bf16.vlgmr.msra.gmra.mrb[32].mxu1 %v1021_v54  ;;  %v993_v59 = vmax.f32 %v920_v56, 0.0 }
 0x2a7   :  { %v924_v58 = vpop.f32.mrb[38].mxu0  ;;  %v994_v62 = vmax.f32 %v922_v57, 0.0 }
 0x2a8   :  { %v995_v60 = vmax.f32 %v924_v58, 0.0  ;;  %v926_v61 = vpop.f32.mrb[39].mxu0 }
 0x2a9   :  { %v996_v63 = vmax.f32 %v926_v61, 0.0 }
 0x2aa   :  { %v1023_v0 = vpack.c.bf16 %v995_v60, %v993_v59 }
 0x2ab   :  { %v1024_v1 = vpack.c.bf16 %v996_v63, %v994_v62  ;;  %v4563_v62 = vld [vmem:[%s6766_s6 + $0xe4] ss:$8 sps:$4 sm:$0xff]   ;;  %v4561_v63 = vld [vmem:[%s6766_s6 + $0xe0] ss:$8 sps:$4 sm:$0xff]  }
 0x2ac   :  { %1610 = vmatprep.subr.bf16.mxu0 %v4563_v62 }
 0x2ad   :  { %v930_v2 = vpop.f32.mrb[40].mxu0  ;;  %1271 = vmatprep.mubr.bf16.mxu1 %v1024_v1  ;;  %1611 = vmatpush1.bf16.msra.mxu0 %v4561_v63  ;;  %v4564_v1 = vld [vmem:[%s6766_s6 + $0xf0] ss:$8 sps:$4 sm:$0xff]  }
 0x2ae   :  { %v932_v3 = vpop.f32.mrb[41].mxu0  ;;  %1272 = vmatmul.mubr.bf16.gmra.mrb[36].mxu1 %v1023_v0  ;;  %v997_v5 = vmax.f32 %v930_v2, 0.0  ;;  %v4566_v0 = vld [vmem:[%s6766_s6 + $0xf4] ss:$8 sps:$4 sm:$0xff]   ;;  %v4567_v2 = vld [vmem:[%s6767_s7] ss:$8 sps:$4 sm:$0xff]  }
 0x2af   :  { %v934_v4 = vpop.f32.mrb[42].mxu0  ;;  %v998_v8 = vmax.f32 %v932_v3, 0.0  ;;  %1612 = vmatprep.subr.bf16.mxu0 %v4566_v0  ;;  %v4569_v3 = vld [vmem:[%s6767_s7 + $0x4] ss:$8 sps:$4 sm:$0xff]  }
 0x2b0   :  { %v999_v6 = vmax.f32 %v934_v4, 0.0  ;;  %v936_v7 = vpop.f32.mrb[43].mxu0  ;;  %v4572_v4 = vld [vmem:[%s6767_s7 + $0x14] ss:$8 sps:$4 sm:$0xff]   ;;  %1935 = vmatprep.subr.bf16.mxu1 %v4569_v3 }
 0x2b1   :  { %v1000_v9 = vmax.f32 %v936_v7, 0.0  ;;  %1613 = vmatpush1.bf16.msra.mxu0 %v4564_v1  ;;  %1936 = vmatpush1.bf16.msra.mxu1 %v4567_v2  ;;  %v4573_v7 = vld [vmem:[%s6767_s7 + $0x20] ss:$8 sps:$4 sm:$0xff]  }
 0x2b2   :  { %v1025_v10 = vpack.c.bf16 %v999_v6, %v997_v5  ;;  %v4570_v5 = vld [vmem:[%s6767_s7 + $0x10] ss:$8 sps:$4 sm:$0xff]   ;;  %1937 = vmatprep.subr.bf16.mxu1 %v4572_v4  ;;  %v4575_v6 = vld [vmem:[%s6767_s7 + $0x24] ss:$8 sps:$4 sm:$0xff]  }
 0x2b3   :  { %v1026_v11 = vpack.c.bf16 %v1000_v9, %v998_v8  ;;  %v4578_v8 = vld [vmem:[%s6767_s7 + $0x34] ss:$8 sps:$4 sm:$0xff]   ;;  %v4576_v9 = vld [vmem:[%s6767_s7 + $0x30] ss:$8 sps:$4 sm:$0xff]  }
 0x2b5   :  { %v940_v12 = vpop.f32.mrb[44].mxu0  ;;  %1281 = vmatprep.mubr.bf16.mxu1 %v1026_v11  ;;  %1938 = vmatpush1.bf16.msra.mxu1 %v4570_v5  ;;  %v4579_v11 = vld [vmem:[%s6767_s7 + $0x40] ss:$8 sps:$4 sm:$0xff]  }
 0x2b6   :  { %v942_v13 = vpop.f32.mrb[45].mxu0  ;;  %1282 = vmatmul.mubr.bf16.gmra.mrb[40].mxu1 %v1025_v10  ;;  %v1001_v15 = vmax.f32 %v940_v12, 0.0  ;;  %1939 = vmatprep.subr.bf16.mxu1 %v4575_v6  ;;  %v4581_v10 = vld [vmem:[%s6767_s7 + $0x44] ss:$8 sps:$4 sm:$0xff]   ;;  %v4584_v12 = vld [vmem:[%s6767_s7 + $0x54] ss:$8 sps:$4 sm:$0xff]  }
 0x2b7   :  { %v944_v14 = vpop.f32.mrb[46].mxu0  ;;  %v1002_v18 = vmax.f32 %v942_v13, 0.0  ;;  %v4582_v13 = vld [vmem:[%s6767_s7 + $0x50] ss:$8 sps:$4 sm:$0xff]  }
 0x2b8   :  { %v1003_v16 = vmax.f32 %v944_v14, 0.0  ;;  %v946_v17 = vpop.f32.mrb[47].mxu0  ;;  %v4587_v14 = vld [vmem:[%s6767_s7 + $0x64] ss:$8 sps:$4 sm:$0xff]  }
 0x2b9   :  { %v1004_v19 = vmax.f32 %v946_v17, 0.0  ;;  %1940 = vmatpush1.bf16.msra.mxu1 %v4573_v7  ;;  %v4588_v17 = vld [vmem:[%s6767_s7 + $0x70] ss:$8 sps:$4 sm:$0xff]  }
 0x2ba   :  { %v1027_v20 = vpack.c.bf16 %v1003_v16, %v1001_v15  ;;  %1941 = vmatprep.subr.bf16.mxu1 %v4578_v8  ;;  %v4585_v15 = vld [vmem:[%s6767_s7 + $0x60] ss:$8 sps:$4 sm:$0xff]   ;;  %v4590_v16 = vld [vmem:[%s6767_s7 + $0x74] ss:$8 sps:$4 sm:$0xff]  }
 0x2bb   :  { %v1028_v21 = vpack.c.bf16 %v1004_v19, %v1002_v18  ;;  %v4593_v18 = vld [vmem:[%s6767_s7 + $0x84] ss:$8 sps:$4 sm:$0xff]   ;;  %v4591_v19 = vld [vmem:[%s6767_s7 + $0x80] ss:$8 sps:$4 sm:$0xff]  }
 0x2bd   :  { %v950_v22 = vpop.f32.mrb[48].mxu0  ;;  %1291 = vmatprep.mubr.bf16.mxu1 %v1028_v21  ;;  %1942 = vmatpush1.bf16.msra.mxu1 %v4576_v9  ;;  %v4594_v21 = vld [vmem:[%s6767_s7 + $0x90] ss:$8 sps:$4 sm:$0xff]  }
 0x2be   :  { %v952_v23 = vpop.f32.mrb[49].mxu0  ;;  %1292 = vmatmul.mubr.bf16.gmra.mrb[44].mxu1 %v1027_v20  ;;  %v1005_v25 = vmax.f32 %v950_v22, 0.0  ;;  %1943 = vmatprep.subr.bf16.mxu1 %v4581_v10  ;;  %v4596_v20 = vld [vmem:[%s6767_s7 + $0x94] ss:$8 sps:$4 sm:$0xff]   ;;  %v4599_v22 = vld [vmem:[%s6767_s7 + $0xa4] ss:$8 sps:$4 sm:$0xff]  }
 0x2bf   :  { %v954_v24 = vpop.f32.mrb[50].mxu0  ;;  %v1006_v28 = vmax.f32 %v952_v23, 0.0  ;;  %v4597_v23 = vld [vmem:[%s6767_s7 + $0xa0] ss:$8 sps:$4 sm:$0xff]  }
 0x2c0   :  { %v1007_v26 = vmax.f32 %v954_v24, 0.0  ;;  %v956_v27 = vpop.f32.mrb[51].mxu0  ;;  %v4602_v24 = vld [vmem:[%s6767_s7 + $0xb4] ss:$8 sps:$4 sm:$0xff]  }
 0x2c1   :  { %v1008_v29 = vmax.f32 %v956_v27, 0.0  ;;  %1944 = vmatpush1.bf16.msra.mxu1 %v4579_v11  ;;  %v4603_v27 = vld [vmem:[%s6767_s7 + $0xc0] ss:$8 sps:$4 sm:$0xff]  }
 0x2c2   :  { %v1029_v30 = vpack.c.bf16 %v1007_v26, %v1005_v25  ;;  %1945 = vmatprep.subr.bf16.mxu1 %v4584_v12  ;;  %v4600_v25 = vld [vmem:[%s6767_s7 + $0xb0] ss:$8 sps:$4 sm:$0xff]   ;;  %v4605_v26 = vld [vmem:[%s6767_s7 + $0xc4] ss:$8 sps:$4 sm:$0xff]  }
 0x2c3   :  { %v1030_v31 = vpack.c.bf16 %v1008_v29, %v1006_v28  ;;  %v4608_v28 = vld [vmem:[%s6767_s7 + $0xd4] ss:$8 sps:$4 sm:$0xff]   ;;  %v4606_v29 = vld [vmem:[%s6767_s7 + $0xd0] ss:$8 sps:$4 sm:$0xff]  }
 0x2c5   :  { %v960_v32 = vpop.f32.mrb[52].mxu0  ;;  %1301 = vmatprep.mubr.bf16.mxu1 %v1030_v31  ;;  %1946 = vmatpush1.bf16.msra.mxu1 %v4582_v13 }
 0x2c6   :  { %v962_v33 = vpop.f32.mrb[53].mxu0  ;;  %1302 = vmatmul.mubr.bf16.gmra.mrb[48].mxu1 %v1029_v30  ;;  %v1009_v35 = vmax.f32 %v960_v32, 0.0  ;;  %1947 = vmatprep.subr.bf16.mxu1 %v4587_v14 }
 0x2c7   :  { %v964_v34 = vpop.f32.mrb[54].mxu0  ;;  %v1010_v38 = vmax.f32 %v962_v33, 0.0 }
 0x2c8   :  { %v1011_v36 = vmax.f32 %v964_v34, 0.0  ;;  %v966_v37 = vpop.f32.mrb[55].mxu0 }
 0x2c9   :  { %v1012_v39 = vmax.f32 %v966_v37, 0.0  ;;  %1948 = vmatpush1.bf16.msra.mxu1 %v4585_v15 }
 0x2ca   :  { %v1031_v40 = vpack.c.bf16 %v1011_v36, %v1009_v35  ;;  %1949 = vmatprep.subr.bf16.mxu1 %v4590_v16 }
 0x2cb   :  { %v1032_v41 = vpack.c.bf16 %v1012_v39, %v1010_v38 }
 0x2cd   :  { %v970_v42 = vpop.f32.mrb[56].mxu0  ;;  %1311 = vmatprep.mubr.bf16.mxu1 %v1032_v41  ;;  %1950 = vmatpush1.bf16.msra.mxu1 %v4588_v17 }
 0x2ce   :  { %v972_v43 = vpop.f32.mrb[57].mxu0  ;;  %1312 = vmatmul.mubr.bf16.gmra.mrb[52].mxu1 %v1031_v40  ;;  %v1013_v45 = vmax.f32 %v970_v42, 0.0  ;;  %1951 = vmatprep.subr.bf16.mxu1 %v4593_v18 }
 0x2cf   :  { %v974_v44 = vpop.f32.mrb[58].mxu0  ;;  %v1014_v48 = vmax.f32 %v972_v43, 0.0 }
 0x2d0   :  { %v1015_v46 = vmax.f32 %v974_v44, 0.0  ;;  %v976_v47 = vpop.f32.mrb[59].mxu0 }
 0x2d1   :  { %v1016_v49 = vmax.f32 %v976_v47, 0.0  ;;  %1952 = vmatpush1.bf16.msra.mxu1 %v4591_v19 }
 0x2d2   :  { %v1033_v50 = vpack.c.bf16 %v1015_v46, %v1013_v45  ;;  %1953 = vmatprep.subr.bf16.mxu1 %v4596_v20 }
 0x2d3   :  { %v1034_v51 = vpack.c.bf16 %v1016_v49, %v1014_v48 }
 0x2d5   :  { %v980_v52 = vpop.f32.mrb[60].mxu0  ;;  %1321 = vmatprep.mubr.bf16.mxu1 %v1034_v51  ;;  %1954 = vmatpush1.bf16.msra.mxu1 %v4594_v21 }
 0x2d6   :  { %v982_v53 = vpop.f32.mrb[61].mxu0  ;;  %1322 = vmatmul.mubr.bf16.gmra.mrb[56].mxu1 %v1033_v50  ;;  %v1017_v55 = vmax.f32 %v980_v52, 0.0  ;;  %1955 = vmatprep.subr.bf16.mxu1 %v4599_v22 }
 0x2d7   :  { %v984_v54 = vpop.f32.mrb[62].mxu0  ;;  %v1018_v58 = vmax.f32 %v982_v53, 0.0 }
 0x2d8   :  { %v1019_v56 = vmax.f32 %v984_v54, 0.0  ;;  %v986_v57 = vpop.f32.mrb[63].mxu0 }
 0x2d9   :  { %v1020_v59 = vmax.f32 %v986_v57, 0.0  ;;  %1956 = vmatpush1.bf16.msra.mxu1 %v4597_v23 }
 0x2da   :  { %v1035_v60 = vpack.c.bf16 %v1019_v56, %v1017_v55  ;;  %1957 = vmatprep.subr.bf16.mxu1 %v4602_v24 }
 0x2db   :  { %v1036_v61 = vpack.c.bf16 %v1020_v59, %v1018_v58 }
 0x2dd   :  { %1331 = vmatprep.mubr.bf16.mxu1 %v1036_v61  ;;  %1958 = vmatpush1.bf16.msra.mxu1 %v4600_v25 }
 0x2de   :  { %1332 = vmatmul.mubr.bf16.gmra.mrb[60].mxu1 %v1035_v60  ;;  %1959 = vmatprep.subr.bf16.mxu1 %v4605_v26 }
 0x2e1   :  { %1960 = vmatpush1.bf16.msra.mxu1 %v4603_v27 }
 0x2e2   :  { %1961 = vmatprep.subr.bf16.mxu1 %v4608_v28 }
 0x2e5   :  { %1962 = vmatpush1.bf16.msra.mxu1 %v4606_v29 }
 0x379   :  { %v1263_v30 = vpop.f32.mrb[32].mxu1 }
 0x37a   :  { %v1265_v31 = vpop.f32.mrb[33].mxu1  ;;  %v1342_v33 = vmax.f32 %v1263_v30, 0.0 }
 0x37b   :  { %v1267_v32 = vpop.f32.mrb[34].mxu1  ;;  %v1343_v36 = vmax.f32 %v1265_v31, 0.0 }
 0x37c   :  { %v1344_v34 = vmax.f32 %v1267_v32, 0.0  ;;  %v1269_v35 = vpop.f32.mrb[35].mxu1 }
 0x37d   :  { %v1345_v37 = vmax.f32 %v1269_v35, 0.0 }
 0x37e   :  { %v1374_v38 = vpack.c.bf16 %v1344_v34, %v1342_v33 }
 0x37f   :  { %v1375_v39 = vpack.c.bf16 %v1345_v37, %v1343_v36 }
 0x381   :  { %v1273_v40 = vpop.f32.mrb[36].mxu1  ;;  %1614 = vmatprep.mubr.bf16.mxu0 %v1375_v39 }
 0x382   :  { %v1275_v41 = vpop.f32.mrb[37].mxu1  ;;  %1615 = vmatmul.mubr.bf16.vlgmr.msra.gmra.mrb[64].mxu0 %v1374_v38  ;;  %v1346_v43 = vmax.f32 %v1273_v40, 0.0 }
 0x383   :  { %v1277_v42 = vpop.f32.mrb[38].mxu1  ;;  %v1347_v46 = vmax.f32 %v1275_v41, 0.0 }
 0x384   :  { %v1348_v44 = vmax.f32 %v1277_v42, 0.0  ;;  %v1279_v45 = vpop.f32.mrb[39].mxu1 }
 0x385   :  { %v1349_v47 = vmax.f32 %v1279_v45, 0.0 }
 0x386   :  { %v1376_v48 = vpack.c.bf16 %v1348_v44, %v1346_v43 }
 0x387   :  { %v1377_v49 = vpack.c.bf16 %v1349_v47, %v1347_v46  ;;  %v4611_v46 = vld [vmem:[%s6767_s7 + $0xe4] ss:$8 sps:$4 sm:$0xff]   ;;  %v4609_v47 = vld [vmem:[%s6767_s7 + $0xe0] ss:$8 sps:$4 sm:$0xff]  }
 0x388   :  { %1963 = vmatprep.subr.bf16.mxu1 %v4611_v46 }
 0x389   :  { %v1283_v50 = vpop.f32.mrb[40].mxu1  ;;  %1624 = vmatprep.mubr.bf16.mxu0 %v1377_v49  ;;  %1964 = vmatpush1.bf16.msra.mxu1 %v4609_v47  ;;  %v4612_v49 = vld [vmem:[%s6767_s7 + $0xf0] ss:$8 sps:$4 sm:$0xff]  }
 0x38a   :  { %v1285_v51 = vpop.f32.mrb[41].mxu1  ;;  %1625 = vmatmul.mubr.bf16.gmra.mrb[68].mxu0 %v1376_v48  ;;  %v1350_v53 = vmax.f32 %v1283_v50, 0.0  ;;  %v4614_v48 = vld [vmem:[%s6767_s7 + $0xf4] ss:$8 sps:$4 sm:$0xff]  }
 0x38b   :  { %v1287_v52 = vpop.f32.mrb[42].mxu1  ;;  %v1351_v56 = vmax.f32 %v1285_v51, 0.0  ;;  %1965 = vmatprep.subr.bf16.mxu1 %v4614_v48  ;;  %v4615_v50 = vld [vmem:[%s6768_s8] ss:$28 sps:$4 sm:$0xff]   ;;  %v4644_v48 = vld [vmem:[%s6768_s8 + $0xec] ss:$28 sps:$4 sm:$0xff]  }
 0x38c   :  { %v1352_v54 = vmax.f32 %v1287_v52, 0.0  ;;  %v1289_v55 = vpop.f32.mrb[43].mxu1  ;;  %v4617_v51 = vld [vmem:[%s6768_s8 + $0x4] ss:$28 sps:$4 sm:$0xff]   ;;  %v4620_v52 = vld [vmem:[%s6768_s8 + $0xc] ss:$28 sps:$4 sm:$0xff]  }
 0x38d   :  { %v1353_v57 = vmax.f32 %v1289_v55, 0.0  ;;  %1966 = vmatpush1.bf16.msra.mxu1 %v4612_v49  ;;  %2800 = vmatprep.subr.bf16.mxu0 %v4617_v51  ;;  %v4629_v55 = vld [vmem:[%s6768_s8 + $0x74] ss:$28 sps:$4 sm:$0xff]  }
 0x38e   :  { %v1378_v58 = vpack.c.bf16 %v1352_v54, %v1350_v53  ;;  %v4623_v53 = vld [vmem:[%s6768_s8 + $0x3c] ss:$28 sps:$4 sm:$0xff]   ;;  %2801 = vmatpush1.bf16.msra.mxu0 %v4615_v50  ;;  %2913 = vmatprep.subr.bf16.mxu1 %v4620_v52 }
 0x38f   :  { %v1379_v59 = vpack.c.bf16 %v1353_v57, %v1351_v56  ;;  %v4621_v54 = vld [vmem:[%s6768_s8 + $0x38] ss:$28 sps:$4 sm:$0xff]   ;;  %2802 = vmatprep.subr.bf16.mxu0 %v4623_v53  ;;  %v4627_v56 = vld [vmem:[%s6768_s8 + $0x70] ss:$28 sps:$4 sm:$0xff]   ;;  %v4642_v53 = vld [vmem:[%s6768_s8 + $0xe8] ss:$28 sps:$4 sm:$0xff]  }
 0x390   :  { %v4635_v57 = vld [vmem:[%s6768_s8 + $0xac] ss:$28 sps:$4 sm:$0xff]  }
 0x391   :  { %v1293_v60 = vpop.f32.mrb[44].mxu1  ;;  %1634 = vmatprep.mubr.bf16.mxu0 %v1379_v59  ;;  %v4641_v59 = vld [vmem:[%s6768_s8 + $0xe4] ss:$28 sps:$4 sm:$0xff]  }
 0x392   :  { %v1295_v61 = vpop.f32.mrb[45].mxu1  ;;  %1635 = vmatmul.mubr.bf16.gmra.mrb[72].mxu0 %v1378_v58  ;;  %v1354_v63 = vmax.f32 %v1293_v60, 0.0  ;;  %v4633_v58 = vld [vmem:[%s6768_s8 + $0xa8] ss:$28 sps:$4 sm:$0xff]   ;;  %v4639_v60 = vld [vmem:[%s6768_s8 + $0xe0] ss:$28 sps:$4 sm:$0xff]  }
 0x393   :  { %v1297_v62 = vpop.f32.mrb[46].mxu1  ;;  %v1355_v2 = vmax.f32 %v1295_v61, 0.0  ;;  %2803 = vmatpush1.bf16.msra.mxu0 %v4621_v54  ;;  %v4647_v61 = vld [vmem:[%s6768_s8 + $0x11c] ss:$28 sps:$4 sm:$0xff]   ;;  %v4650_v54 = vld [vmem:[%s6768_s8 + $0x124] ss:$28 sps:$4 sm:$0xff]  }
 0x394   :  { %v1356_v0 = vmax.f32 %v1297_v62, 0.0  ;;  %v1299_v1 = vpop.f32.mrb[47].mxu1  ;;  %2804 = vmatprep.subr.bf16.mxu0 %v4629_v55  ;;  %v4645_v62 = vld [vmem:[%s6768_s8 + $0x118] ss:$28 sps:$4 sm:$0xff]  }
 0x395   :  { %v1357_v3 = vmax.f32 %v1299_v1, 0.0  ;;  %v4659_v1 = vld [vmem:[%s6768_s8 + $0x18c] ss:$28 sps:$4 sm:$0xff]  }
 0x396   :  { %v1380_v4 = vpack.c.bf16 %v1356_v0, %v1354_v63  ;;  %v4653_v63 = vld [vmem:[%s6768_s8 + $0x154] ss:$28 sps:$4 sm:$0xff]  }
 0x397   :  { %v1381_v5 = vpack.c.bf16 %v1357_v3, %v1355_v2  ;;  %2805 = vmatpush1.bf16.msra.mxu0 %v4627_v56  ;;  %v4651_v0 = vld [vmem:[%s6768_s8 + $0x150] ss:$28 sps:$4 sm:$0xff]   ;;  %v4657_v2 = vld [vmem:[%s6768_s8 + $0x188] ss:$28 sps:$4 sm:$0xff]  }
 0x398   :  { %2806 = vmatprep.subr.bf16.mxu0 %v4635_v57  ;;  %v4665_v3 = vld [vmem:[%s6768_s8 + $0x1c4] ss:$28 sps:$4 sm:$0xff]  }
 0x399   :  { %v1303_v6 = vpop.f32.mrb[48].mxu1  ;;  %1644 = vmatprep.mubr.bf16.mxu0 %v1381_v5  ;;  %v4671_v5 = vld [vmem:[%s6768_s8 + $0x1fc] ss:$28 sps:$4 sm:$0xff]  }
 0x39a   :  { %v1305_v7 = vpop.f32.mrb[49].mxu1  ;;  %1645 = vmatmul.mubr.bf16.gmra.mrb[76].mxu0 %v1380_v4  ;;  %v1358_v9 = vmax.f32 %v1303_v6, 0.0  ;;  %v4663_v4 = vld [vmem:[%s6768_s8 + $0x1c0] ss:$28 sps:$4 sm:$0xff]   ;;  %v4669_v6 = vld [vmem:[%s6768_s8 + $0x1f8] ss:$28 sps:$4 sm:$0xff]  }
 0x39b   :  { %v1307_v8 = vpop.f32.mrb[50].mxu1  ;;  %v1359_v12 = vmax.f32 %v1305_v7, 0.0  ;;  %2807 = vmatpush1.bf16.msra.mxu0 %v4633_v58  ;;  %v4677_v7 = vld [vmem:[%s6768_s8 + $0x234] ss:$28 sps:$4 sm:$0xff]   ;;  %v4648_v58 = vld [vmem:[%s6768_s8 + $0x120] ss:$28 sps:$4 sm:$0xff]  }
 0x39c   :  { %v1360_v10 = vmax.f32 %v1307_v8, 0.0  ;;  %v1309_v11 = vpop.f32.mrb[51].mxu1  ;;  %2808 = vmatprep.subr.bf16.mxu0 %v4641_v59  ;;  %v4675_v8 = vld [vmem:[%s6768_s8 + $0x230] ss:$28 sps:$4 sm:$0xff]  }
 0x39d   :  { %v1361_v13 = vmax.f32 %v1309_v11, 0.0  ;;  %v4689_v11 = vld [vmem:[%s6768_s8 + $0x2a4] ss:$28 sps:$4 sm:$0xff]  }
 0x39e   :  { %v1382_v14 = vpack.c.bf16 %v1360_v10, %v1358_v9  ;;  %v4683_v9 = vld [vmem:[%s6768_s8 + $0x26c] ss:$28 sps:$4 sm:$0xff]  }
 0x39f   :  { %v1383_v15 = vpack.c.bf16 %v1361_v13, %v1359_v12  ;;  %2809 = vmatpush1.bf16.msra.mxu0 %v4639_v60  ;;  %v4681_v10 = vld [vmem:[%s6768_s8 + $0x268] ss:$28 sps:$4 sm:$0xff]   ;;  %v4687_v12 = vld [vmem:[%s6768_s8 + $0x2a0] ss:$28 sps:$4 sm:$0xff]  }
 0x3a0   :  { %2810 = vmatprep.subr.bf16.mxu0 %v4647_v61  ;;  %v4695_v13 = vld [vmem:[%s6768_s8 + $0x2dc] ss:$28 sps:$4 sm:$0xff]  }
 0x3a1   :  { %v1313_v16 = vpop.f32.mrb[52].mxu1  ;;  %1654 = vmatprep.mubr.bf16.mxu0 %v1383_v15 }
 0x3a2   :  { %v1315_v17 = vpop.f32.mrb[53].mxu1  ;;  %1655 = vmatmul.mubr.bf16.gmra.mrb[80].mxu0 %v1382_v14  ;;  %v1362_v19 = vmax.f32 %v1313_v16, 0.0  ;;  %v4693_v14 = vld [vmem:[%s6768_s8 + $0x2d8] ss:$28 sps:$4 sm:$0xff]  }
 0x3a3   :  { %v1317_v18 = vpop.f32.mrb[54].mxu1  ;;  %v1363_v22 = vmax.f32 %v1315_v17, 0.0  ;;  %2811 = vmatpush1.bf16.msra.mxu0 %v4645_v62  ;;  %v4656_v62 = vld [vmem:[%s6768_s8 + $0x15c] ss:$28 sps:$4 sm:$0xff]  }
 0x3a4   :  { %v1364_v20 = vmax.f32 %v1317_v18, 0.0  ;;  %v1319_v21 = vpop.f32.mrb[55].mxu1  ;;  %2812 = vmatprep.subr.bf16.mxu0 %v4653_v63 }
 0x3a5   :  { %v1365_v23 = vmax.f32 %v1319_v21, 0.0 }
 0x3a6   :  { %v1384_v24 = vpack.c.bf16 %v1364_v20, %v1362_v19 }
 0x3a7   :  { %v1385_v25 = vpack.c.bf16 %v1365_v23, %v1363_v22  ;;  %2813 = vmatpush1.bf16.msra.mxu0 %v4651_v0 }
 0x3a8   :  { %2814 = vmatprep.subr.bf16.mxu0 %v4659_v1 }
 0x3a9   :  { %v1323_v26 = vpop.f32.mrb[56].mxu1  ;;  %1664 = vmatprep.mubr.bf16.mxu0 %v1385_v25  ;;  %v4618_v25 = vld [vmem:[%s6768_s8 + $0x8] ss:$28 sps:$4 sm:$0xff]  }
 0x3aa   :  { %v1325_v27 = vpop.f32.mrb[57].mxu1  ;;  %1665 = vmatmul.mubr.bf16.gmra.mrb[84].mxu0 %v1384_v24  ;;  %v1366_v29 = vmax.f32 %v1323_v26, 0.0  ;;  %v4626_v26 = vld [vmem:[%s6768_s8 + $0x44] ss:$28 sps:$4 sm:$0xff]  }
 0x3ab   :  { %v1327_v28 = vpop.f32.mrb[58].mxu1  ;;  %v1367_v32 = vmax.f32 %v1325_v27, 0.0  ;;  %2815 = vmatpush1.bf16.msra.mxu0 %v4657_v2 }
 0x3ac   :  { %v1368_v30 = vmax.f32 %v1327_v28, 0.0  ;;  %v1329_v31 = vpop.f32.mrb[59].mxu1  ;;  %2816 = vmatprep.subr.bf16.mxu0 %v4665_v3  ;;  %v4654_v3 = vld [vmem:[%s6768_s8 + $0x158] ss:$28 sps:$4 sm:$0xff]  }
 0x3ad   :  { %v1369_v33 = vmax.f32 %v1329_v31, 0.0 }
 0x3ae   :  { %v1386_v34 = vpack.c.bf16 %v1368_v30, %v1366_v29  ;;  %v4624_v30 = vld [vmem:[%s6768_s8 + $0x40] ss:$28 sps:$4 sm:$0xff]  }
 0x3af   :  { %v1387_v35 = vpack.c.bf16 %v1369_v33, %v1367_v32  ;;  %2817 = vmatpush1.bf16.msra.mxu0 %v4663_v4  ;;  %v4662_v4 = vld [vmem:[%s6768_s8 + $0x194] ss:$28 sps:$4 sm:$0xff]  }
 0x3b0   :  { %2818 = vmatprep.subr.bf16.mxu0 %v4671_v5 }
 0x3b1   :  { %v1333_v36 = vpop.f32.mrb[60].mxu1  ;;  %1674 = vmatprep.mubr.bf16.mxu0 %v1387_v35 }
 0x3b2   :  { %v1335_v37 = vpop.f32.mrb[61].mxu1  ;;  %1675 = vmatmul.mubr.bf16.gmra.mrb[88].mxu0 %v1386_v34  ;;  %v1370_v39 = vmax.f32 %v1333_v36, 0.0  ;;  %v4632_v34 = vld [vmem:[%s6768_s8 + $0x7c] ss:$28 sps:$4 sm:$0xff]  }
 0x3b3   :  { %v1337_v38 = vpop.f32.mrb[62].mxu1  ;;  %v1371_v42 = vmax.f32 %v1335_v37, 0.0  ;;  %2819 = vmatpush1.bf16.msra.mxu0 %v4669_v6 }
 0x3b4   :  { %v1372_v40 = vmax.f32 %v1337_v38, 0.0  ;;  %v1339_v41 = vpop.f32.mrb[63].mxu1  ;;  %2820 = vmatprep.subr.bf16.mxu0 %v4677_v7 }
 0x3b5   :  { %v1373_v43 = vmax.f32 %v1339_v41, 0.0 }
 0x3b6   :  { %v1388_v44 = vpack.c.bf16 %v1372_v40, %v1370_v39  ;;  %v4630_v39 = vld [vmem:[%s6768_s8 + $0x78] ss:$28 sps:$4 sm:$0xff]  }
 0x3b7   :  { %v1389_v45 = vpack.c.bf16 %v1373_v43, %v1371_v42  ;;  %2821 = vmatpush1.bf16.msra.mxu0 %v4675_v8  ;;  %v4638_v40 = vld [vmem:[%s6768_s8 + $0xb4] ss:$28 sps:$4 sm:$0xff]  }
 0x3b8   :  { %2822 = vmatprep.subr.bf16.mxu0 %v4683_v9  ;;  %v4660_v8 = vld [vmem:[%s6768_s8 + $0x190] ss:$28 sps:$4 sm:$0xff]  }
 0x3b9   :  { %1684 = vmatprep.mubr.bf16.mxu0 %v1389_v45 }
 0x3ba   :  { %1685 = vmatmul.mubr.bf16.gmra.mrb[92].mxu0 %v1388_v44  ;;  %v4636_v44 = vld [vmem:[%s6768_s8 + $0xb0] ss:$28 sps:$4 sm:$0xff]  }
 0x3bb   :  { %2823 = vmatpush1.bf16.msra.mxu0 %v4681_v10 }
 0x3bc   :  { %2824 = vmatprep.subr.bf16.mxu0 %v4689_v11 }
 0x3bf   :  { %2825 = vmatpush1.bf16.msra.mxu0 %v4687_v12  ;;  %v4668_v12 = vld [vmem:[%s6768_s8 + $0x1cc] ss:$28 sps:$4 sm:$0xff]  }
 0x3c0   :  { %2826 = vmatprep.subr.bf16.mxu0 %v4695_v13 }
 0x3c3   :  { %2827 = vmatpush1.bf16.msra.mxu0 %v4693_v14 }
 0x455   :  { %v1616_v15 = vpop.f32.mrb[64].mxu0 }
 0x456   :  { %v1618_v16 = vpop.f32.mrb[65].mxu0  ;;  %v1695_v18 = vmax.f32 %v1616_v15, 0.0 }
 0x457   :  { %v1620_v17 = vpop.f32.mrb[66].mxu0  ;;  %v1696_v21 = vmax.f32 %v1618_v16, 0.0 }
 0x458   :  { %v1697_v19 = vmax.f32 %v1620_v17, 0.0  ;;  %v1622_v20 = vpop.f32.mrb[67].mxu0  ;;  %v4666_v17 = vld [vmem:[%s6768_s8 + $0x1c8] ss:$28 sps:$4 sm:$0xff]  }
 0x459   :  { %v1698_v22 = vmax.f32 %v1622_v20, 0.0 }
 0x45a   :  { %v1727_v23 = vpack.c.bf16 %v1697_v19, %v1695_v18  ;;  %v4674_v18 = vld [vmem:[%s6768_s8 + $0x204] ss:$28 sps:$4 sm:$0xff]  }
 0x45b   :  { %v1728_v24 = vpack.c.bf16 %v1698_v22, %v1696_v21  ;;  %v4672_v22 = vld [vmem:[%s6768_s8 + $0x200] ss:$28 sps:$4 sm:$0xff]  }
 0x45d   :  { %v1626_v27 = vpop.f32.mrb[68].mxu0  ;;  %1967 = vmatprep.mubr.bf16.mxu1 %v1728_v24 }
 0x45e   :  { %v1628_v28 = vpop.f32.mrb[69].mxu0  ;;  %1968 = vmatmul.mubr.bf16.vlgmr.msra.gmra.mrb[64].mxu1 %v1727_v23  ;;  %v1699_v31 = vmax.f32 %v1626_v27, 0.0 }
 0x45f   :  { %v1630_v29 = vpop.f32.mrb[70].mxu0  ;;  %2914 = vmatpush1.bf16.msra.mxu1 %v4618_v25  ;;  %v1700_v35 = vmax.f32 %v1628_v28, 0.0 }
 0x460   :  { %v1701_v32 = vmax.f32 %v1630_v29, 0.0  ;;  %v1632_v33 = vpop.f32.mrb[71].mxu0  ;;  %2915 = vmatprep.subr.bf16.mxu1 %v4626_v26  ;;  %v4680_v26 = vld [vmem:[%s6768_s8 + $0x23c] ss:$28 sps:$4 sm:$0xff]  }
 0x461   :  { %v1702_v36 = vmax.f32 %v1632_v33, 0.0 }
 0x462   :  { %v1729_v37 = vpack.c.bf16 %v1701_v32, %v1699_v31  ;;  %v4678_v31 = vld [vmem:[%s6768_s8 + $0x238] ss:$28 sps:$4 sm:$0xff]  }
 0x463   :  { %v1730_v38 = vpack.c.bf16 %v1702_v36, %v1700_v35  ;;  %2916 = vmatpush1.bf16.msra.mxu1 %v4624_v30  ;;  %v4686_v32 = vld [vmem:[%s6768_s8 + $0x274] ss:$28 sps:$4 sm:$0xff]  }
 0x464   :  { %2917 = vmatprep.subr.bf16.mxu1 %v4632_v34  ;;  %v4684_v36 = vld [vmem:[%s6768_s8 + $0x270] ss:$28 sps:$4 sm:$0xff]  }
 0x465   :  { %v1636_v41 = vpop.f32.mrb[72].mxu0  ;;  %1977 = vmatprep.mubr.bf16.mxu1 %v1730_v38 }
 0x466   :  { %v1638_v42 = vpop.f32.mrb[73].mxu0  ;;  %1978 = vmatmul.mubr.bf16.gmra.mrb[68].mxu1 %v1729_v37  ;;  %v1703_v45 = vmax.f32 %v1636_v41, 0.0 }
 0x467   :  { %v1640_v43 = vpop.f32.mrb[74].mxu0  ;;  %2918 = vmatpush1.bf16.msra.mxu1 %v4630_v39  ;;  %v1704_v49 = vmax.f32 %v1638_v42, 0.0 }
 0x468   :  { %v1705_v46 = vmax.f32 %v1640_v43, 0.0  ;;  %v1642_v47 = vpop.f32.mrb[75].mxu0  ;;  %2919 = vmatprep.subr.bf16.mxu1 %v4638_v40  ;;  %v4692_v40 = vld [vmem:[%s6768_s8 + $0x2ac] ss:$28 sps:$4 sm:$0xff]  }
 0x469   :  { %v1706_v50 = vmax.f32 %v1642_v47, 0.0 }
 0x46a   :  { %v1731_v51 = vpack.c.bf16 %v1705_v46, %v1703_v45  ;;  %v4690_v45 = vld [vmem:[%s6768_s8 + $0x2a8] ss:$28 sps:$4 sm:$0xff]  }
 0x46b   :  { %v1732_v52 = vpack.c.bf16 %v1706_v50, %v1704_v49  ;;  %2920 = vmatpush1.bf16.msra.mxu1 %v4636_v44  ;;  %v4698_v46 = vld [vmem:[%s6768_s8 + $0x2e4] ss:$28 sps:$4 sm:$0xff]  }
 0x46c   :  { %2921 = vmatprep.subr.bf16.mxu1 %v4644_v48  ;;  %v4696_v50 = vld [vmem:[%s6768_s8 + $0x2e0] ss:$28 sps:$4 sm:$0xff]  }
 0x46d   :  { %v1646_v55 = vpop.f32.mrb[76].mxu0  ;;  %1987 = vmatprep.mubr.bf16.mxu1 %v1732_v52 }
 0x46e   :  { %v1648_v56 = vpop.f32.mrb[77].mxu0  ;;  %1988 = vmatmul.mubr.bf16.gmra.mrb[72].mxu1 %v1731_v51  ;;  %v1707_v59 = vmax.f32 %v1646_v55, 0.0 }
 0x46f   :  { %v1650_v57 = vpop.f32.mrb[78].mxu0  ;;  %2922 = vmatpush1.bf16.msra.mxu1 %v4642_v53  ;;  %v1708_v63 = vmax.f32 %v1648_v56, 0.0 }
 0x470   :  { %v1709_v60 = vmax.f32 %v1650_v57, 0.0  ;;  %v1652_v61 = vpop.f32.mrb[79].mxu0  ;;  %2923 = vmatprep.subr.bf16.mxu1 %v4650_v54 }
 0x471   :  { %v1710_v0 = vmax.f32 %v1652_v61, 0.0  ;;  %v4702_v61 = vld [vmem:[%s6768_s8 + $0x318] ss:$28 sps:$4 sm:$0xff]  }
 0x472   :  { %v1733_v1 = vpack.c.bf16 %v1709_v60, %v1707_v59  ;;  %v4704_v59 = vld [vmem:[%s6768_s8 + $0x31c] ss:$28 sps:$4 sm:$0xff]   ;;  %v4699_v60 = vld [vmem:[%s6768_s8 + $0x310] ss:$28 sps:$4 sm:$0xff]  }
 0x473   :  { %v1734_v2 = vpack.c.bf16 %v1710_v0, %v1708_v63  ;;  %2924 = vmatpush1.bf16.msra.mxu1 %v4648_v58  ;;  %v4701_v58 = vld [vmem:[%s6768_s8 + $0x314] ss:$28 sps:$4 sm:$0xff]   ;;  %v4705_v0 = vld [vmem:[%s6768_s8 + $0x348] ss:$28 sps:$4 sm:$0xff]  }
 0x474   :  { %2925 = vmatprep.subr.bf16.mxu1 %v4656_v62  ;;  %2828 = vmatprep.subr.bf16.mxu0 %v4701_v58  ;;  %v4707_v62 = vld [vmem:[%s6768_s8 + $0x34c] ss:$28 sps:$4 sm:$0xff]   ;;  %v4710_v63 = vld [vmem:[%s6768_s8 + $0x354] ss:$28 sps:$4 sm:$0xff]   ;;  %v4731_v58 = vld [vmem:[%s6768_s8 + $0x164] ss:$28 sps:$4 sm:$0xff]  }
 0x475   :  { %v1656_v5 = vpop.f32.mrb[80].mxu0  ;;  %1997 = vmatprep.mubr.bf16.mxu1 %v1734_v2  ;;  %2829 = vmatpush1.bf16.msra.mxu0 %v4699_v60  ;;  %v4713_v2 = vld [vmem:[%s6768_s8 + $0x14] ss:$28 sps:$4 sm:$0xff]  }
 0x476   :  { %v1658_v6 = vpop.f32.mrb[81].mxu0  ;;  %1998 = vmatmul.mubr.bf16.gmra.mrb[76].mxu1 %v1733_v1  ;;  %v1711_v9 = vmax.f32 %v1656_v5, 0.0  ;;  %v4708_v1 = vld [vmem:[%s6768_s8 + $0x350] ss:$28 sps:$4 sm:$0xff]   ;;  %2830 = vmatprep.subr.bf16.mxu0 %v4707_v62 }
 0x477   :  { %v1660_v7 = vpop.f32.mrb[82].mxu0  ;;  %2926 = vmatpush1.bf16.msra.mxu1 %v4654_v3  ;;  %v1712_v13 = vmax.f32 %v1658_v6, 0.0  ;;  %v5598_v3 = vld [vmem:[%s6768_s8 + $0x1d8] ss:$28 sps:$4 sm:$0xff]  }
 0x478   :  { %v1713_v10 = vmax.f32 %v1660_v7, 0.0  ;;  %v1662_v11 = vpop.f32.mrb[83].mxu0  ;;  %2927 = vmatprep.subr.bf16.mxu1 %v4662_v4 }
 0x479   :  { %v1714_v14 = vmax.f32 %v1662_v11, 0.0  ;;  %2831 = vmatpush1.bf16.msra.mxu0 %v4705_v0 }
 0x47a   :  { %v1735_v15 = vpack.c.bf16 %v1713_v10, %v1711_v9  ;;  %3026 = vmatprep.subr.bf16.mxu0 %v4713_v2 }
 0x47b   :  { %v1736_v16 = vpack.c.bf16 %v1714_v14, %v1712_v13  ;;  %2928 = vmatpush1.bf16.msra.mxu1 %v4660_v8  ;;  %v4711_v14 = vld [vmem:[%s6768_s8 + $0x10] ss:$28 sps:$4 sm:$0xff]  }
 0x47c   :  { %2929 = vmatprep.subr.bf16.mxu1 %v4668_v12 }
 0x47d   :  { %v1666_v19 = vpop.f32.mrb[84].mxu0  ;;  %2007 = vmatprep.mubr.bf16.mxu1 %v1736_v16  ;;  %v4716_v16 = vld [vmem:[%s6768_s8 + $0x4c] ss:$28 sps:$4 sm:$0xff]  }
 0x47e   :  { %v1668_v20 = vpop.f32.mrb[85].mxu0  ;;  %2008 = vmatmul.mubr.bf16.gmra.mrb[80].mxu1 %v1735_v15  ;;  %v1715_v23 = vmax.f32 %v1666_v19, 0.0  ;;  %v5611_v15 = vld [vmem:[%s6768_s8 + $0x18] ss:$28 sps:$4 sm:$0xff]  }
 0x47f   :  { %v1670_v21 = vpop.f32.mrb[86].mxu0  ;;  %2930 = vmatpush1.bf16.msra.mxu1 %v4666_v17  ;;  %v1716_v27 = vmax.f32 %v1668_v20, 0.0  ;;  %v5619_v17 = vld [vmem:[%s6768_s8 + $0x210] ss:$28 sps:$4 sm:$0xff]   ;;  %v4714_v20 = vld [vmem:[%s6768_s8 + $0x48] ss:$28 sps:$4 sm:$0xff]  }
 0x480   :  { %v1717_v24 = vmax.f32 %v1670_v21, 0.0  ;;  %v1672_v25 = vpop.f32.mrb[87].mxu0  ;;  %2931 = vmatprep.subr.bf16.mxu1 %v4674_v18 }
 0x481   :  { %v1718_v28 = vmax.f32 %v1672_v25, 0.0 }
 0x482   :  { %v1737_v29 = vpack.c.bf16 %v1717_v24, %v1715_v23  ;;  %v5635_v23 = vld [vmem:[%s6768_s8 + $0x50] ss:$28 sps:$4 sm:$0xff]  }
 0x483   :  { %v1738_v30 = vpack.c.bf16 %v1718_v28, %v1716_v27  ;;  %2932 = vmatpush1.bf16.msra.mxu1 %v4672_v22  ;;  %v4719_v22 = vld [vmem:[%s6768_s8 + $0x84] ss:$28 sps:$4 sm:$0xff]  }
 0x484   :  { %2933 = vmatprep.subr.bf16.mxu1 %v4680_v26  ;;  %v5641_v27 = vld [vmem:[%s6768_s8 + $0x248] ss:$28 sps:$4 sm:$0xff]  }
 0x485   :  { %v1676_v33 = vpop.f32.mrb[88].mxu0  ;;  %2017 = vmatprep.mubr.bf16.mxu1 %v1738_v30 }
 0x486   :  { %v1678_v34 = vpop.f32.mrb[89].mxu0  ;;  %2018 = vmatmul.mubr.bf16.gmra.mrb[84].mxu1 %v1737_v29  ;;  %v1719_v37 = vmax.f32 %v1676_v33, 0.0  ;;  %v5654_v33 = vld [vmem:[%s6768_s8 + $0x88] ss:$28 sps:$4 sm:$0xff]  }
 0x487   :  { %v1680_v35 = vpop.f32.mrb[90].mxu0  ;;  %2934 = vmatpush1.bf16.msra.mxu1 %v4678_v31  ;;  %v1720_v41 = vmax.f32 %v1678_v34, 0.0  ;;  %v4722_v34 = vld [vmem:[%s6768_s8 + $0xbc] ss:$28 sps:$4 sm:$0xff]  }
 0x488   :  { %v1721_v38 = vmax.f32 %v1680_v35, 0.0  ;;  %v1682_v39 = vpop.f32.mrb[91].mxu0  ;;  %2935 = vmatprep.subr.bf16.mxu1 %v4686_v32  ;;  %v4717_v32 = vld [vmem:[%s6768_s8 + $0x80] ss:$28 sps:$4 sm:$0xff]  }
 0x489   :  { %v1722_v42 = vmax.f32 %v1682_v39, 0.0  ;;  %v5663_v35 = vld [vmem:[%s6768_s8 + $0x280] ss:$28 sps:$4 sm:$0xff]  }
 0x48a   :  { %v1739_v43 = vpack.c.bf16 %v1721_v38, %v1719_v37  ;;  %v4720_v38 = vld [vmem:[%s6768_s8 + $0xb8] ss:$28 sps:$4 sm:$0xff]  }
 0x48b   :  { %v1740_v44 = vpack.c.bf16 %v1722_v42, %v1720_v41  ;;  %2936 = vmatpush1.bf16.msra.mxu1 %v4684_v36  ;;  %v5679_v41 = vld [vmem:[%s6768_s8 + $0xc0] ss:$28 sps:$4 sm:$0xff]  }
 0x48c   :  { %2937 = vmatprep.subr.bf16.mxu1 %v4692_v40  ;;  %v4725_v40 = vld [vmem:[%s6768_s8 + $0xf4] ss:$28 sps:$4 sm:$0xff]  }
 0x48d   :  { %v1686_v47 = vpop.f32.mrb[92].mxu0  ;;  %2027 = vmatprep.mubr.bf16.mxu1 %v1740_v44 }
 0x48e   :  { %v1688_v48 = vpop.f32.mrb[93].mxu0  ;;  %2028 = vmatmul.mubr.bf16.gmra.mrb[88].mxu1 %v1739_v43  ;;  %v1723_v51 = vmax.f32 %v1686_v47, 0.0 }
 0x48f   :  { %v1690_v49 = vpop.f32.mrb[94].mxu0  ;;  %2938 = vmatpush1.bf16.msra.mxu1 %v4690_v45  ;;  %v1724_v54 = vmax.f32 %v1688_v48, 0.0  ;;  %v5685_v45 = vld [vmem:[%s6768_s8 + $0x2b8] ss:$28 sps:$4 sm:$0xff]  }
 0x490   :  { %v1725_v52 = vmax.f32 %v1690_v49, 0.0  ;;  %v1692_v53 = vpop.f32.mrb[95].mxu0  ;;  %2939 = vmatprep.subr.bf16.mxu1 %v4698_v46 }
 0x491   :  { %v1726_v55 = vmax.f32 %v1692_v53, 0.0  ;;  %v5707_v53 = vld [vmem:[%s6768_s8 + $0x2f0] ss:$28 sps:$4 sm:$0xff]  }
 0x492   :  { %v1741_v56 = vpack.c.bf16 %v1725_v52, %v1723_v51  ;;  %v5698_v51 = vld [vmem:[%s6768_s8 + $0xf8] ss:$28 sps:$4 sm:$0xff]   ;;  %v4728_v52 = vld [vmem:[%s6768_s8 + $0x12c] ss:$28 sps:$4 sm:$0xff]  }
 0x493   :  { %v1742_v57 = vpack.c.bf16 %v1726_v55, %v1724_v54  ;;  %2940 = vmatpush1.bf16.msra.mxu1 %v4696_v50  ;;  %v4723_v50 = vld [vmem:[%s6768_s8 + $0xf0] ss:$28 sps:$4 sm:$0xff]  }
 0x494   :  { %2941 = vmatprep.subr.bf16.mxu1 %v4704_v59  ;;  %v5723_v59 = vld [vmem:[%s6768_s8 + $0x130] ss:$28 sps:$4 sm:$0xff]  }
 0x495   :  { %2037 = vmatprep.mubr.bf16.mxu1 %v1742_v57 }
 0x496   :  { %2038 = vmatmul.mubr.bf16.gmra.mrb[92].mxu1 %v1741_v56  ;;  %v4726_v56 = vld [vmem:[%s6768_s8 + $0x128] ss:$28 sps:$4 sm:$0xff]  }
 0x497   :  { %2942 = vmatpush1.bf16.msra.mxu1 %v4702_v61 }
 0x498   :  { %2943 = vmatprep.subr.bf16.mxu1 %v4710_v63  ;;  %v5729_v63 = vld [vmem:[%s6768_s8 + $0x328] ss:$28 sps:$4 sm:$0xff]  }
 0x49b   :  { %2944 = vmatpush1.bf16.msra.mxu1 %v4708_v1 }
 0x49c   :  { %4337 = vmatprep.subr.bf16.mxu1 %v5598_v3 }
 0x531   :  { %v1969_v4 = vpop.f32.mrb[64].mxu1 }
 0x532   :  { %v1971_v5 = vpop.f32.mrb[65].mxu1  ;;  %v2048_v7 = vmax.f32 %v1969_v4, 0.0 }
 0x533   :  { %v1973_v6 = vpop.f32.mrb[66].mxu1  ;;  %v2049_v10 = vmax.f32 %v1971_v5, 0.0  ;;  %v4729_v5 = vld [vmem:[%s6768_s8 + $0x160] ss:$28 sps:$4 sm:$0xff]  }
 0x534   :  { %v2050_v8 = vmax.f32 %v1973_v6, 0.0  ;;  %v1975_v9 = vpop.f32.mrb[67].mxu1  ;;  %v5742_v6 = vld [vmem:[%s6768_s8 + $0x168] ss:$28 sps:$4 sm:$0xff]  }
 0x535   :  { %v2051_v11 = vmax.f32 %v1975_v9, 0.0 }
 0x536   :  { %v5601_v12 = vpack.c.bf16 %v2050_v8, %v2048_v7  ;;  %v4734_v7 = vld [vmem:[%s6768_s8 + $0x19c] ss:$28 sps:$4 sm:$0xff]  }
 0x537   :  { %v5603_v13 = vpack.c.bf16 %v2051_v11, %v2049_v10  ;;  %v5751_v8 = vld [vmem:[%s6768_s8 + $0x360] ss:$28 sps:$4 sm:$0xff]  }
 0x539   :  { %v1979_v18 = vpop.f32.mrb[68].mxu1  ;;  %2832 = vmatprep.mubr.bf16.mxu0 %v5603_v13  ;;  %2945 = vmatprep.mubr.bf16.mxu1 %v5603_v13 }
 0x53a   :  { %v1981_v19 = vpop.f32.mrb[69].mxu1  ;;  %2833 = vmatmul.mubr.bf16.vlgmr.msra.gmra.mrb[96].mxu0 %v5601_v12  ;;  %2946 = vmatmul.mubr.bf16.vlgmr.msra.gmra.mrb[96].mxu1 %v5601_v12  ;;  %v2052_v24 = vmax.f32 %v1979_v18, 0.0 }
 0x53b   :  { %3027 = vmatpush1.bf16.msra.mxu0 %v4711_v14  ;;  %v1983_v21 = vpop.f32.mrb[70].mxu1  ;;  %4345 = vmatpush3.bf16.msra.mxu1 %v5611_v15  ;;  %v2053_v28 = vmax.f32 %v1981_v19, 0.0  ;;  %v4732_v14 = vld [vmem:[%s6768_s8 + $0x198] ss:$28 sps:$4 sm:$0xff]  }
 0x53c   :  { %v2054_v25 = vmax.f32 %v1983_v21, 0.0  ;;  %v1985_v26 = vpop.f32.mrb[71].mxu1  ;;  %3028 = vmatprep.subr.bf16.mxu0 %v4716_v16  ;;  %4338 = vmatprep.subr.bf16.mxu1 %v5619_v17  ;;  %v5764_v16 = vld [vmem:[%s6768_s8 + $0x1a0] ss:$28 sps:$4 sm:$0xff]   ;;  %v4737_v21 = vld [vmem:[%s6768_s8 + $0x1d4] ss:$28 sps:$4 sm:$0xff]  }
 0x53d   :  { %v2055_v29 = vmax.f32 %v1985_v26, 0.0 }
 0x53e   :  { %v5643_v30 = vpack.c.bf16 %v2054_v25, %v2052_v24 }
 0x53f   :  { %v5645_v31 = vpack.c.bf16 %v2055_v29, %v2053_v28  ;;  %3029 = vmatpush1.bf16.msra.mxu0 %v4714_v20  ;;  %4346 = vmatpush3.bf16.msra.mxu1 %v5635_v23  ;;  %v4735_v28 = vld [vmem:[%s6768_s8 + $0x1d0] ss:$28 sps:$4 sm:$0xff]  }
 0x540   :  { %3030 = vmatprep.subr.bf16.mxu0 %v4719_v22  ;;  %4339 = vmatprep.subr.bf16.mxu1 %v5641_v27  ;;  %v4742_v29 = vld [vmem:[%s6768_s8 + $0x20c] ss:$28 sps:$4 sm:$0xff]  }
 0x541   :  { %v1989_v36 = vpop.f32.mrb[72].mxu1  ;;  %2842 = vmatprep.mubr.bf16.mxu0 %v5645_v31  ;;  %2955 = vmatprep.mubr.bf16.mxu1 %v5645_v31 }
 0x542   :  { %v1991_v37 = vpop.f32.mrb[73].mxu1  ;;  %2843 = vmatmul.mubr.bf16.gmra.mrb[100].mxu0 %v5643_v30  ;;  %2956 = vmatmul.mubr.bf16.gmra.mrb[100].mxu1 %v5643_v30  ;;  %v2056_v42 = vmax.f32 %v1989_v36, 0.0 }
 0x543   :  { %3031 = vmatpush1.bf16.msra.mxu0 %v4717_v32  ;;  %v1993_v39 = vpop.f32.mrb[74].mxu1  ;;  %4347 = vmatpush3.bf16.msra.mxu1 %v5654_v33  ;;  %v2057_v46 = vmax.f32 %v1991_v37, 0.0  ;;  %v4740_v37 = vld [vmem:[%s6768_s8 + $0x208] ss:$28 sps:$4 sm:$0xff]  }
 0x544   :  { %v2058_v43 = vmax.f32 %v1993_v39, 0.0  ;;  %v1995_v44 = vpop.f32.mrb[75].mxu1  ;;  %3032 = vmatprep.subr.bf16.mxu0 %v4722_v34  ;;  %4340 = vmatprep.subr.bf16.mxu1 %v5663_v35 }
 0x545   :  { %v2059_v47 = vmax.f32 %v1995_v44, 0.0 }
 0x546   :  { %v5687_v48 = vpack.c.bf16 %v2058_v43, %v2056_v42  ;;  %v4747_v42 = vld [vmem:[%s6768_s8 + $0x244] ss:$28 sps:$4 sm:$0xff]  }
 0x547   :  { %v5689_v49 = vpack.c.bf16 %v2059_v47, %v2057_v46  ;;  %3033 = vmatpush1.bf16.msra.mxu0 %v4720_v38  ;;  %4348 = vmatpush3.bf16.msra.mxu1 %v5679_v41 }
 0x548   :  { %3034 = vmatprep.subr.bf16.mxu0 %v4725_v40  ;;  %4341 = vmatprep.subr.bf16.mxu1 %v5685_v45 }
 0x549   :  { %v1999_v54 = vpop.f32.mrb[76].mxu1  ;;  %2852 = vmatprep.mubr.bf16.mxu0 %v5689_v49  ;;  %2965 = vmatprep.mubr.bf16.mxu1 %v5689_v49 }
 0x54a   :  { %v2001_v55 = vpop.f32.mrb[77].mxu1  ;;  %2853 = vmatmul.mubr.bf16.gmra.mrb[104].mxu0 %v5687_v48  ;;  %2966 = vmatmul.mubr.bf16.gmra.mrb[104].mxu1 %v5687_v48  ;;  %v2060_v60 = vmax.f32 %v1999_v54, 0.0 }
 0x54b   :  { %3035 = vmatpush1.bf16.msra.mxu0 %v4723_v50  ;;  %v2003_v57 = vpop.f32.mrb[78].mxu1  ;;  %4349 = vmatpush3.bf16.msra.mxu1 %v5698_v51  ;;  %v2061_v0 = vmax.f32 %v2001_v55, 0.0  ;;  %v4745_v50 = vld [vmem:[%s6768_s8 + $0x240] ss:$28 sps:$4 sm:$0xff]  }
 0x54c   :  { %v2062_v61 = vmax.f32 %v2003_v57, 0.0  ;;  %v2005_v62 = vpop.f32.mrb[79].mxu1  ;;  %3036 = vmatprep.subr.bf16.mxu0 %v4728_v52  ;;  %4342 = vmatprep.subr.bf16.mxu1 %v5707_v53  ;;  %v4752_v52 = vld [vmem:[%s6768_s8 + $0x27c] ss:$28 sps:$4 sm:$0xff]  }
 0x54d   :  { %v2063_v1 = vmax.f32 %v2005_v62, 0.0  ;;  %v4750_v57 = vld [vmem:[%s6768_s8 + $0x278] ss:$28 sps:$4 sm:$0xff]  }
 0x54e   :  { %v5731_v2 = vpack.c.bf16 %v2062_v61, %v2060_v60  ;;  %v4757_v62 = vld [vmem:[%s6768_s8 + $0x2b4] ss:$28 sps:$4 sm:$0xff]  }
 0x54f   :  { %v5733_v4 = vpack.c.bf16 %v2063_v1, %v2061_v0  ;;  %3037 = vmatpush1.bf16.msra.mxu0 %v4726_v56  ;;  %4350 = vmatpush3.bf16.msra.mxu1 %v5723_v59 }
 0x550   :  { %3038 = vmatprep.subr.bf16.mxu0 %v4731_v58  ;;  %4343 = vmatprep.subr.bf16.mxu1 %v5729_v63 }
 0x551   :  { %v2009_v9 = vpop.f32.mrb[80].mxu1  ;;  %2862 = vmatprep.mubr.bf16.mxu0 %v5733_v4  ;;  %2975 = vmatprep.mubr.bf16.mxu1 %v5733_v4 }
 0x552   :  { %v2011_v10 = vpop.f32.mrb[81].mxu1  ;;  %2863 = vmatmul.mubr.bf16.gmra.mrb[108].mxu0 %v5731_v2  ;;  %2976 = vmatmul.mubr.bf16.gmra.mrb[108].mxu1 %v5731_v2  ;;  %v2064_v18 = vmax.f32 %v2009_v9, 0.0  ;;  %v4755_v9 = vld [vmem:[%s6768_s8 + $0x2b0] ss:$28 sps:$4 sm:$0xff]  }
 0x553   :  { %3039 = vmatpush1.bf16.msra.mxu0 %v4729_v5  ;;  %v2013_v11 = vpop.f32.mrb[82].mxu1  ;;  %4351 = vmatpush3.bf16.msra.mxu1 %v5742_v6  ;;  %v2065_v22 = vmax.f32 %v2011_v10, 0.0  ;;  %v4762_v10 = vld [vmem:[%s6768_s8 + $0x2ec] ss:$28 sps:$4 sm:$0xff]  }
 0x554   :  { %v2066_v19 = vmax.f32 %v2013_v11, 0.0  ;;  %v2015_v20 = vpop.f32.mrb[83].mxu1  ;;  %3040 = vmatprep.subr.bf16.mxu0 %v4734_v7  ;;  %4344 = vmatprep.subr.bf16.mxu1 %v5751_v8 }
 0x555   :  { %v2067_v24 = vmax.f32 %v2015_v20, 0.0 }
 0x556   :  { %v5770_v25 = vpack.c.bf16 %v2066_v19, %v2064_v18  ;;  %v4760_v19 = vld [vmem:[%s6768_s8 + $0x2e8] ss:$28 sps:$4 sm:$0xff]  }
 0x557   :  { %v5772_v26 = vpack.c.bf16 %v2067_v24, %v2065_v22  ;;  %3041 = vmatpush1.bf16.msra.mxu0 %v4732_v14  ;;  %4352 = vmatpush3.bf16.msra.mxu1 %v5764_v16  ;;  %v4767_v24 = vld [vmem:[%s6768_s8 + $0x324] ss:$28 sps:$4 sm:$0xff]  }
 0x558   :  { %3042 = vmatprep.subr.bf16.mxu0 %v4737_v21 }
 0x559   :  { %v2019_v32 = vpop.f32.mrb[84].mxu1  ;;  %2872 = vmatprep.mubr.bf16.mxu0 %v5772_v26  ;;  %2985 = vmatprep.mubr.bf16.mxu1 %v5772_v26 }
 0x55a   :  { %v2021_v34 = vpop.f32.mrb[85].mxu1  ;;  %2873 = vmatmul.mubr.bf16.gmra.mrb[112].mxu0 %v5770_v25  ;;  %2986 = vmatmul.mubr.bf16.gmra.mrb[112].mxu1 %v5770_v25  ;;  %v2068_v38 = vmax.f32 %v2019_v32, 0.0 }
 0x55b   :  { %3043 = vmatpush1.bf16.msra.mxu0 %v4735_v28  ;;  %v2023_v36 = vpop.f32.mrb[86].mxu1  ;;  %v2069_v43 = vmax.f32 %v2021_v34, 0.0 }
 0x55c   :  { %v2070_v39 = vmax.f32 %v2023_v36, 0.0  ;;  %v2025_v40 = vpop.f32.mrb[87].mxu1  ;;  %3044 = vmatprep.subr.bf16.mxu0 %v4742_v29  ;;  %v4765_v36 = vld [vmem:[%s6768_s8 + $0x320] ss:$28 sps:$4 sm:$0xff]  }
 0x55d   :  { %v2071_v44 = vmax.f32 %v2025_v40, 0.0 }
 0x55e   :  { %v5791_v46 = vpack.c.bf16 %v2070_v39, %v2068_v38  ;;  %v4770_v38 = vld [vmem:[%s6768_s8 + $0x358] ss:$28 sps:$4 sm:$0xff]  }
 0x55f   :  { %v5793_v47 = vpack.c.bf16 %v2071_v44, %v2069_v43  ;;  %3045 = vmatpush1.bf16.msra.mxu0 %v4740_v37  ;;  %v4772_v37 = vld [vmem:[%s6768_s8 + $0x35c] ss:$28 sps:$4 sm:$0xff]   ;;  %v3363_v44 = vld [vmem:[%s6761_s1 + $0x70] sm:$0xff] }
 0x560   :  { %3046 = vmatprep.subr.bf16.mxu0 %v4747_v42 }
 0x561   :  { %v2029_v54 = vpop.f32.mrb[88].mxu1  ;;  %2882 = vmatprep.mubr.bf16.mxu0 %v5793_v47  ;;  %2995 = vmatprep.mubr.bf16.mxu1 %v5793_v47 }
 0x562   :  { %v2031_v55 = vpop.f32.mrb[89].mxu1  ;;  %2883 = vmatmul.mubr.bf16.gmra.mrb[116].mxu0 %v5791_v46  ;;  %2996 = vmatmul.mubr.bf16.gmra.mrb[116].mxu1 %v5791_v46  ;;  %v2072_v58 = vmax.f32 %v2029_v54, 0.0 }
 0x563   :  { %3047 = vmatpush1.bf16.msra.mxu0 %v4745_v50  ;;  %v2033_v56 = vpop.f32.mrb[90].mxu1  ;;  %v2073_v0 = vmax.f32 %v2031_v55, 0.0 }
 0x564   :  { %v2074_v60 = vmax.f32 %v2033_v56, 0.0  ;;  %v2035_v61 = vpop.f32.mrb[91].mxu1  ;;  %3048 = vmatprep.subr.bf16.mxu0 %v4752_v52 }
 0x565   :  { %v2075_v1 = vmax.f32 %v2035_v61, 0.0 }
 0x566   :  { %v5811_v5 = vpack.c.bf16 %v2074_v60, %v2072_v58  ;;  %v3366_v58 = vld [vmem:[%s6761_s1 + $0x88] sm:$0xff] }
 0x567   :  { %v5813_v7 = vpack.c.bf16 %v2075_v1, %v2073_v0  ;;  %3049 = vmatpush1.bf16.msra.mxu0 %v4750_v57  ;;  %v3370_v60 = vld [vmem:[%s6761_s1 + $0xa8] sm:$0xff] }
 0x568   :  { %3050 = vmatprep.subr.bf16.mxu0 %v4757_v62 }
 0x569   :  { %v2039_v11 = vpop.f32.mrb[92].mxu1  ;;  %2892 = vmatprep.mubr.bf16.mxu0 %v5813_v7  ;;  %3005 = vmatprep.mubr.bf16.mxu1 %v5813_v7 }
 0x56a   :  { %v2041_v14 = vpop.f32.mrb[93].mxu1  ;;  %2893 = vmatmul.mubr.bf16.gmra.mrb[120].mxu0 %v5811_v5  ;;  %3006 = vmatmul.mubr.bf16.gmra.mrb[120].mxu1 %v5811_v5  ;;  %v2076_v20 = vmax.f32 %v2039_v11, 0.0 }
 0x56b   :  { %3051 = vmatpush1.bf16.msra.mxu0 %v4755_v9  ;;  %v2043_v18 = vpop.f32.mrb[94].mxu1  ;;  %v2077_v28 = vmax.f32 %v2041_v14, 0.0 }
 0x56c   :  { %v2078_v21 = vmax.f32 %v2043_v18, 0.0  ;;  %v2045_v22 = vpop.f32.mrb[95].mxu1  ;;  %3052 = vmatprep.subr.bf16.mxu0 %v4762_v10 }
 0x56d   :  { %v2079_v29 = vmax.f32 %v2045_v22, 0.0 }
 0x56e   :  { %v2094_v32 = vpack.c.bf16 %v2078_v21, %v2076_v20  ;;  %v3373_v20 = vld [vmem:[%s6761_s1 + $0xc0] sm:$0xff] }
 0x56f   :  { %v2095_v34 = vpack.c.bf16 %v2079_v29, %v2077_v28  ;;  %3053 = vmatpush1.bf16.msra.mxu0 %v4760_v19 }
 0x570   :  { %3054 = vmatprep.subr.bf16.mxu0 %v4767_v24 }
 0x571   :  { %2902 = vmatprep.mubr.bf16.mxu0 %v2095_v34  ;;  %3015 = vmatprep.mubr.bf16.mxu1 %v2095_v34 }
 0x572   :  { %2903 = vmatmul.mubr.bf16.gmra.mrb[124].mxu0 %v2094_v32  ;;  %3016 = vmatmul.mubr.bf16.gmra.mrb[124].mxu1 %v2094_v32 }
 0x573   :  { %3055 = vmatpush1.bf16.msra.mxu0 %v4765_v36  ;;  %3058 = vmatprep.mubr.bf16.mxu0 %v5603_v13 }
 0x574   :  { %3195 = vmatprep.mubr.bf16.mxu1 %v5733_v4  ;;  %3056 = vmatprep.subr.bf16.mxu0 %v4772_v37 }
 0x577   :  { %3057 = vmatpush1.bf16.msra.mxu0 %v4770_v38 }
 0x578   :  { %4273 = vmatprep.subr.bf16.mxu0 %v5598_v3  ;;  %v3349_v3 = vld [vmem:[%s6761_s1] sm:$0xff] }
 0x57a   :  { %3059 = vmatmul.mubr.bf16.vlgmr.msra.gmra.mrb[128].mxu0 %v5601_v12  ;;  %3196 = vmatmul.mubr.bf16.vlgmr.msra.gmra.mrb[128].mxu1 %v5731_v2 }
 0x57b   :  { %4274 = vmatpush3.bf16.msra.mxu0 %v5611_v15  ;;  %3068 = vmatprep.mubr.bf16.mxu0 %v5645_v31  ;;  %v3351_v15 = vld [vmem:[%s6761_s1 + $0x10] sm:$0xff] }
 0x57c   :  { %3203 = vmatprep.mubr.bf16.mxu1 %v5772_v26  ;;  %4275 = vmatprep.subr.bf16.mxu0 %v5619_v17 }
 0x57f   :  { %4276 = vmatpush3.bf16.msra.mxu0 %v5635_v23  ;;  %v3356_v23 = vld [vmem:[%s6761_s1 + $0x38] sm:$0xff] }
 0x580   :  { %4277 = vmatprep.subr.bf16.mxu0 %v5641_v27 }
 0x582   :  { %3069 = vmatmul.mubr.bf16.gmra.mrb[132].mxu0 %v5643_v30  ;;  %3204 = vmatmul.mubr.bf16.gmra.mrb[132].mxu1 %v5770_v25 }
 0x583   :  { %3078 = vmatprep.mubr.bf16.mxu0 %v5689_v49  ;;  %3211 = vmatprep.mubr.bf16.mxu1 %v5793_v47 }
 0x584   :  { %4278 = vmatpush3.bf16.msra.mxu0 %v5654_v33  ;;  %v3352_v33 = vld [vmem:[%s6761_s1 + $0x18] sm:$0xff] }
 0x585   :  { %4279 = vmatprep.subr.bf16.mxu0 %v5663_v35  ;;  %v3358_v35 = vld [vmem:[%s6761_s1 + $0x48] sm:$0xff] }
 0x588   :  { %4280 = vmatpush3.bf16.msra.mxu0 %v5679_v41  ;;  %v3357_v41 = vld [vmem:[%s6761_s1 + $0x40] sm:$0xff] }
 0x589   :  { %4281 = vmatprep.subr.bf16.mxu0 %v5685_v45 }
 0x58a   :  { %3079 = vmatmul.mubr.bf16.gmra.mrb[136].mxu0 %v5687_v48  ;;  %3212 = vmatmul.mubr.bf16.gmra.mrb[136].mxu1 %v5791_v46 }
 0x58b   :  { %3088 = vmatprep.mubr.bf16.mxu0 %v5733_v4  ;;  %3219 = vmatprep.mubr.bf16.mxu1 %v5813_v7 }
 0x58c   :  { %4282 = vmatpush3.bf16.msra.mxu0 %v5698_v51 }
 0x58d   :  { %4283 = vmatprep.subr.bf16.mxu0 %v5707_v53  ;;  %v3359_v53 = vld [vmem:[%s6761_s1 + $0x50] sm:$0xff] }
 0x590   :  { %4284 = vmatpush3.bf16.msra.mxu0 %v5723_v59 }
 0x591   :  { %4285 = vmatprep.subr.bf16.mxu0 %v5729_v63 }
 0x592   :  { %3089 = vmatmul.mubr.bf16.gmra.mrb[140].mxu0 %v5731_v2  ;;  %3220 = vmatmul.mubr.bf16.gmra.mrb[140].mxu1 %v5811_v5 }
 0x593   :  { %3098 = vmatprep.mubr.bf16.mxu0 %v5772_v26  ;;  %3227 = vmatprep.mubr.bf16.mxu1 %v2095_v34 }
 0x594   :  { %4286 = vmatpush3.bf16.msra.mxu0 %v5742_v6 }
 0x595   :  { %4287 = vmatprep.subr.bf16.mxu0 %v5751_v8 }
 0x598   :  { %4288 = vmatpush3.bf16.msra.mxu0 %v5764_v16 }
 0x59a   :  { %3099 = vmatmul.mubr.bf16.gmra.mrb[144].mxu0 %v5770_v25  ;;  %3228 = vmatmul.mubr.bf16.gmra.mrb[144].mxu1 %v2094_v32 }
 0x59b   :  { %3108 = vmatprep.mubr.bf16.mxu0 %v5793_v47  ;;  %v3364_v47 = vld [vmem:[%s6761_s1 + $0x78] sm:$0xff] }
 0x5a2   :  { %3109 = vmatmul.mubr.bf16.gmra.mrb[148].mxu0 %v5791_v46  ;;  %v3365_v46 = vld [vmem:[%s6761_s1 + $0x80] sm:$0xff] }
 0x5a3   :  { %3118 = vmatprep.mubr.bf16.mxu0 %v5813_v7  ;;  %v3371_v7 = vld [vmem:[%s6761_s1 + $0xb0] sm:$0xff] }
 0x5aa   :  { %3119 = vmatmul.mubr.bf16.gmra.mrb[152].mxu0 %v5811_v5  ;;  %v3372_v5 = vld [vmem:[%s6761_s1 + $0xb8] sm:$0xff] }
 0x5ab   :  { %3128 = vmatprep.mubr.bf16.mxu0 %v2095_v34 }
 0x5b2   :  { %3129 = vmatmul.mubr.bf16.gmra.mrb[156].mxu0 %v2094_v32 }
 0x5b3   :  { %3171 = vmatprep.mubr.bf16.mxu0 %v5603_v13 }
 0x5ba   :  { %3172 = vmatmul.mubr.bf16.vlgmr.msra.gmra.mrb[160].mxu0 %v5601_v12  ;;  %v3350_v12 = vld [vmem:[%s6761_s1 + $0x8] sm:$0xff] }
 0x5bb   :  { %3179 = vmatprep.mubr.bf16.mxu0 %v5645_v31 }
 0x5c2   :  { %3180 = vmatmul.mubr.bf16.gmra.mrb[164].mxu0 %v5643_v30 }
 0x5c3   :  { %3187 = vmatprep.mubr.bf16.mxu0 %v5689_v49 }
 0x5ca   :  { %3188 = vmatmul.mubr.bf16.gmra.mrb[168].mxu0 %v5687_v48 }
 0x60d   :  { %v2834_v13 = vpop.f32.mrb[96].mxu0  ;;  %v2947_v17 = vpop.f32.mrb[96].mxu1 }
 0x60e   :  { %3236 = vst [vmem:[%s6769_s9] sm:$0xff] %v2834_v13  ;;  %v3461_v27 = vsub.f32 %v3349_v3, %v2834_v13  ;;  %3238 = vst [vmem:[%s6769_s9 + $0x10] sm:$0xff] %v2947_v17  ;;  %v2836_v30 = vpop.f32.mrb[97].mxu0  ;;  %v2949_v31 = vpop.f32.mrb[97].mxu1  ;;  %v3463_v45 = vsub.f32 %v3351_v15, %v2947_v17  ;;  %v3377_v17 = vld [vmem:[%s6761_s1 + $0xe0] sm:$0xff] }
 0x60f   :  { %3237 = vst [vmem:[%s6769_s9 + $0x8] sm:$0xff] %v2836_v30  ;;  %v3462_v48 = vsub.f32 %v3350_v12, %v2836_v30  ;;  %3239 = vst [vmem:[%s6769_s9 + $0x18] sm:$0xff] %v2949_v31  ;;  %v2838_v49 = vpop.f32.mrb[98].mxu0  ;;  %v2951_v51 = vpop.f32.mrb[98].mxu1  ;;  %v3464_v8 = vsub.f32 %v3352_v33, %v2949_v31 }
 0x610   :  { %v3573_v59 = vmul.f32 %v3461_v27, %v3461_v27  ;;  %3244 = vst [vmem:[%s6769_s9 + $0x38] sm:$0xff] %v2838_v49  ;;  %v3468_v63 = vsub.f32 %v3356_v23, %v2838_v49  ;;  %3246 = vst [vmem:[%s6769_s9 + $0x48] sm:$0xff] %v2951_v51  ;;  %v2840_v2 = vpop.f32.mrb[99].mxu0  ;;  %v2953_v4 = vpop.f32.mrb[99].mxu1  ;;  %v3470_v16 = vsub.f32 %v3358_v35, %v2951_v51  ;;  %v3379_v23 = vld [vmem:[%s6761_s1 + $0xf0] sm:$0xff]  ;;  %v3378_v27 = vld [vmem:[%s6761_s1 + $0xe8] sm:$0xff] }
 0x611   :  { %v3574_v6 = vmul.f32 %v3462_v48, %v3462_v48  ;;  %3245 = vst [vmem:[%s6769_s9 + $0x40] sm:$0xff] %v2840_v2  ;;  %v3469_v25 = vsub.f32 %v3357_v41, %v2840_v2  ;;  %3247 = vst [vmem:[%s6769_s9 + $0x50] sm:$0xff] %v2953_v4  ;;  %v3471_v39 = vsub.f32 %v3359_v53, %v2953_v4  ;;  %v3380_v48 = vld [vmem:[%s6761_s1 + $0xf8] sm:$0xff]  ;;  %v3386_v2 = vld [vmem:[%s6761_s1 + $0x128] sm:$0xff] }
 0x612   :  { %v3580_v26 = vmul.f32 %v3468_v63, %v3468_v63  ;;  %v3575_v40 = vmul.f32 %v3463_v45, %v3463_v45  ;;  %v3576_v50 = vmul.f32 %v3464_v8, %v3464_v8  ;;  %v3582_v54 = vmul.f32 %v3470_v16, %v3470_v16  ;;  %v3384_v49 = vld [vmem:[%s6761_s1 + $0x118] sm:$0xff]  ;;  %v3385_v4 = vld [vmem:[%s6761_s1 + $0x120] sm:$0xff] }
 0x613   :  { %v3685_v42 = vadd.f32 %v3574_v6, %v3573_v59  ;;  %v3581_v43 = vmul.f32 %v3469_v25, %v3469_v25  ;;  %v3583_v61 = vmul.f32 %v3471_v39, %v3471_v39 }
 0x615   :  { %v3686_v52 = vadd.f32 %v3685_v42, %v3575_v40  ;;  %v3694_v55 = vadd.f32 %v3581_v43, %v3580_v26  ;;  %v2844_v56 = vpop.f32.mrb[100].mxu0  ;;  %v2957_v57 = vpop.f32.mrb[100].mxu1  ;;  %v3387_v40 = vld [vmem:[%s6761_s1 + $0x130] sm:$0xff] }
 0x616   :  { %3251 = vst [vmem:[%s6769_s9 + $0x70] sm:$0xff] %v2844_v56  ;;  %v3475_v62 = vsub.f32 %v3363_v44, %v2844_v56  ;;  %3253 = vst [vmem:[%s6769_s9 + $0x80] sm:$0xff] %v2957_v57  ;;  %v2846_v0 = vpop.f32.mrb[101].mxu0  ;;  %v2959_v1 = vpop.f32.mrb[101].mxu1  ;;  %v3477_v11 = vsub.f32 %v3365_v46, %v2957_v57 }
 0x617   :  { %v5959_v9 = vadd.f32 %v3686_v52, %v3576_v50  ;;  %v3695_v10 = vadd.f32 %v3694_v55, %v3582_v54  ;;  %3252 = vst [vmem:[%s6769_s9 + $0x78] sm:$0xff] %v2846_v0  ;;  %v3476_v14 = vsub.f32 %v3364_v47, %v2846_v0  ;;  %3254 = vst [vmem:[%s6769_s9 + $0x88] sm:$0xff] %v2959_v1  ;;  %v2848_v18 = vpop.f32.mrb[102].mxu0  ;;  %v2961_v19 = vpop.f32.mrb[102].mxu1  ;;  %v3393_v0 = vld [vmem:[%s6761_s1 + $0x160] sm:$0xff] }
 0x618   :  { %v3587_v21 = vmul.f32 %v3475_v62, %v3475_v62  ;;  %v3478_v22 = vsub.f32 %v3366_v58, %v2959_v1  ;;  %3258 = vst [vmem:[%s6769_s9 + $0xa8] sm:$0xff] %v2848_v18  ;;  %v3482_v24 = vsub.f32 %v3370_v60, %v2848_v18  ;;  %3260 = vst [vmem:[%s6769_s9 + $0xb8] sm:$0xff] %v2961_v19  ;;  %v2850_v28 = vpop.f32.mrb[103].mxu0  ;;  %v2963_v29 = vpop.f32.mrb[103].mxu1  ;;  %v3391_v62 = vld [vmem:[%s6761_s1 + $0x150] sm:$0xff]  ;;  %v3392_v1 = vld [vmem:[%s6761_s1 + $0x158] sm:$0xff] }
 0x619   :  { %v5976_v32 = vadd.f32 %v3695_v10, %v3583_v61  ;;  %v3588_v34 = vmul.f32 %v3476_v14, %v3476_v14  ;;  %v3484_v36 = vsub.f32 %v3372_v5, %v2961_v19  ;;  %3259 = vst [vmem:[%s6769_s9 + $0xb0] sm:$0xff] %v2850_v28  ;;  %v3483_v37 = vsub.f32 %v3371_v7, %v2850_v28  ;;  %v3394_v19 = vld [vmem:[%s6761_s1 + $0x168] sm:$0xff] }
 0x61a   :  { %3261 = vst [vmem:[%s6769_s9 + $0xc0] sm:$0xff] %v2963_v29  ;;  %v3594_v38 = vmul.f32 %v3482_v24, %v3482_v24  ;;  %v3485_v3 = vsub.f32 %v3373_v20, %v2963_v29  ;;  %v3589_v15 = vmul.f32 %v3477_v11, %v3477_v11  ;;  %v3590_v30 = vmul.f32 %v3478_v22, %v3478_v22  ;;  %v3398_v20 = vld [vmem:[%s6761_s1 + $0x188] sm:$0xff]  ;;  %v3400_v29 = vld [vmem:[%s6761_s1 + $0x198] sm:$0xff] }
 0x61b   :  { %v3703_v12 = vadd.f32 %v3588_v34, %v3587_v21  ;;  %v3595_v13 = vmul.f32 %v3483_v37, %v3483_v37  ;;  %v3596_v33 = vmul.f32 %v3484_v36, %v3484_v36  ;;  %v3399_v34 = vld [vmem:[%s6761_s1 + $0x190] sm:$0xff] }
 0x61c   :  { %v3597_v51 = vmul.f32 %v3485_v3, %v3485_v3 }
 0x61d   :  { %v3704_v31 = vadd.f32 %v3703_v12, %v3589_v15  ;;  %v3712_v35 = vadd.f32 %v3595_v13, %v3594_v38  ;;  %v2854_v41 = vpop.f32.mrb[104].mxu0  ;;  %v2967_v45 = vpop.f32.mrb[104].mxu1  ;;  %v3401_v13 = vld [vmem:[%s6761_s1 + $0x1a0] sm:$0xff] }
 0x61e   :  { %3265 = vst [vmem:[%s6769_s9 + $0xe0] sm:$0xff] %v2854_v41  ;;  %v3489_v53 = vsub.f32 %v3377_v17, %v2854_v41  ;;  %3267 = vst [vmem:[%s6769_s9 + $0xf0] sm:$0xff] %v2967_v45  ;;  %v2856_v59 = vpop.f32.mrb[105].mxu0  ;;  %v2969_v63 = vpop.f32.mrb[105].mxu1  ;;  %v3491_v16 = vsub.f32 %v3379_v23, %v2967_v45 }
 0x61f   :  { %v6011_v6 = vadd.f32 %v3704_v31, %v3590_v30  ;;  %v3713_v8 = vadd.f32 %v3712_v35, %v3596_v33  ;;  %3266 = vst [vmem:[%s6769_s9 + $0xe8] sm:$0xff] %v2856_v59  ;;  %v3490_v25 = vsub.f32 %v3378_v27, %v2856_v59  ;;  %3268 = vst [vmem:[%s6769_s9 + $0xf8] sm:$0xff] %v2969_v63  ;;  %v2858_v26 = vpop.f32.mrb[106].mxu0  ;;  %v2971_v39 = vpop.f32.mrb[106].mxu1 }
 0x620   :  { %v3601_v42 = vmul.f32 %v3489_v53, %v3489_v53  ;;  %v3492_v43 = vsub.f32 %v3380_v48, %v2969_v63  ;;  %3272 = vst [vmem:[%s6769_s9 + $0x118] sm:$0xff] %v2858_v26  ;;  %v3496_v44 = vsub.f32 %v3384_v49, %v2858_v26  ;;  %3274 = vst [vmem:[%s6769_s9 + $0x128] sm:$0xff] %v2971_v39  ;;  %v2860_v46 = vpop.f32.mrb[107].mxu0  ;;  %v2973_v47 = vpop.f32.mrb[107].mxu1  ;;  %v3405_v63 = vld [vmem:[%s6761_s1 + $0x1c0] sm:$0xff] }
 0x621   :  { %v6028_v50 = vadd.f32 %v3713_v8, %v3597_v51  ;;  %v3602_v52 = vmul.f32 %v3490_v25, %v3490_v25  ;;  %v3498_v54 = vsub.f32 %v3386_v2, %v2971_v39  ;;  %3273 = vst [vmem:[%s6769_s9 + $0x120] sm:$0xff] %v2860_v46  ;;  %v3497_v55 = vsub.f32 %v3385_v4, %v2860_v46  ;;  %v3407_v2 = vld [vmem:[%s6761_s1 + $0x1d0] sm:$0xff]  ;;  %v3406_v4 = vld [vmem:[%s6761_s1 + $0x1c8] sm:$0xff] }
 0x622   :  { %3275 = vst [vmem:[%s6769_s9 + $0x130] sm:$0xff] %v2973_v47  ;;  %v3608_v56 = vmul.f32 %v3496_v44, %v3496_v44  ;;  %v3499_v57 = vsub.f32 %v3387_v40, %v2973_v47  ;;  %v3603_v58 = vmul.f32 %v3491_v16, %v3491_v16  ;;  %v3604_v5 = vmul.f32 %v3492_v43, %v3492_v43  ;;  %v3412_v43 = vld [vmem:[%s6761_s1 + $0x1f8] sm:$0xff] }
 0x623   :  { %v3721_v60 = vadd.f32 %v3602_v52, %v3601_v42  ;;  %v3609_v61 = vmul.f32 %v3497_v55, %v3497_v55  ;;  %v3610_v10 = vmul.f32 %v3498_v54, %v3498_v54  ;;  %v3408_v42 = vld [vmem:[%s6761_s1 + $0x1d8] sm:$0xff]  ;;  %v3414_v54 = vld [vmem:[%s6761_s1 + $0x208] sm:$0xff]  ;;  %v3413_v55 = vld [vmem:[%s6761_s1 + $0x200] sm:$0xff] }
 0x624   :  { %v3611_v21 = vmul.f32 %v3499_v57, %v3499_v57 }
 0x625   :  { %v3722_v7 = vadd.f32 %v3721_v60, %v3603_v58  ;;  %v3730_v11 = vadd.f32 %v3609_v61, %v3608_v56  ;;  %v2864_v14 = vpop.f32.mrb[108].mxu0  ;;  %v2977_v18 = vpop.f32.mrb[108].mxu1 }
 0x626   :  { %3279 = vst [vmem:[%s6769_s9 + $0x150] sm:$0xff] %v2864_v14  ;;  %v3503_v22 = vsub.f32 %v3391_v62, %v2864_v14  ;;  %3281 = vst [vmem:[%s6769_s9 + $0x160] sm:$0xff] %v2977_v18  ;;  %v2866_v24 = vpop.f32.mrb[109].mxu0  ;;  %v2979_v28 = vpop.f32.mrb[109].mxu1  ;;  %v3505_v38 = vsub.f32 %v3393_v0, %v2977_v18  ;;  %v3415_v0 = vld [vmem:[%s6761_s1 + $0x210] sm:$0xff] }
 0x627   :  { %v6063_v36 = vadd.f32 %v3722_v7, %v3604_v5  ;;  %v3731_v37 = vadd.f32 %v3730_v11, %v3610_v10  ;;  %3280 = vst [vmem:[%s6769_s9 + $0x158] sm:$0xff] %v2866_v24  ;;  %v3504_v3 = vsub.f32 %v3392_v1, %v2866_v24  ;;  %3282 = vst [vmem:[%s6769_s9 + $0x168] sm:$0xff] %v2979_v28  ;;  %v2868_v15 = vpop.f32.mrb[110].mxu0  ;;  %v2981_v12 = vpop.f32.mrb[110].mxu1 }
 0x628   :  { %v3615_v17 = vmul.f32 %v3503_v22, %v3503_v22  ;;  %v3506_v23 = vsub.f32 %v3394_v19, %v2979_v28  ;;  %3286 = vst [vmem:[%s6769_s9 + $0x188] sm:$0xff] %v2868_v15  ;;  %v3510_v27 = vsub.f32 %v3398_v20, %v2868_v15  ;;  %3288 = vst [vmem:[%s6769_s9 + $0x198] sm:$0xff] %v2981_v12  ;;  %v2870_v30 = vpop.f32.mrb[111].mxu0  ;;  %v2983_v31 = vpop.f32.mrb[111].mxu1 }
 0x629   :  { %v6080_v33 = vadd.f32 %v3731_v37, %v3611_v21  ;;  %v3616_v35 = vmul.f32 %v3504_v3, %v3504_v3  ;;  %v3512_v41 = vsub.f32 %v3400_v29, %v2981_v12  ;;  %3287 = vst [vmem:[%s6769_s9 + $0x190] sm:$0xff] %v2870_v30  ;;  %v3511_v45 = vsub.f32 %v3399_v34, %v2870_v30  ;;  %v3419_v34 = vld [vmem:[%s6761_s1 + $0x230] sm:$0xff]  ;;  %v3421_v37 = vld [vmem:[%s6761_s1 + $0x240] sm:$0xff]  ;;  %v3426_v30 = vld [vmem:[%s6761_s1 + $0x268] sm:$0xff] }
 0x62a   :  { %3289 = vst [vmem:[%s6769_s9 + $0x1a0] sm:$0xff] %v2983_v31  ;;  %v3622_v48 = vmul.f32 %v3510_v27, %v3510_v27  ;;  %v3513_v49 = vsub.f32 %v3401_v13, %v2983_v31  ;;  %v3617_v51 = vmul.f32 %v3505_v38, %v3505_v38  ;;  %v3618_v8 = vmul.f32 %v3506_v23, %v3506_v23  ;;  %v3420_v38 = vld [vmem:[%s6761_s1 + $0x238] sm:$0xff]  ;;  %v3422_v27 = vld [vmem:[%s6761_s1 + $0x248] sm:$0xff] }
 0x62b   :  { %v3739_v53 = vadd.f32 %v3616_v35, %v3615_v17  ;;  %v3623_v59 = vmul.f32 %v3511_v45, %v3511_v45  ;;  %v3624_v25 = vmul.f32 %v3512_v41, %v3512_v41 }
 0x62c   :  { %v3625_v44 = vmul.f32 %v3513_v49, %v3513_v49  ;;  %v3427_v49 = vld [vmem:[%s6761_s1 + $0x270] sm:$0xff] }
 0x62d   :  { %v3740_v16 = vadd.f32 %v3739_v53, %v3617_v51  ;;  %v3748_v26 = vadd.f32 %v3623_v59, %v3622_v48  ;;  %v2874_v39 = vpop.f32.mrb[112].mxu0  ;;  %v2987_v40 = vpop.f32.mrb[112].mxu1  ;;  %v3428_v48 = vld [vmem:[%s6761_s1 + $0x278] sm:$0xff] }
 0x62e   :  { %3293 = vst [vmem:[%s6769_s9 + $0x1c0] sm:$0xff] %v2874_v39  ;;  %v3517_v46 = vsub.f32 %v3405_v63, %v2874_v39  ;;  %3295 = vst [vmem:[%s6769_s9 + $0x1d0] sm:$0xff] %v2987_v40  ;;  %v2876_v47 = vpop.f32.mrb[113].mxu0  ;;  %v2989_v52 = vpop.f32.mrb[113].mxu1  ;;  %v3519_v58 = vsub.f32 %v3407_v2, %v2987_v40 }
 0x62f   :  { %v6115_v56 = vadd.f32 %v3740_v16, %v3618_v8  ;;  %v3749_v57 = vadd.f32 %v3748_v26, %v3624_v25  ;;  %3294 = vst [vmem:[%s6769_s9 + $0x1c8] sm:$0xff] %v2876_v47  ;;  %v3518_v60 = vsub.f32 %v3406_v4, %v2876_v47  ;;  %3296 = vst [vmem:[%s6769_s9 + $0x1d8] sm:$0xff] %v2989_v52  ;;  %v2878_v61 = vpop.f32.mrb[114].mxu0  ;;  %v2991_v62 = vpop.f32.mrb[114].mxu1  ;;  %v3429_v8 = vld [vmem:[%s6761_s1 + $0x280] sm:$0xff] }
 0x630   :  { %v3629_v1 = vmul.f32 %v3517_v46, %v3517_v46  ;;  %v3520_v5 = vsub.f32 %v3408_v42, %v2989_v52  ;;  %3300 = vst [vmem:[%s6769_s9 + $0x1f8] sm:$0xff] %v2878_v61  ;;  %v3524_v7 = vsub.f32 %v3412_v43, %v2878_v61  ;;  %3302 = vst [vmem:[%s6769_s9 + $0x208] sm:$0xff] %v2991_v62  ;;  %v2880_v10 = vpop.f32.mrb[115].mxu0  ;;  %v2993_v11 = vpop.f32.mrb[115].mxu1  ;;  %v3434_v61 = vld [vmem:[%s6761_s1 + $0x2a8] sm:$0xff] }
 0x631   :  { %v6132_v14 = vadd.f32 %v3749_v57, %v3625_v44  ;;  %v3630_v18 = vmul.f32 %v3518_v60, %v3518_v60  ;;  %v3526_v19 = vsub.f32 %v3414_v54, %v2991_v62  ;;  %3301 = vst [vmem:[%s6769_s9 + $0x200] sm:$0xff] %v2880_v10  ;;  %v3525_v20 = vsub.f32 %v3413_v55, %v2880_v10  ;;  %v3435_v60 = vld [vmem:[%s6761_s1 + $0x2b0] sm:$0xff] }
 0x632   :  { %3303 = vst [vmem:[%s6769_s9 + $0x210] sm:$0xff] %v2993_v11  ;;  %v3636_v21 = vmul.f32 %v3524_v7, %v3524_v7  ;;  %v3527_v22 = vsub.f32 %v3415_v0, %v2993_v11  ;;  %v3631_v24 = vmul.f32 %v3519_v58, %v3519_v58  ;;  %v3632_v3 = vmul.f32 %v3520_v5, %v3520_v5  ;;  %v3433_v58 = vld [vmem:[%s6761_s1 + $0x2a0] sm:$0xff]  ;;  %v3436_v11 = vld [vmem:[%s6761_s1 + $0x2b8] sm:$0xff] }
 0x633   :  { %v3757_v28 = vadd.f32 %v3630_v18, %v3629_v1  ;;  %v3637_v29 = vmul.f32 %v3525_v20, %v3525_v20  ;;  %v3638_v12 = vmul.f32 %v3526_v19, %v3526_v19  ;;  %v3440_v18 = vld [vmem:[%s6761_s1 + $0x2d8] sm:$0xff] }
 0x634   :  { %v3639_v31 = vmul.f32 %v3527_v22, %v3527_v22 }
 0x635   :  { %v3758_v15 = vadd.f32 %v3757_v28, %v3631_v24  ;;  %v3766_v13 = vadd.f32 %v3637_v29, %v3636_v21  ;;  %v2884_v17 = vpop.f32.mrb[116].mxu0  ;;  %v2997_v23 = vpop.f32.mrb[116].mxu1  ;;  %v3442_v24 = vld [vmem:[%s6761_s1 + $0x2e8] sm:$0xff]  ;;  %v3441_v28 = vld [vmem:[%s6761_s1 + $0x2e0] sm:$0xff] }
 0x636   :  { %3307 = vst [vmem:[%s6769_s9 + $0x230] sm:$0xff] %v2884_v17  ;;  %v3531_v35 = vsub.f32 %v3419_v34, %v2884_v17  ;;  %3309 = vst [vmem:[%s6769_s9 + $0x240] sm:$0xff] %v2997_v23  ;;  %v2886_v41 = vpop.f32.mrb[117].mxu0  ;;  %v2999_v45 = vpop.f32.mrb[117].mxu1  ;;  %v3533_v59 = vsub.f32 %v3421_v37, %v2997_v23 }
 0x637   :  { %v6167_v51 = vadd.f32 %v3758_v15, %v3632_v3  ;;  %v3767_v53 = vadd.f32 %v3766_v13, %v3638_v12  ;;  %3308 = vst [vmem:[%s6769_s9 + $0x238] sm:$0xff] %v2886_v41  ;;  %v3532_v63 = vsub.f32 %v3420_v38, %v2886_v41  ;;  %3310 = vst [vmem:[%s6769_s9 + $0x248] sm:$0xff] %v2999_v45  ;;  %v2888_v2 = vpop.f32.mrb[118].mxu0  ;;  %v3001_v4 = vpop.f32.mrb[118].mxu1  ;;  %v3443_v12 = vld [vmem:[%s6761_s1 + $0x2f0] sm:$0xff] }
 0x638   :  { %v3643_v16 = vmul.f32 %v3531_v35, %v3531_v35  ;;  %v3534_v25 = vsub.f32 %v3422_v27, %v2999_v45  ;;  %3314 = vst [vmem:[%s6769_s9 + $0x268] sm:$0xff] %v2888_v2  ;;  %v3538_v26 = vsub.f32 %v3426_v30, %v2888_v2  ;;  %3316 = vst [vmem:[%s6769_s9 + $0x278] sm:$0xff] %v3001_v4  ;;  %v2890_v39 = vpop.f32.mrb[119].mxu0  ;;  %v3003_v40 = vpop.f32.mrb[119].mxu1  ;;  %v3447_v2 = vld [vmem:[%s6761_s1 + $0x310] sm:$0xff] }
 0x639   :  { %v6184_v42 = vadd.f32 %v3767_v53, %v3639_v31  ;;  %v3644_v43 = vmul.f32 %v3532_v63, %v3532_v63  ;;  %v3540_v44 = vsub.f32 %v3428_v48, %v3001_v4  ;;  %3315 = vst [vmem:[%s6769_s9 + $0x270] sm:$0xff] %v2890_v39  ;;  %v3539_v46 = vsub.f32 %v3427_v49, %v2890_v39  ;;  %v3449_v4 = vld [vmem:[%s6761_s1 + $0x320] sm:$0xff] }
 0x63a   :  { %3317 = vst [vmem:[%s6769_s9 + $0x280] sm:$0xff] %v3003_v40  ;;  %v3650_v47 = vmul.f32 %v3538_v26, %v3538_v26  ;;  %v3541_v52 = vsub.f32 %v3429_v8, %v3003_v40  ;;  %v3645_v54 = vmul.f32 %v3533_v59, %v3533_v59  ;;  %v3646_v62 = vmul.f32 %v3534_v25, %v3534_v25  ;;  %v3448_v8 = vld [vmem:[%s6761_s1 + $0x318] sm:$0xff] }
 0x63b   :  { %v3775_v55 = vadd.f32 %v3644_v43, %v3643_v16  ;;  %v3651_v57 = vmul.f32 %v3539_v46, %v3539_v46  ;;  %v3652_v1 = vmul.f32 %v3540_v44, %v3540_v44  ;;  %v3450_v44 = vld [vmem:[%s6761_s1 + $0x328] sm:$0xff] }
 0x63c   :  { %v3653_v19 = vmul.f32 %v3541_v52, %v3541_v52  ;;  %v3454_v46 = vld [vmem:[%s6761_s1 + $0x348] sm:$0xff] }
 0x63d   :  { %v3776_v0 = vadd.f32 %v3775_v55, %v3645_v54  ;;  %v3784_v5 = vadd.f32 %v3651_v57, %v3650_v47  ;;  %v2894_v7 = vpop.f32.mrb[120].mxu0  ;;  %v3007_v10 = vpop.f32.mrb[120].mxu1  ;;  %v3456_v57 = vld [vmem:[%s6761_s1 + $0x358] sm:$0xff] }
 0x63e   :  { %3321 = vst [vmem:[%s6769_s9 + $0x2a0] sm:$0xff] %v2894_v7  ;;  %v3545_v20 = vsub.f32 %v3433_v58, %v2894_v7  ;;  %3323 = vst [vmem:[%s6769_s9 + $0x2b0] sm:$0xff] %v3007_v10  ;;  %v2896_v21 = vpop.f32.mrb[121].mxu0  ;;  %v3009_v22 = vpop.f32.mrb[121].mxu1  ;;  %v3547_v37 = vsub.f32 %v3435_v60, %v3007_v10  ;;  %v3455_v58 = vld [vmem:[%s6761_s1 + $0x350] sm:$0xff]  ;;  %v3457_v7 = vld [vmem:[%s6761_s1 + $0x360] sm:$0xff] }
 0x63f   :  { %v6219_v29 = vadd.f32 %v3776_v0, %v3646_v62  ;;  %v3785_v34 = vadd.f32 %v3784_v5, %v3652_v1  ;;  %3322 = vst [vmem:[%s6769_s9 + $0x2a8] sm:$0xff] %v2896_v21  ;;  %v3546_v38 = vsub.f32 %v3434_v61, %v2896_v21  ;;  %3324 = vst [vmem:[%s6769_s9 + $0x2b8] sm:$0xff] %v3009_v22  ;;  %v2898_v3 = vpop.f32.mrb[122].mxu0  ;;  %v3011_v15 = vpop.f32.mrb[122].mxu1 }
 0x640   :  { %v3657_v13 = vmul.f32 %v3545_v20, %v3545_v20  ;;  %v3548_v17 = vsub.f32 %v3436_v11, %v3009_v22  ;;  %3328 = vst [vmem:[%s6769_s9 + $0x2d8] sm:$0xff] %v2898_v3  ;;  %v3552_v23 = vsub.f32 %v3440_v18, %v2898_v3  ;;  %3330 = vst [vmem:[%s6769_s9 + $0x2e8] sm:$0xff] %v3011_v15  ;;  %v2900_v27 = vpop.f32.mrb[123].mxu0  ;;  %v3013_v30 = vpop.f32.mrb[123].mxu1 }
 0x641   :  { %v6236_v31 = vadd.f32 %v3785_v34, %v3653_v19  ;;  %v3658_v35 = vmul.f32 %v3546_v38, %v3546_v38  ;;  %v3554_v41 = vsub.f32 %v3442_v24, %v3011_v15  ;;  %3329 = vst [vmem:[%s6769_s9 + $0x2e0] sm:$0xff] %v2900_v27  ;;  %v3553_v45 = vsub.f32 %v3441_v28, %v2900_v27 }
 0x642   :  { %3331 = vst [vmem:[%s6769_s9 + $0x2f0] sm:$0xff] %v3013_v30  ;;  %v3664_v48 = vmul.f32 %v3552_v23, %v3552_v23  ;;  %v3555_v49 = vsub.f32 %v3443_v12, %v3013_v30  ;;  %v3659_v53 = vmul.f32 %v3547_v37, %v3547_v37  ;;  %v3660_v16 = vmul.f32 %v3548_v17, %v3548_v17  ;;  %v3353_v12 = vld [vmem:[%s6761_s1 + $0x20] sm:$0xff] }
 0x643   :  { %v3793_v59 = vadd.f32 %v3658_v35, %v3657_v13  ;;  %v3665_v63 = vmul.f32 %v3553_v45, %v3553_v45  ;;  %v3666_v26 = vmul.f32 %v3554_v41, %v3554_v41  ;;  %v3354_v13 = vld [vmem:[%s6761_s1 + $0x28] sm:$0xff]  ;;  %v3360_v45 = vld [vmem:[%s6761_s1 + $0x58] sm:$0xff] }
 0x644   :  { %v3667_v47 = vmul.f32 %v3555_v49, %v3555_v49 }
 0x645   :  { %v3794_v25 = vadd.f32 %v3793_v59, %v3659_v53  ;;  %v3802_v39 = vadd.f32 %v3665_v63, %v3664_v48  ;;  %v2904_v40 = vpop.f32.mrb[124].mxu0  ;;  %v3017_v43 = vpop.f32.mrb[124].mxu1  ;;  %v3361_v63 = vld [vmem:[%s6761_s1 + $0x60] sm:$0xff] }
 0x646   :  { %3335 = vst [vmem:[%s6769_s9 + $0x310] sm:$0xff] %v2904_v40  ;;  %v3559_v52 = vsub.f32 %v3447_v2, %v2904_v40  ;;  %3337 = vst [vmem:[%s6769_s9 + $0x320] sm:$0xff] %v3017_v43  ;;  %v2906_v54 = vpop.f32.mrb[125].mxu0  ;;  %v3019_v55 = vpop.f32.mrb[125].mxu1  ;;  %v3561_v62 = vsub.f32 %v3449_v4, %v3017_v43 }
 0x647   :  { %v6271_v60 = vadd.f32 %v3794_v25, %v3660_v16  ;;  %v3803_v61 = vadd.f32 %v3802_v39, %v3666_v26  ;;  %3336 = vst [vmem:[%s6769_s9 + $0x318] sm:$0xff] %v2906_v54  ;;  %v3560_v0 = vsub.f32 %v3448_v8, %v2906_v54  ;;  %3338 = vst [vmem:[%s6769_s9 + $0x328] sm:$0xff] %v3019_v55  ;;  %v2908_v1 = vpop.f32.mrb[126].mxu0  ;;  %v3021_v5 = vpop.f32.mrb[126].mxu1 }
 0x648   :  { %v3671_v10 = vmul.f32 %v3559_v52, %v3559_v52  ;;  %v3562_v11 = vsub.f32 %v3450_v44, %v3019_v55  ;;  %3342 = vst [vmem:[%s6769_s9 + $0x348] sm:$0xff] %v2908_v1  ;;  %v3566_v18 = vsub.f32 %v3454_v46, %v2908_v1  ;;  %3344 = vst [vmem:[%s6769_s9 + $0x358] sm:$0xff] %v3021_v5  ;;  %v2910_v19 = vpop.f32.mrb[127].mxu0  ;;  %v3023_v20 = vpop.f32.mrb[127].mxu1 }
 0x649   :  { %v6288_v21 = vadd.f32 %v3803_v61, %v3667_v47  ;;  %v3672_v22 = vmul.f32 %v3560_v0, %v3560_v0  ;;  %v3568_v24 = vsub.f32 %v3456_v57, %v3021_v5  ;;  %3343 = vst [vmem:[%s6769_s9 + $0x350] sm:$0xff] %v2910_v19  ;;  %v3567_v28 = vsub.f32 %v3455_v58, %v2910_v19  ;;  %v3367_v61 = vld [vmem:[%s6761_s1 + $0x90] sm:$0xff] }
 0x64a   :  { %3345 = vst [vmem:[%s6769_s9 + $0x360] sm:$0xff] %v3023_v20  ;;  %v3678_v34 = vmul.f32 %v3566_v18, %v3566_v18  ;;  %v3569_v37 = vsub.f32 %v3457_v7, %v3023_v20  ;;  %v3673_v38 = vmul.f32 %v3561_v62, %v3561_v62  ;;  %v3674_v17 = vmul.f32 %v3562_v11, %v3562_v11  ;;  %v3374_v7 = vld [vmem:[%s6761_s1 + $0xc8] sm:$0xff]  ;;  %v3375_v18 = vld [vmem:[%s6761_s1 + $0xd0] sm:$0xff] }
 0x64b   :  { %v3811_v3 = vadd.f32 %v3672_v22, %v3671_v10  ;;  %v3679_v15 = vmul.f32 %v3567_v28, %v3567_v28  ;;  %v3680_v27 = vmul.f32 %v3568_v24, %v3568_v24 }
 0x64c   :  { %v3681_v48 = vmul.f32 %v3569_v37, %v3569_v37 }
 0x64d   :  { %v3812_v23 = vadd.f32 %v3811_v3, %v3673_v38  ;;  %v3820_v30 = vadd.f32 %v3679_v15, %v3678_v34  ;;  %v3060_v35 = vpop.f32.mrb[128].mxu0  ;;  %v4307_v41 = vpop.f32.mrb[128].mxu1 }
 0x64e   :  { %3240 = vst [vmem:[%s6769_s9 + $0x20] sm:$0xff] %v3060_v35  ;;  %v3465_v49 = vsub.f32 %v3353_v12, %v3060_v35  ;;  %v3062_v53 = vpop.f32.mrb[129].mxu0  ;;  %v4308_v59 = vpop.f32.mrb[129].mxu1 }
 0x64f   :  { %v6311_v2 = vadd.f32 %v3812_v23, %v3674_v17  ;;  %v3821_v4 = vadd.f32 %v3820_v30, %v3680_v27  ;;  %3241 = vst [vmem:[%s6769_s9 + $0x28] sm:$0xff] %v3062_v53  ;;  %v3466_v8 = vsub.f32 %v3354_v13, %v3062_v53  ;;  %v6316_v16 = vadd.f32 %v4308_v59, %v4307_v41  ;;  %v3064_v25 = vpop.f32.mrb[130].mxu0  ;;  %v4310_v26 = vpop.f32.mrb[130].mxu1  ;;  %v3381_v30 = vld [vmem:[%s6761_s1 + $0x100] sm:$0xff]  ;;  %v3382_v41 = vld [vmem:[%s6761_s1 + $0x108] sm:$0xff] }
 0x650   :  { %v3577_v39 = vmul.f32 %v3465_v49, %v3465_v49  ;;  %3248 = vst [vmem:[%s6769_s9 + $0x58] sm:$0xff] %v3064_v25  ;;  %v3472_v40 = vsub.f32 %v3360_v45, %v3064_v25  ;;  %v3066_v43 = vpop.f32.mrb[131].mxu0  ;;  %v4311_v44 = vpop.f32.mrb[131].mxu1  ;;  %v3388_v49 = vld [vmem:[%s6761_s1 + $0x138] sm:$0xff] }
 0x651   :  { %v6321_v46 = vadd.f32 %v3821_v4, %v3681_v48  ;;  %v3578_v47 = vmul.f32 %v3466_v8, %v3466_v8  ;;  %3285 = vst.msk [vmem:[%s6769_s9 + $0x180] sm:$0xff] %vm3242_vm2, %v6316_v16  ;;  %3249 = vst [vmem:[%s6769_s9 + $0x60] sm:$0xff] %v3066_v43  ;;  %v3473_v52 = vsub.f32 %v3361_v63, %v3066_v43 }
 0x652   :  { %v3688_v54 = vadd.f32 %v5959_v9, %v3577_v39  ;;  %v3584_v55 = vmul.f32 %v3472_v40, %v3472_v40  ;;  %v6332_v57 = vadd.f32 %v4311_v44, %v4310_v26  ;;  %v3368_v9 = vld [vmem:[%s6761_s1 + $0x98] sm:$0xff] }
 0x653   :  { %v3585_v58 = vmul.f32 %v3473_v52, %v3473_v52 }
 0x654   :  { %v3697_v62 = vadd.f32 %v5976_v32, %v3584_v55  ;;  %3292 = vst.msk [vmem:[%s6769_s9 + $0x1b8] sm:$0xff] %vm3242_vm2, %v6332_v57  ;;  %v6346_v0 = vadd.f32 %v3688_v54, %v3578_v47 }
 0x655   :  { %v3070_v1 = vpop.f32.mrb[132].mxu0  ;;  %v4313_v5 = vpop.f32.mrb[132].mxu1 }
 0x656   :  { %3255 = vst [vmem:[%s6769_s9 + $0x90] sm:$0xff] %v3070_v1  ;;  %v3479_v32 = vsub.f32 %v3367_v61, %v3070_v1  ;;  %v3072_v10 = vpop.f32.mrb[133].mxu0  ;;  %v4314_v11 = vpop.f32.mrb[133].mxu1  ;;  %v6357_v19 = vadd.f32 %v3697_v62, %v3585_v58  ;;  %v3397_v58 = vld [vmem:[%s6761_s1 + $0x180] sm:$0xff]  ;;  %v3395_v1 = vld [vmem:[%s6761_s1 + $0x170] sm:$0xff] }
 0x657   :  { %3256 = vst [vmem:[%s6769_s9 + $0x98] sm:$0xff] %v3072_v10  ;;  %v3480_v20 = vsub.f32 %v3368_v9, %v3072_v10  ;;  %v6362_v22 = vadd.f32 %v4314_v11, %v4313_v5  ;;  %v3074_v24 = vpop.f32.mrb[134].mxu0  ;;  %v4316_v28 = vpop.f32.mrb[134].mxu1  ;;  %v3404_v5 = vld [vmem:[%s6761_s1 + $0x1b8] sm:$0xff]  ;;  %v3509_v10 = vsub.f32 %v3397_v58, %v6316_v16 }
 0x658   :  { %v3591_v34 = vmul.f32 %v3479_v32, %v3479_v32  ;;  %3262 = vst [vmem:[%s6769_s9 + $0xc8] sm:$0xff] %v3074_v24  ;;  %v3486_v37 = vsub.f32 %v3374_v7, %v3074_v24  ;;  %v3076_v38 = vpop.f32.mrb[135].mxu0  ;;  %v4317_v3 = vpop.f32.mrb[135].mxu1  ;;  %v3516_v16 = vsub.f32 %v3404_v5, %v6332_v57 }
 0x659   :  { %v3592_v15 = vmul.f32 %v3480_v20, %v3480_v20  ;;  %3299 = vst.msk [vmem:[%s6769_s9 + $0x1f0] sm:$0xff] %vm3242_vm2, %v6362_v22  ;;  %3263 = vst [vmem:[%s6769_s9 + $0xd0] sm:$0xff] %v3076_v38  ;;  %v3487_v12 = vsub.f32 %v3375_v18, %v3076_v38  ;;  %v6375_v13 = vadd.f32 %v4317_v3, %v4316_v28  ;;  %v3402_v20 = vld [vmem:[%s6761_s1 + $0x1a8] sm:$0xff] }
 0x65a   :  { %v3706_v17 = vadd.f32 %v6011_v6, %v3591_v34  ;;  %v3598_v23 = vmul.f32 %v3486_v37, %v3486_v37  ;;  %v3403_v34 = vld [vmem:[%s6761_s1 + $0x1b0] sm:$0xff] }
 0x65b   :  { %v3599_v27 = vmul.f32 %v3487_v12, %v3487_v12  ;;  %3306 = vst.msk [vmem:[%s6769_s9 + $0x228] sm:$0xff] %vm3242_vm2, %v6375_v13 }
 0x65c   :  { %v3715_v35 = vadd.f32 %v6028_v50, %v3598_v23  ;;  %v6390_v45 = vadd.f32 %v3706_v17, %v3592_v15  ;;  %v3389_v50 = vld [vmem:[%s6761_s1 + $0x140] sm:$0xff] }
 0x65d   :  { %v3080_v6 = vpop.f32.mrb[136].mxu0  ;;  %v4319_v48 = vpop.f32.mrb[136].mxu1 }
 0x65e   :  { %3269 = vst [vmem:[%s6769_s9 + $0x100] sm:$0xff] %v3080_v6  ;;  %v3493_v53 = vsub.f32 %v3381_v30, %v3080_v6  ;;  %v3082_v59 = vpop.f32.mrb[137].mxu0  ;;  %v4320_v63 = vpop.f32.mrb[137].mxu1  ;;  %v6401_v4 = vadd.f32 %v3715_v35, %v3599_v27  ;;  %v3621_v6 = vmul.f32 %v3509_v10, %v3509_v10 }
 0x65f   :  { %3270 = vst [vmem:[%s6769_s9 + $0x108] sm:$0xff] %v3082_v59  ;;  %v3494_v8 = vsub.f32 %v3382_v41, %v3082_v59  ;;  %v6406_v25 = vadd.f32 %v4320_v63, %v4319_v48  ;;  %v3084_v26 = vpop.f32.mrb[138].mxu0  ;;  %v4322_v39 = vpop.f32.mrb[138].mxu1  ;;  %v3411_v48 = vld [vmem:[%s6761_s1 + $0x1f0] sm:$0xff]  ;;  %v3409_v63 = vld [vmem:[%s6761_s1 + $0x1e0] sm:$0xff] }
 0x660   :  { %v3605_v40 = vmul.f32 %v3493_v53, %v3493_v53  ;;  %3276 = vst [vmem:[%s6769_s9 + $0x138] sm:$0xff] %v3084_v26  ;;  %v3500_v43 = vsub.f32 %v3388_v49, %v3084_v26  ;;  %v3086_v44 = vpop.f32.mrb[139].mxu0  ;;  %v4323_v47 = vpop.f32.mrb[139].mxu1 }
 0x661   :  { %v3606_v52 = vmul.f32 %v3494_v8, %v3494_v8  ;;  %3313 = vst.msk [vmem:[%s6769_s9 + $0x260] sm:$0xff] %vm3242_vm2, %v6406_v25  ;;  %3277 = vst [vmem:[%s6769_s9 + $0x140] sm:$0xff] %v3086_v44  ;;  %v3501_v54 = vsub.f32 %v3389_v50, %v3086_v44  ;;  %v6419_v55 = vadd.f32 %v4323_v47, %v4322_v39  ;;  %v3418_v8 = vld [vmem:[%s6761_s1 + $0x228] sm:$0xff]  ;;  %v3416_v47 = vld [vmem:[%s6761_s1 + $0x218] sm:$0xff] }
 0x662   :  { %v3724_v61 = vadd.f32 %v6063_v36, %v3605_v40  ;;  %v3612_v62 = vmul.f32 %v3500_v43, %v3500_v43  ;;  %v3396_v36 = vld [vmem:[%s6761_s1 + $0x178] sm:$0xff]  ;;  %v3628_v50 = vmul.f32 %v3516_v16, %v3516_v16  ;;  %v3523_v40 = vsub.f32 %v3411_v48, %v6362_v22 }
 0x663   :  { %v3613_v9 = vmul.f32 %v3501_v54, %v3501_v54  ;;  %3320 = vst.msk [vmem:[%s6769_s9 + $0x298] sm:$0xff] %vm3242_vm2, %v6419_v55 }
 0x664   :  { %v3733_v7 = vadd.f32 %v6080_v33, %v3612_v62  ;;  %v6440_v32 = vadd.f32 %v3724_v61, %v3606_v52  ;;  %v3744_v52 = vsel %vm3242_vm2, %v3621_v6, 0.0  ;;  %v3753_v10 = vsel %vm3242_vm2, %v3628_v50, 0.0  ;;  %v3431_v50 = vld [vmem:[%s6761_s1 + $0x290] sm:$0xff] }
 0x665   :  { %v3090_v11 = vpop.f32.mrb[140].mxu0  ;;  %v4325_v18 = vpop.f32.mrb[140].mxu1 }
 0x666   :  { %3283 = vst [vmem:[%s6769_s9 + $0x170] sm:$0xff] %v3090_v11  ;;  %v3507_v24 = vsub.f32 %v3395_v1, %v3090_v11  ;;  %v3092_v33 = vpop.f32.mrb[141].mxu0  ;;  %v4326_v28 = vpop.f32.mrb[141].mxu1  ;;  %v6452_v37 = vadd.f32 %v3733_v7, %v3613_v9  ;;  %v3530_v9 = vsub.f32 %v3418_v8, %v6375_v13 }
 0x667   :  { %3284 = vst [vmem:[%s6769_s9 + $0x178] sm:$0xff] %v3092_v33  ;;  %v3508_v38 = vsub.f32 %v3396_v36, %v3092_v33  ;;  %v6458_v3 = vadd.f32 %v4326_v28, %v4325_v18  ;;  %v3094_v15 = vpop.f32.mrb[142].mxu0  ;;  %v4328_v12 = vpop.f32.mrb[142].mxu1  ;;  %v3635_v33 = vmul.f32 %v3523_v40, %v3523_v40 }
 0x668   :  { %v3619_v17 = vmul.f32 %v3507_v24, %v3507_v24  ;;  %3290 = vst [vmem:[%s6769_s9 + $0x1a8] sm:$0xff] %v3094_v15  ;;  %v3514_v23 = vsub.f32 %v3402_v20, %v3094_v15  ;;  %v3096_v27 = vpop.f32.mrb[143].mxu0  ;;  %v4329_v30 = vpop.f32.mrb[143].mxu1 }
 0x669   :  { %v3620_v35 = vmul.f32 %v3508_v38, %v3508_v38  ;;  %3327 = vst.msk [vmem:[%s6769_s9 + $0x2d0] sm:$0xff] %vm3242_vm2, %v6458_v3  ;;  %3291 = vst [vmem:[%s6769_s9 + $0x1b0] sm:$0xff] %v3096_v27  ;;  %v3515_v57 = vsub.f32 %v3403_v34, %v3096_v27  ;;  %v6471_v41 = vadd.f32 %v4329_v30, %v4328_v12  ;;  %v3425_v38 = vld [vmem:[%s6761_s1 + $0x260] sm:$0xff]  ;;  %v3423_v27 = vld [vmem:[%s6761_s1 + $0x250] sm:$0xff] }
 0x66a   :  { %v3626_v49 = vmul.f32 %v3514_v23, %v3514_v23  ;;  %v3742_v53 = vadd.f32 %v6115_v56, %v3619_v17  ;;  %v3410_v56 = vld [vmem:[%s6761_s1 + $0x1e8] sm:$0xff]  ;;  %v3642_v17 = vmul.f32 %v3530_v9, %v3530_v9  ;;  %v3432_v30 = vld [vmem:[%s6761_s1 + $0x298] sm:$0xff]  ;;  %v3537_v6 = vsub.f32 %v3425_v38, %v6406_v25  ;;  %v3437_v9 = vld [vmem:[%s6761_s1 + $0x2c0] sm:$0xff] }
 0x66b   :  { %v3627_v59 = vmul.f32 %v3515_v57, %v3515_v57  ;;  %3334 = vst.msk [vmem:[%s6769_s9 + $0x308] sm:$0xff] %vm3242_vm2, %v6471_v41  ;;  %v3544_v25 = vsub.f32 %v3432_v30, %v6419_v55 }
 0x66c   :  { %v3743_v26 = vadd.f32 %v3742_v53, %v3620_v35  ;;  %v3751_v39 = vadd.f32 %v6132_v14, %v3626_v49  ;;  %v3417_v14 = vld [vmem:[%s6761_s1 + $0x220] sm:$0xff]  ;;  %v3424_v35 = vld [vmem:[%s6761_s1 + $0x258] sm:$0xff]  ;;  %v3430_v49 = vld [vmem:[%s6761_s1 + $0x288] sm:$0xff]  ;;  %v3762_v53 = vsel %vm3242_vm2, %v3635_v33, 0.0 }
 0x66d   :  { %v3100_v43 = vpop.f32.mrb[144].mxu0  ;;  %v4331_v44 = vpop.f32.mrb[144].mxu1 }
 0x66e   :  { %3297 = vst [vmem:[%s6769_s9 + $0x1e0] sm:$0xff] %v3100_v43  ;;  %v3521_v54 = vsub.f32 %v3409_v63, %v3100_v43  ;;  %v3102_v58 = vpop.f32.mrb[145].mxu0  ;;  %v4332_v61 = vpop.f32.mrb[145].mxu1  ;;  %v3745_v62 = vadd.f32 %v3744_v52, %v3743_v26  ;;  %v3752_v22 = vadd.f32 %v3751_v39, %v3627_v59  ;;  %v3771_v39 = vsel %vm3242_vm2, %v3642_v17, 0.0 }
 0x66f   :  { %3298 = vst [vmem:[%s6769_s9 + $0x1e8] sm:$0xff] %v3102_v58  ;;  %v3522_v1 = vsub.f32 %v3410_v56, %v3102_v58  ;;  %v6507_v5 = vadd.f32 %v4332_v61, %v4331_v44  ;;  %v3104_v7 = vpop.f32.mrb[146].mxu0  ;;  %v4334_v36 = vpop.f32.mrb[146].mxu1  ;;  %v3649_v52 = vmul.f32 %v3537_v6, %v3537_v6  ;;  %v3439_v58 = vld [vmem:[%s6761_s1 + $0x2d0] sm:$0xff] }
 0x670   :  { %v3633_v11 = vmul.f32 %v3521_v54, %v3521_v54  ;;  %3304 = vst [vmem:[%s6769_s9 + $0x218] sm:$0xff] %v3104_v7  ;;  %v3528_v18 = vsub.f32 %v3416_v47, %v3104_v7  ;;  %v4335_v20 = vpop.f32.mrb[147].mxu1  ;;  %3746 = vadd.xlane.f32.xlu0 %v3745_v62  ;;  %v3106_v13 = vpop.f32.mrb[147].mxu0  ;;  %v3754_v24 = vadd.f32 %v3753_v10, %v3752_v22 }
 0x671   :  { %v3634_v28 = vmul.f32 %v3522_v1, %v3522_v1  ;;  %3341 = vst.msk [vmem:[%s6769_s9 + $0x340] sm:$0xff] %vm3242_vm2, %v6507_v5  ;;  %v6518_v34 = vadd.f32 %v4335_v20, %v4334_v36  ;;  %3305 = vst [vmem:[%s6769_s9 + $0x220] sm:$0xff] %v3106_v13  ;;  %v3529_v16 = vsub.f32 %v3417_v14, %v3106_v13  ;;  %v3446_v1 = vld [vmem:[%s6761_s1 + $0x308] sm:$0xff]  ;;  %v3780_v20 = vsel %vm3242_vm2, %v3649_v52, 0.0 }
 0x672   :  { %v3760_v15 = vadd.f32 %v6167_v51, %v3633_v11  ;;  %v3640_v12 = vmul.f32 %v3528_v18, %v3528_v18  ;;  %3755 = vadd.xlane.f32.xlu1 %v3754_v24  ;;  %v3656_v14 = vmul.f32 %v3544_v25, %v3544_v25  ;;  %v3438_v36 = vld [vmem:[%s6761_s1 + $0x2c8] sm:$0xff]  ;;  %v3444_v18 = vld [vmem:[%s6761_s1 + $0x2f8] sm:$0xff]  ;;  %v3445_v24 = vld [vmem:[%s6761_s1 + $0x300] sm:$0xff] }
 0x673   :  { %3348 = vst.msk [vmem:[%s6769_s9 + $0x378] sm:$0xff] %vm3242_vm2, %v6518_v34  ;;  %v3641_v23 = vmul.f32 %v3529_v16, %v3529_v16  ;;  %v3458_v25 = vld [vmem:[%s6761_s1 + $0x368] sm:$0xff] }
 0x674   :  { %v3769_v51 = vadd.f32 %v6184_v42, %v3640_v12  ;;  %v3761_v57 = vadd.f32 %v3760_v15, %v3634_v28  ;;  %v3558_v28 = vsub.f32 %v3446_v1, %v6471_v41  ;;  %v3789_v15 = vsel %vm3242_vm2, %v3656_v14, 0.0 }
 0x675   :  { %v3110_v48 = vpop.f32.mrb[148].mxu0 }
 0x676   :  { %3311 = vst [vmem:[%s6769_s9 + $0x250] sm:$0xff] %v3110_v48  ;;  %v3535_v59 = vsub.f32 %v3423_v27, %v3110_v48  ;;  %v3112_v42 = vpop.f32.mrb[149].mxu0  ;;  %v3763_v63 = vadd.f32 %v3762_v53, %v3761_v57  ;;  %v3770_v8 = vadd.f32 %v3769_v51, %v3641_v23  ;;  %v3670_v48 = vmul.f32 %v3558_v28, %v3558_v28  ;;  %v3451_v53 = vld [vmem:[%s6761_s1 + $0x330] sm:$0xff] }
 0x677   :  { %3312 = vst [vmem:[%s6769_s9 + $0x258] sm:$0xff] %v3112_v42  ;;  %v3536_v56 = vsub.f32 %v3424_v35, %v3112_v42  ;;  %v3114_v26 = vpop.f32.mrb[150].mxu0  ;;  %v3453_v35 = vld [vmem:[%s6761_s1 + $0x340] sm:$0xff] }
 0x678   :  { %v3647_v40 = vmul.f32 %v3535_v59, %v3535_v59  ;;  %3318 = vst [vmem:[%s6769_s9 + $0x288] sm:$0xff] %v3114_v26  ;;  %v3542_v43 = vsub.f32 %v3430_v49, %v3114_v26  ;;  %3764 = vadd.xlane.f32.xlu0 %v3763_v63  ;;  %v3116_v44 = vpop.f32.mrb[151].mxu0  ;;  %v3772_v47 = vadd.f32 %v3771_v39, %v3770_v8  ;;  %v3460_v59 = vld [vmem:[%s6761_s1 + $0x378] sm:$0xff]  ;;  %v3459_v39 = vld [vmem:[%s6761_s1 + $0x370] sm:$0xff]  ;;  %v3807_v52 = vsel %vm3242_vm2, %v3670_v48, 0.0 }
 0x679   :  { %v3648_v54 = vmul.f32 %v3536_v56, %v3536_v56  ;;  %3319 = vst [vmem:[%s6769_s9 + $0x290] sm:$0xff] %v3116_v44  ;;  %v3543_v55 = vsub.f32 %v3431_v50, %v3116_v44  ;;  %v3452_v63 = vld [vmem:[%s6761_s1 + $0x338] sm:$0xff] }
 0x67a   :  { %v3778_v61 = vadd.f32 %v6219_v29, %v3647_v40  ;;  %v3654_v62 = vmul.f32 %v3542_v43, %v3542_v43  ;;  %3773 = vadd.xlane.f32.xlu1 %v3772_v47  ;;  %v3551_v29 = vsub.f32 %v3439_v58, %v6458_v3  ;;  %v3572_v43 = vsub.f32 %v3460_v59, %v6518_v34  ;;  %v3376_v59 = vld [vmem:[%s6761_s1 + $0xd8] sm:$0xff] }
 0x67b   :  { %v3655_v22 = vmul.f32 %v3543_v55, %v3543_v55 }
 0x67c   :  { %v3787_v7 = vadd.f32 %v6236_v31, %v3654_v62  ;;  %v3779_v10 = vadd.f32 %v3778_v61, %v3648_v54  ;;  %v3663_v30 = vmul.f32 %v3551_v29, %v3551_v29  ;;  %v3684_v1 = vmul.f32 %v3572_v43, %v3572_v43 }
 0x67d   :  { %v3120_v11 = vpop.f32.mrb[152].mxu0 }
 0x67e   :  { %3325 = vst [vmem:[%s6769_s9 + $0x2c0] sm:$0xff] %v3120_v11  ;;  %v3549_v13 = vsub.f32 %v3437_v9, %v3120_v11  ;;  %v3122_v31 = vpop.f32.mrb[153].mxu0  ;;  %v6589_v33 = vadd.f32 %v3780_v20, %v3779_v10  ;;  %v3788_v3 = vadd.f32 %v3787_v7, %v3655_v22  ;;  %v3798_v56 = vsel %vm3242_vm2, %v3663_v30, 0.0  ;;  %v3355_v20 = vld [vmem:[%s6761_s1 + $0x30] sm:$0xff] }
 0x67f   :  { %3326 = vst [vmem:[%s6769_s9 + $0x2c8] sm:$0xff] %v3122_v31  ;;  %v3550_v16 = vsub.f32 %v3438_v36, %v3122_v31  ;;  %v3124_v38 = vpop.f32.mrb[154].mxu0 }
 0x680   :  { %v3661_v12 = vmul.f32 %v3549_v13, %v3549_v13  ;;  %3332 = vst [vmem:[%s6769_s9 + $0x2f8] sm:$0xff] %v3124_v38  ;;  %v3556_v17 = vsub.f32 %v3444_v18, %v3124_v38  ;;  %v3126_v23 = vpop.f32.mrb[155].mxu0  ;;  %v6599_v27 = vadd.f32 %v3789_v15, %v3788_v3 }
 0x681   :  { %v3662_v51 = vmul.f32 %v3550_v16, %v3550_v16  ;;  %3333 = vst [vmem:[%s6769_s9 + $0x300] sm:$0xff] %v3126_v23  ;;  %v3557_v41 = vsub.f32 %v3445_v24, %v3126_v23 }
 0x682   :  { %v3796_v57 = vadd.f32 %v6271_v60, %v3661_v12  ;;  %v3668_v6 = vmul.f32 %v3556_v17, %v3556_v17  ;;  %v3565_v60 = vsub.f32 %v3453_v35, %v6507_v5  ;;  %v3369_v35 = vld [vmem:[%s6761_s1 + $0xa0] sm:$0xff] }
 0x683   :  { %v3669_v49 = vmul.f32 %v3557_v41, %v3557_v41 }
 0x684   :  { %v3805_v42 = vadd.f32 %v6288_v21, %v3668_v6  ;;  %v3797_v50 = vadd.f32 %v3796_v57, %v3662_v51  ;;  %v3677_v62 = vmul.f32 %v3565_v60, %v3565_v60 }
 0x685   :  { %v3130_v8 = vpop.f32.mrb[156].mxu0 }
 0x686   :  { %3339 = vst [vmem:[%s6769_s9 + $0x330] sm:$0xff] %v3130_v8  ;;  %v3563_v26 = vsub.f32 %v3451_v53, %v3130_v8  ;;  %v3132_v21 = vpop.f32.mrb[157].mxu0  ;;  %v6629_v40 = vadd.f32 %v3798_v56, %v3797_v50  ;;  %v3806_v5 = vadd.f32 %v3805_v42, %v3669_v49  ;;  %v3816_v11 = vsel %vm3242_vm2, %v3677_v62, 0.0 }
 0x687   :  { %3340 = vst [vmem:[%s6769_s9 + $0x338] sm:$0xff] %v3132_v21  ;;  %v3564_v44 = vsub.f32 %v3452_v63, %v3132_v21  ;;  %v3134_v47 = vpop.f32.mrb[158].mxu0 }
 0x688   :  { %v3675_v54 = vmul.f32 %v3563_v26, %v3563_v26  ;;  %3346 = vst [vmem:[%s6769_s9 + $0x368] sm:$0xff] %v3134_v47  ;;  %v3570_v55 = vsub.f32 %v3458_v25, %v3134_v47  ;;  %v3136_v58 = vpop.f32.mrb[159].mxu0  ;;  %v6639_v61 = vadd.f32 %v3807_v52, %v3806_v5  ;;  %v3383_v26 = vld [vmem:[%s6761_s1 + $0x110] sm:$0xff]  ;;  %v3390_v47 = vld [vmem:[%s6761_s1 + $0x148] sm:$0xff] }
 0x689   :  { %v3676_v14 = vmul.f32 %v3564_v44, %v3564_v44  ;;  %3347 = vst [vmem:[%s6769_s9 + $0x370] sm:$0xff] %v3136_v58  ;;  %v3571_v34 = vsub.f32 %v3459_v39, %v3136_v58 }
 0x68a   :  { %v3814_v22 = vadd.f32 %v6311_v2, %v3675_v54  ;;  %v3682_v9 = vmul.f32 %v3570_v55, %v3570_v55  ;;  %v3825_v2 = vsel %vm3242_vm2, %v3684_v1, 0.0  ;;  %v3845_v1 = vlaneseq }
 0x68b   :  { %v3683_v7 = vmul.f32 %v3571_v34, %v3571_v34 }
 0x68c   :  { %v3823_v36 = vadd.f32 %v6321_v46, %v3682_v9  ;;  %v3815_v10 = vadd.f32 %v3814_v22, %v3676_v14  ;;  %v3362_v46 = vld [vmem:[%s6761_s1 + $0x68] sm:$0xff]  ;;  %s4800_s1 = smov [#allocation2]  }
 0x68d   :  { %v4289_v29 = vpop.f32.mrb[160].mxu0 }
 0x68e   :  { %v4290_v18 = vpop.f32.mrb[161].mxu0  ;;  %v6650_v13 = vadd.f32 %v3816_v11, %v3815_v10  ;;  %v3824_v31 = vadd.f32 %v3823_v36, %v3683_v7  ;;  %v6709_v36 = vand.u32 127, %v3845_v1 }
 0x68f   :  { %v4291_v24 = vadd.f32 %v4290_v18, %v4289_v29  ;;  %v4292_v3 = vpop.f32.mrb[162].mxu0 }
 0x690   :  { %v4293_v28 = vpop.f32.mrb[163].mxu0  ;;  %v3826_v16 = vadd.f32 %v3825_v2, %v3824_v31  ;;  %v3851_v29 = vadd.s32 4294967288, %v6709_v36  ;;  %v3893_v2 = vadd.s32 4294967240, %v6709_v36 }
 0x691   :  { %3243 = vst.msk [vmem:[%s6769_s9 + $0x30] sm:$0xff] %vm3242_vm2, %v4291_v24  ;;  %v3467_v38 = vsub.f32 %v3355_v20, %v4291_v24  ;;  %v4294_v15 = vadd.f32 %v4293_v28, %v4292_v3  ;;  %v3886_v3 = vadd.s32 4294967248, %v6709_v36  ;;  %v3879_v28 = vadd.s32 4294967256, %v6709_v36 }
 0x693   :  { %v3579_v12 = vmul.f32 %v3467_v38, %v3467_v38  ;;  %3250 = vst.msk [vmem:[%s6769_s9 + $0x68] sm:$0xff] %vm3242_vm2, %v4294_v15  ;;  %v3474_v17 = vsub.f32 %v3362_v46, %v4294_v15  ;;  %v3900_v38 = vadd.s32 4294967232, %v6709_v36 }
 0x695   :  { %v3586_v23 = vmul.f32 %v3474_v17, %v3474_v17  ;;  %v4295_v30 = vpop.f32.mrb[164].mxu0  ;;  %v3690_v51 = vsel %vm3242_vm2, %v3579_v12, 0.0  ;;  %v3907_v17 = vadd.s32 4294967224, %v6709_v36 }
 0x696   :  { %v4296_v41 = vpop.f32.mrb[165].mxu0  ;;  %v3691_v57 = vadd.f32 %v3690_v51, %v6346_v0 }
 0x697   :  { %v4297_v6 = vadd.f32 %v4296_v41, %v4295_v30  ;;  %v4298_v48 = vpop.f32.mrb[166].mxu0  ;;  %v3699_v49 = vsel %vm3242_vm2, %v3586_v23, 0.0 }
 0x698   :  { %v4299_v53 = vpop.f32.mrb[167].mxu0  ;;  %3692 = vadd.xlane.f32.xlu0 %v3691_v57  ;;  %v3700_v42 = vadd.f32 %v3699_v49, %v6357_v19  ;;  %v3921_v49 = vadd.s32 4294967208, %v6709_v36 }
 0x699   :  { %3257 = vst.msk [vmem:[%s6769_s9 + $0xa0] sm:$0xff] %vm3242_vm2, %v4297_v6  ;;  %v3481_v63 = vsub.f32 %v3369_v35, %v4297_v6  ;;  %v4300_v50 = vadd.f32 %v4299_v53, %v4298_v48  ;;  %v3914_v48 = vadd.s32 4294967216, %v6709_v36 }
 0x69b   :  { %v3593_v0 = vmul.f32 %v3481_v63, %v3481_v63  ;;  %3264 = vst.msk [vmem:[%s6769_s9 + $0xd8] sm:$0xff] %vm3242_vm2, %v4300_v50  ;;  %v3488_v60 = vsub.f32 %v3376_v59, %v4300_v50  ;;  %v3928_v63 = vadd.s32 4294967200, %v6709_v36 }
 0x69c   :  { %3701 = vadd.xlane.f32.xlu0 %v3700_v42 }
 0x69d   :  { %v3600_v8 = vmul.f32 %v3488_v60, %v3488_v60  ;;  %v4301_v25 = vpop.f32.mrb[168].mxu0  ;;  %v3708_v56 = vsel %vm3242_vm2, %v3593_v0, 0.0 }
 0x69e   :  { %v4302_v19 = vpop.f32.mrb[169].mxu0  ;;  %v3709_v21 = vadd.f32 %v3708_v56, %v6390_v45  ;;  %v3935_v56 = vadd.s32 4294967192, %v6709_v36 }
 0x69f   :  { %v4303_v39 = vadd.f32 %v4302_v19, %v4301_v25  ;;  %v4304_v5 = vpop.f32.mrb[170].mxu0  ;;  %v3717_v43 = vsel %vm3242_vm2, %v3600_v8, 0.0 }
 0x6a0   :  { %v4305_v44 = vpop.f32.mrb[171].mxu0  ;;  %3710 = vadd.xlane.f32.xlu1 %v3709_v21  ;;  %v3718_v52 = vadd.f32 %v3717_v43, %v6401_v4 }
 0x6a1   :  { %3271 = vst.msk [vmem:[%s6769_s9 + $0x110] sm:$0xff] %vm3242_vm2, %v4303_v39  ;;  %v3495_v54 = vsub.f32 %v3383_v26, %v4303_v39  ;;  %v4306_v55 = vadd.f32 %v4305_v44, %v4304_v5 }
 0x6a3   :  { %v3607_v45 = vmul.f32 %v3495_v54, %v3495_v54  ;;  %3278 = vst.msk [vmem:[%s6769_s9 + $0x148] sm:$0xff] %vm3242_vm2, %v4306_v55  ;;  %v3502_v58 = vsub.f32 %v3390_v47, %v4306_v55  ;;  %v3942_v47 = vadd.s32 4294967184, %v6709_v36  ;;  %s3966_s9 = sshll.u32 %s4800_s1, 4  ;;  %s3967_s9 = int_to_ptr.vmem [resolvable:$true] %s3966_s9 }
 0x6a4   :  { %3719 = vadd.xlane.f32.xlu1 %v3718_v52  ;;  %s4775_s8 = scalar_lea.vmem %s3967_s9, 16  ;;  %s4779_s7 = scalar_lea.vmem %s3967_s9, 32 }
 0x6a5   :  { %v3614_v62 = vmul.f32 %v3502_v58, %v3502_v58  ;;  %v3726_v14 = vsel %vm3242_vm2, %v3607_v45, 0.0  ;;  %p4776_p0 = scmp.ne.s32.totalorder %s3967_s9, %s4775_s8  ;;  %p4780_p1 = scmp.lt.s32.totalorder %s3967_s9, %s3967_s9 }
 0x6a6   :  { %v3727_v4 = vadd.f32 %v3726_v14, %v6440_v32  ;;  %v3949_v14 = vadd.s32 4294967176, %v6709_v36  ;;  %p4781_p2 = scmp.lt.s32.totalorder %s4779_s7, %s4775_s8 }
 0x6a7   :  { %v3735_v34 = vsel %vm3242_vm2, %v3614_v62, 0.0 }
 0x6a8   :  { %3728 = vadd.xlane.f32.xlu0 %v3727_v4  ;;  %v3736_v22 = vadd.f32 %v3735_v34, %v6452_v37  ;;  %p4782_p3 = por %p4781_p2, %p4780_p1 }
 0x6aa   :  { %3737 = vadd.xlane.f32.xlu1 %v3736_v22  ;;  %p4783_p4 = pnand %p4782_p3, %p4776_p0 }
 0x6ac   :  { %3782 = vadd.xlane.f32.xlu0 %v6589_v33  ;;  %v3858_v33 = vadd.s32 4294967280, %v6709_v36 }
 0x6ae   :  { %3791 = vadd.xlane.f32.xlu1 %v6599_v27  ;;  %v6713_v27 = vshrl.u32 %v3845_v1, 7 }
 0x6b0   :  { %3800 = vadd.xlane.f32.xlu0 %v6629_v40  ;;  %v3865_v40 = vadd.s32 4294967272, %v6709_v36  ;;  %v3861_v20 = vsub.s32 %v3858_v33, %v6713_v27  ;;  %v3849_v31 = vsub.s32 %v6709_v36, %v6713_v27  ;;  %v3889_v51 = vsub.s32 %v3886_v3, %v6713_v27 }
 0x6b1   :  { %v3896_v41 = vsub.s32 %v3893_v2, %v6713_v27  ;;  %v3882_v35 = vsub.s32 %v3879_v28, %v6713_v27  ;;  %v3903_v53 = vsub.s32 %v3900_v38, %v6713_v27  ;;  %v3910_v50 = vsub.s32 %v3907_v17, %v6713_v27 }
 0x6b2   :  { %3809 = vadd.xlane.f32.xlu1 %v6639_v61  ;;  %v3854_v61 = vsub.s32 %v3851_v29, %v6713_v27  ;;  %v3868_v24 = vsub.s32 %v3865_v40, %v6713_v27  ;;  %v3917_v26 = vsub.s32 %v3914_v48, %v6713_v27  ;;  %v3924_v39 = vsub.s32 %v3921_v49, %v6713_v27 }
 0x6b3   :  { %v3931_v44 = vsub.s32 %v3928_v63, %v6713_v27  ;;  %v3938_v62 = vsub.s32 %v3935_v56, %v6713_v27  ;;  %v3952_v40 = vsub.s32 %v3949_v14, %v6713_v27 }
 0x6b4   :  { %3818 = vadd.xlane.f32.xlu0 %v6650_v13  ;;  %v3872_v13 = vadd.s32 4294967264, %v6709_v36 }
 0x6b6   :  { %3827 = vadd.xlane.f32.xlu1 %v3826_v16  ;;  %v3875_v12 = vsub.s32 %v3872_v13, %v6713_v27 }
 0x6fd   :  { %v3747_v9 = vpop.xlane.xlu0 %3746 }
 0x6fe   :  { %v3890_v19 = vrot.slane %v3747_v9, %v3889_v51 }
 0x6ff   :  { %v3756_v7 = vpop.xlane.xlu1 %3755 }
 0x700   :  { %v3897_v5 = vrot.slane %v3756_v7, %v3896_v41  ;;  %v3945_v7 = vsub.s32 %v3942_v47, %v6713_v27 }
 0x705   :  { %v3765_v32 = vpop.xlane.xlu0 %3764 }
 0x706   :  { %v3904_v52 = vrot.slane %v3765_v32, %v3903_v53 }
 0x707   :  { %v3774_v37 = vpop.xlane.xlu1 %3773 }
 0x708   :  { %v3911_v45 = vrot.slane %v3774_v37, %v3910_v50 }
 0x725   :  { %v3693_v10 = vpop.xlane.xlu0 %3692 }
 0x726   :  { %v3850_v23 = vrot.slane %v3693_v10, %v3849_v31 }
 0x729   :  { %v3702_v18 = vpop.xlane.xlu0 %3701 }
 0x72a   :  { %v3855_v46 = vrot.slane %v3702_v18, %v3854_v61 }
 0x72c   :  { %v3857_v57 = vsel %vm3856_vm3, %v3855_v46, %v3850_v23 }
 0x72d   :  { %v3711_v11 = vpop.xlane.xlu1 %3710 }
 0x72e   :  { %v3862_v15 = vrot.slane %v3711_v11, %v3861_v20 }
 0x730   :  { %v3864_v59 = vsel %vm3863_vm4, %v3862_v15, %v3857_v57 }
 0x731   :  { %v3720_v16 = vpop.xlane.xlu1 %3719 }
 0x732   :  { %v3869_v30 = vrot.slane %v3720_v16, %v3868_v24 }
 0x734   :  { %v3871_v0 = vsel %vm3870_vm5, %v3869_v30, %v3864_v59 }
 0x735   :  { %v3729_v6 = vpop.xlane.xlu0 %3728 }
 0x736   :  { %v3876_v42 = vrot.slane %v3729_v6, %v3875_v12 }
 0x737   :  { %v3738_v60 = vpop.xlane.xlu1 %3737 }
 0x738   :  { %v3878_v8 = vsel %vm3877_vm6, %v3876_v42, %v3871_v0  ;;  %v3883_v25 = vrot.slane %v3738_v60, %v3882_v35 }
 0x739   :  { %v3783_v21 = vpop.xlane.xlu0 %3782 }
 0x73a   :  { %v3885_v43 = vsel %vm3884_vm7, %v3883_v25, %v3878_v8  ;;  %v3918_v34 = vrot.slane %v3783_v21, %v3917_v26 }
 0x73b   :  { %v3892_v54 = vsel %vm3891_vm8, %v3890_v19, %v3885_v43  ;;  %v3792_v55 = vpop.xlane.xlu1 %3791 }
 0x73c   :  { %v3899_v58 = vsel %vm3898_vm9, %v3897_v5, %v3892_v54  ;;  %v3925_v1 = vrot.slane %v3792_v55, %v3924_v39 }
 0x73d   :  { %v3906_v4 = vsel %vm3905_vm10, %v3904_v52, %v3899_v58  ;;  %v3801_v22 = vpop.xlane.xlu0 %3800 }
 0x73e   :  { %v3913_v9 = vsel %vm3912_vm11, %v3911_v45, %v3906_v4  ;;  %v3932_v32 = vrot.slane %v3801_v22, %v3931_v44 }
 0x73f   :  { %v3920_v10 = vsel %vm3919_vm12, %v3918_v34, %v3913_v9  ;;  %v3810_v37 = vpop.xlane.xlu1 %3809 }
 0x740   :  { %v3927_v29 = vsel %vm3926_vm13, %v3925_v1, %v3920_v10  ;;  %v3939_v33 = vrot.slane %v3810_v37, %v3938_v62 }
 0x741   :  { %v3934_v61 = vsel %vm3933_vm14, %v3932_v32, %v3927_v29  ;;  %v3819_v36 = vpop.xlane.xlu0 %3818 }
 0x742   :  { %v3941_v11 = vsel %vm3940_vm15, %v3939_v33, %v3934_v61  ;;  %v3946_v18 = vrot.slane %v3819_v36, %v3945_v7 }
 0x743   :  { %v3828_v20 = vpop.xlane.xlu1 %3827 }
 0x744   :  { %v3953_v13 = vrot.slane %v3828_v20, %v3952_v40  ;;  %v3948_v31 = vsel %vm3947_vm0, %v3946_v18, %v3941_v11 }
 0x746   :  { %v3955_v24 = vsel %vm3954_vm1, %v3953_v13, %v3948_v31 }
 0x747   :  { %3957 = vst [vmem:[#allocation2] sm:$0x1] %v3955_v24 }
 0x748   :  { %4786 = shalt.err (!%p4783_p4)
}
 0x749   :  { %s4787_s21 = scalar_lea.hbm %s6770_s10, 16 }
 0x74a   :  { %p4788_p5 = scmp.ne.s32.totalorder %s6770_s10, %s4787_s21  ;;  %p4791_p6 = scmp.lt.u32.totalorder %s4787_s21, %s6770_s10 }
 0x74c   :  { %p4793_p7 = pnand %p4791_p6, %p4788_p5 }
 0x74e   :  { %4796 = shalt.err (!%p4793_p7)
}
 0x74f   :  { %3969 = dma.vmem_to_hbm [thread:$0]  %s3967_s9, 16, %s6770_s10, [#allocation3]  }
 0x750   :  { %4797 = dma.done.wait [#allocation3], 16  }
 0x751   :  { %4798 = vsyncadd [#allocation3], 4294967280 }
 0x752   :  { %3975 = vsyncpa [#allocation3], 1 }

</bundles_post_ra>
